<compile_context>
chip_gen: v7x
topology: tpu7x:2x2x1
jax: 0.10.0
libtpu: 0.0.40
codegen_flags: <defaults>
</compile_context>

<pallas_src>
import functools

import numpy as np
import jax
import jax.numpy as jnp
from jax import lax
from jax.experimental import pallas as pl
from jax.experimental.pallas import tpu as pltpu

MAX_COUNT = 200  # Head.emb has 200 rows; counts are clipped to [15, 200]


def _full_spec(shape):
    nd = len(shape)
    return pl.BlockSpec(shape, lambda i, _nd=nd: (0,) * _nd)


# ------------------------- single fused forward kernel ----------------------

def _net_kernel(x_ref,
                w1_ref, b1_ref, w2_ref, b2_ref, wg_ref, bg_ref, wl_ref, bl_ref,
                ma1w_hbm, ma1b_ref, ma1g_ref, ma1be_ref,
                ma2w_hbm, ma2b_ref, ma2g_ref, ma2be_ref,
                malw_ref, malb_ref,
                embrep_ref, fsel_ref, sum3_ref, meanb_ref,
                r_ref, kpa_ref, kpcd_ref, macnt_ref,
                ma1_vmem, ma2_vmem, dma_sem,
                *, B, N, k, pairs):
    f32 = jnp.float32

    # Kick off the big (bf16) MA weight DMAs first so they overlap with the
    # backbone / head compute below.
    cp1 = pltpu.make_async_copy(ma1w_hbm, ma1_vmem, dma_sem.at[0])
    cp2 = pltpu.make_async_copy(ma2w_hbm, ma2_vmem, dma_sem.at[1])
    cp1.start()
    cp2.start()

    x = x_ref[...]                                       # [B*N, 3]
    f9 = jnp.concatenate([x, x, x], axis=-1)             # cat([x,x,x], -1) -> [B*N, 9]

    # ---- backbone (PointNetPP stand-in), full [B*N, .] slabs on the MXU ----
    h = jnp.dot(f9, w1_ref[...], preferred_element_type=f32) + b1_ref[...]
    h = jnp.maximum(h, 0.0)                                                   # [B*N, 64]
    kp = jnp.dot(h, w2_ref[...], preferred_element_type=f32) + b2_ref[...]    # [B*N, k]
    gf = jnp.dot(f9, wg_ref[...], preferred_element_type=f32) + bg_ref[...]
    gf = jnp.maximum(gf, 0.0)                                                 # [B*N, 1024]
    kpl = jnp.dot(kp, wl_ref[...], preferred_element_type=f32) + bl_ref[...]  # [B*N, k]

    kpa_blocks, kpcd_blocks, gfp_rows = [], [], []
    for b in range(B):
        sl = slice(b * N, (b + 1) * N)
        # GF max-pool over the N points of this batch (sublane reduce, no transpose)
        gfp_rows.append(jnp.max(gf[sl, :], axis=0, keepdims=True))            # [1, 1024]

        # PT_L output -> softmax over the N axis (keep [N, k] layout)
        kpl_b = kpl[sl, :]                                                    # [N, k]
        mx = jnp.max(kpl_b, axis=0, keepdims=True)
        ex = jnp.exp(kpl_b - mx)
        a_b = ex / jnp.sum(ex, axis=0, keepdims=True)                         # [N, k] == KPA[b].T
        kpa_blocks.append(a_b)

        # KPCD[b] = KPA[b] @ x[b]  (single contraction over the N axis)
        kpcd_b = lax.dot_general(a_b, x[sl, :], (((0,), (0,)), ((), ())),
                                 preferred_element_type=f32)                  # [k, 3]
        kpcd_blocks.append(kpcd_b)

    kpa_ref[...] = jnp.concatenate(kpa_blocks, axis=0)      # one store  [B*N, k]
    kpcd_ref[...] = jnp.concatenate(kpcd_blocks, axis=0)    # one store  [B*k, 3]

    # ---- heads: vectorized over (pair, batch) in the lane dimension ---------
    a_pieces, b_pieces = [], []
    for (i, j) in pairs:
        for b in range(B):
            a_pieces.append(kpcd_blocks[b][i:i + 1, :])
            b_pieces.append(kpcd_blocks[b][j:j + 1, :])
    a_row = jnp.concatenate(a_pieces, axis=1)                # [1, P*B*3]
    b_row = jnp.concatenate(b_pieces, axis=1)                # [1, P*B*3]

    diff = a_row - b_row
    sumsq = jnp.dot(diff * diff, sum3_ref[...], preferred_element_type=f32)   # [1, P*B]
    per_b = jnp.sqrt(0.001 + sumsq)
    dist = jnp.dot(per_b, meanb_ref[...], preferred_element_type=f32)         # [1, P]
    cnt_row = jnp.clip(jnp.floor(dist / 0.01), 15.0, float(MAX_COUNT))        # [1, P]

    iota = lax.broadcasted_iota(jnp.int32, (MAX_COUNT, 1), 0).astype(f32)
    f = iota / (cnt_row - 1.0)                                                # [200, P]
    f_rep = jnp.dot(f, fsel_ref[...], preferred_element_type=f32)             # [200, P*B*3]
    # R[(p,b)] = emb_p + kpcd[b,i_p]*f_p + kpcd[b,j_p]*(1-f_p), all pairs at once
    r_ref[...] = embrep_ref[...] + b_row + (a_row - b_row) * f_rep            # one store

    # ---- MA branch: GFP -> PBlock(1024,512,256) -> Linear -> sigmoid --------
    gfp = jnp.concatenate(gfp_rows, axis=0)                                   # [B, 1024]
    cp1.wait()
    cp2.wait()

    def lin_bn_relu(xv, w_bf16, b_r, g_r, be_r):
        y = jnp.dot(xv.astype(jnp.bfloat16), w_bf16,
                    preferred_element_type=f32) + b_r[...]
        mu = jnp.mean(y, axis=0, keepdims=True)            # BatchNorm1d, training stats
        var = jnp.mean(jnp.square(y - mu), axis=0, keepdims=True)
        y = (y - mu) * lax.rsqrt(var + 1e-5)
        return jnp.maximum(y * g_r[...] + be_r[...], 0.0)

    h1 = lin_bn_relu(gfp, ma1_vmem[...], ma1b_ref, ma1g_ref, ma1be_ref)       # [B, 512]
    h2 = lin_bn_relu(h1, ma2_vmem[...], ma2b_ref, ma2g_ref, ma2be_ref)        # [B, 256]
    logits = jnp.dot(h2, malw_ref[...], preferred_element_type=f32) + malb_ref[...]
    ma = 1.0 / (1.0 + jnp.exp(-logits))                                       # sigmoid [B, P]
    macnt_ref[...] = jnp.concatenate([ma, cnt_row], axis=0)                   # one store [B+1, P]


# ------------------------------ jitted wrapper -------------------------------

@functools.partial(jax.jit, static_argnames=("k",))
def _forward_main(params, x, *, k):
    B, N, _ = x.shape
    pairs = tuple((i, j) for i in range(k) for j in range(i))
    P = len(pairs)
    f32 = jnp.float32
    W = P * B * 3

    x_flat = x.reshape(B * N, 3).astype(f32)

    # Head embeddings replicated into the (p, b, d) lane order used in-kernel.
    emb_cat = jnp.stack([params["heads"][pr] for pr in pairs], axis=0)        # [P, 200, 3]
    emb_rep = jnp.transpose(jnp.broadcast_to(emb_cat[:, None], (P, B, MAX_COUNT, 3)),
                            (2, 0, 1, 3)).reshape(MAX_COUNT, W)               # [200, P*B*3]

    # Tiny selection matrices (compile-time constants) for the vectorized heads.
    fsel = np.zeros((P, W), np.float32)                 # f column p -> lanes of pair p
    for p in range(P):
        fsel[p, p * B * 3:(p + 1) * B * 3] = 1.0
    sum3 = np.zeros((W, P * B), np.float32)             # sum groups of 3 lanes
    for c in range(P * B):
        sum3[c * 3:(c + 1) * 3, c] = 1.0
    meanb = np.zeros((P * B, P), np.float32)            # mean over the B batch copies
    for p in range(P):
        meanb[p * B:(p + 1) * B, p] = 1.0 / B
    fsel, sum3, meanb = jnp.asarray(fsel), jnp.asarray(sum3), jnp.asarray(meanb)

    def r2(v):
        return v.reshape(1, -1)

    inputs = (
        x_flat,
        params["ptw_w1"], r2(params["ptw_b1"]),
        params["ptw_w2"], r2(params["ptw_b2"]),
        params["ptw_wg"], r2(params["ptw_bg"]),
        params["ptl_w"], r2(params["ptl_b"]),
        params["ma1_w"].astype(jnp.bfloat16),                       # 9  (pl.ANY, manual DMA)
        r2(params["ma1_b"]), r2(params["ma1_g"]), r2(params["ma1_beta"]),
        params["ma2_w"].astype(jnp.bfloat16),                       # 13 (pl.ANY, manual DMA)
        r2(params["ma2_b"]), r2(params["ma2_g"]), r2(params["ma2_beta"]),
        params["mal_w"], r2(params["mal_b"]),
        emb_rep, fsel, sum3, meanb,
    )
    any_idx = (9, 13)
    in_specs = [pl.BlockSpec(memory_space=pl.ANY) if i in any_idx else _full_spec(a.shape)
                for i, a in enumerate(inputs)]

    out_shapes = (
        jax.ShapeDtypeStruct((MAX_COUNT, W), f32),     # padded head outputs, (p,b,d) lanes
        jax.ShapeDtypeStruct((B * N, k), f32),         # softmax attention, [B,N,k] flat
        jax.ShapeDtypeStruct((B * k, 3), f32),         # KPCD (flat rows)
        jax.ShapeDtypeStruct((B + 1, P), f32),         # rows 0..B-1 = MA, row B = counts
    )

    kernel = functools.partial(_net_kernel, B=B, N=N, k=k, pairs=pairs)
    r_f, kpa_f, kpcd_f, macnt = pl.pallas_call(
        kernel,
        grid=(1,),
        in_specs=in_specs,
        out_specs=tuple(_full_spec(s.shape) for s in out_shapes),
        out_shape=out_shapes,
        scratch_shapes=[
            pltpu.VMEM((1024, 512), jnp.bfloat16),     # MA layer-1 weight (manual DMA dst)
            pltpu.VMEM((512, 256), jnp.bfloat16),      # MA layer-2 weight (manual DMA dst)
            pltpu.SemaphoreType.DMA((2,)),
        ],
        compiler_params=pltpu.CompilerParams(dimension_semantics=("arbitrary",)),
    )(*inputs)

    KPCD = kpcd_f.reshape(B, k, 3)
    KPA = jnp.transpose(kpa_f.reshape(B, N, k), (0, 2, 1))                    # [B, k, N]
    MA = macnt[:B, :]
    cnt = macnt[B, :]
    R_all = jnp.transpose(r_f.reshape(MAX_COUNT, P, B, 3), (1, 2, 0, 3))      # [P, B, 200, 3]
    LF = jnp.concatenate([params["heads"][pr] for pr in pairs], axis=1)       # [200, 3*P]
    return KPCD, KPA, MA, cnt, R_all, LF


def net_forward(params, x, k):
    B, N, _ = x.shape
    # F.max_pool1d(GF, 16).squeeze() in the reference implies the point dim is 16.
    assert N == 16, "stand-in backbone assumes N == 16 (as in the original max_pool1d(.,16))"
    pairs = [(i, j) for i in range(k) for j in range(i)]

    KPCD, KPA, MA, cnt, R_all, LF = _forward_main(params, x, k=k)

    # single host sync for all data-dependent head lengths
    counts = [int(c) for c in jax.device_get(cnt)]
    RP = [R_all[p, :, :counts[p], :] for p in range(len(pairs))]              # [B, count, 3] each
    return RP, KPCD, KPA, LF, MA


# ------------------------------- parameters ---------------------------------

def init_params(key, k):
    keys = jax.random.split(key, 9)
    p = {}
    # TODO(synk): PointNetPP is not defined in the reference source; these are
    # the weights of a deterministic per-point-MLP stand-in backbone.
    p["ptw_w1"] = jax.random.normal(keys[0], (9, 64), jnp.float32) * 0.1
    p["ptw_b1"] = jnp.zeros((64,), jnp.float32)
    p["ptw_w2"] = jax.random.normal(keys[1], (64, k), jnp.float32) * 0.1
    p["ptw_b2"] = jnp.zeros((k,), jnp.float32)
    p["ptw_wg"] = jax.random.normal(keys[2], (9, 1024), jnp.float32) * 0.1
    p["ptw_bg"] = jnp.zeros((1024,), jnp.float32)
    # PT_L: Linear(k, k)
    p["ptl_w"] = jax.random.normal(keys[3], (k, k), jnp.float32) * 0.1
    p["ptl_b"] = jnp.zeros((k,), jnp.float32)
    # MA: PBlock(1024, 512, 256, should_perm=False)
    p["ma1_w"] = jax.random.normal(keys[4], (1024, 512), jnp.float32) * 0.03
    p["ma1_b"] = jnp.zeros((512,), jnp.float32)
    p["ma1_g"] = jnp.ones((512,), jnp.float32)
    p["ma1_beta"] = jnp.zeros((512,), jnp.float32)
    p["ma2_w"] = jax.random.normal(keys[5], (512, 256), jnp.float32) * 0.05
    p["ma2_b"] = jnp.zeros((256,), jnp.float32)
    p["ma2_g"] = jnp.ones((256,), jnp.float32)
    p["ma2_beta"] = jnp.zeros((256,), jnp.float32)
    # MA_L: Linear(256, k*(k-1)//2)
    p["mal_w"] = jax.random.normal(keys[6], (256, k * (k - 1) // 2), jnp.float32) * 0.05
    p["mal_b"] = jnp.zeros((k * (k - 1) // 2,), jnp.float32)
    # MA_EMB exists in __init__ but is never used in forward -> skipped.
    # Heads: emb = randn(200, 3) * 0.002 for each (i, j), j < i
    heads = {}
    hkeys = jax.random.split(keys[7], k * k)
    idx = 0
    for i in range(k):
        for j in range(i):
            heads[(i, j)] = jax.random.normal(hkeys[idx], (MAX_COUNT, 3), jnp.float32) * 0.002
            idx += 1
    p["heads"] = heads
    return p


if __name__ == "__main__":
    B, N, k = 2, 16, 4
    key = jax.random.PRNGKey(0)
    pkey, xkey = jax.random.split(key)
    params = init_params(pkey, k)
    input_x = jax.random.normal(xkey, (B, N, 3), dtype=jnp.float32)

    RP, KPCD, KPA, LF, MA = net_forward(params, input_x, k)
    jax.block_until_ready((tuple(RP), KPCD, KPA, LF, MA))
    print("KERNEL_OK")
</pallas_src>

<mosaic_0001>
module attributes {stable_mosaic.version = 11 : i64} {
  func.func @_net_kernel(%arg0: i32, %arg1: memref<32x3xf32, #tpu.memory_space<vmem>>, %arg2: memref<9x64xf32, #tpu.memory_space<vmem>>, %arg3: memref<1x64xf32, #tpu.memory_space<vmem>>, %arg4: memref<64x4xf32, #tpu.memory_space<vmem>>, %arg5: memref<1x4xf32, #tpu.memory_space<vmem>>, %arg6: memref<9x1024xf32, #tpu.memory_space<vmem>>, %arg7: memref<1x1024xf32, #tpu.memory_space<vmem>>, %arg8: memref<4x4xf32, #tpu.memory_space<vmem>>, %arg9: memref<1x4xf32, #tpu.memory_space<vmem>>, %arg10: memref<1024x512xbf16, #tpu.memory_space<any>>, %arg11: memref<1x512xf32, #tpu.memory_space<vmem>>, %arg12: memref<1x512xf32, #tpu.memory_space<vmem>>, %arg13: memref<1x512xf32, #tpu.memory_space<vmem>>, %arg14: memref<512x256xbf16, #tpu.memory_space<any>>, %arg15: memref<1x256xf32, #tpu.memory_space<vmem>>, %arg16: memref<1x256xf32, #tpu.memory_space<vmem>>, %arg17: memref<1x256xf32, #tpu.memory_space<vmem>>, %arg18: memref<256x6xf32, #tpu.memory_space<vmem>>, %arg19: memref<1x6xf32, #tpu.memory_space<vmem>>, %arg20: memref<200x36xf32, #tpu.memory_space<vmem>>, %arg21: memref<6x36xf32, #tpu.memory_space<vmem>>, %arg22: memref<36x12xf32, #tpu.memory_space<vmem>>, %arg23: memref<12x6xf32, #tpu.memory_space<vmem>>, %arg24: memref<200x36xf32, #tpu.memory_space<vmem>>, %arg25: memref<32x4xf32, #tpu.memory_space<vmem>>, %arg26: memref<8x3xf32, #tpu.memory_space<vmem>>, %arg27: memref<3x6xf32, #tpu.memory_space<vmem>>, %arg28: memref<1024x512xbf16, #tpu.memory_space<vmem>>, %arg29: memref<512x256xbf16, #tpu.memory_space<vmem>>, %arg30: memref<2x!tpu.dma_semaphore, #tpu.memory_space<semaphore_mem>>) attributes {dimension_semantics = [#tpu.dimension_semantics<arbitrary>], iteration_bounds = array<i64: 1>, scalar_prefetch = 0 : i64, scratch_operands = 3 : i64, tpu.core_type = #tpu.core_type<tc>, window_params = [{pipeline_mode = #tpu.pipeline_mode<synchronous>, transform_indices = @transform_0, window_bounds = array<i64: 32, 3>}, {pipeline_mode = #tpu.pipeline_mode<synchronous>, transform_indices = @transform_1, window_bounds = array<i64: 9, 64>}, {pipeline_mode = #tpu.pipeline_mode<synchronous>, transform_indices = @transform_2, window_bounds = array<i64: 1, 64>}, {pipeline_mode = #tpu.pipeline_mode<synchronous>, transform_indices = @transform_3, window_bounds = array<i64: 64, 4>}, {pipeline_mode = #tpu.pipeline_mode<synchronous>, transform_indices = @transform_4, window_bounds = array<i64: 1, 4>}, {pipeline_mode = #tpu.pipeline_mode<synchronous>, transform_indices = @transform_5, window_bounds = array<i64: 9, 1024>}, {pipeline_mode = #tpu.pipeline_mode<synchronous>, transform_indices = @transform_6, window_bounds = array<i64: 1, 1024>}, {pipeline_mode = #tpu.pipeline_mode<synchronous>, transform_indices = @transform_7, window_bounds = array<i64: 4, 4>}, {pipeline_mode = #tpu.pipeline_mode<synchronous>, transform_indices = @transform_8, window_bounds = array<i64: 1, 4>}, {}, {pipeline_mode = #tpu.pipeline_mode<synchronous>, transform_indices = @transform_10, window_bounds = array<i64: 1, 512>}, {pipeline_mode = #tpu.pipeline_mode<synchronous>, transform_indices = @transform_11, window_bounds = array<i64: 1, 512>}, {pipeline_mode = #tpu.pipeline_mode<synchronous>, transform_indices = @transform_12, window_bounds = array<i64: 1, 512>}, {}, {pipeline_mode = #tpu.pipeline_mode<synchronous>, transform_indices = @transform_14, window_bounds = array<i64: 1, 256>}, {pipeline_mode = #tpu.pipeline_mode<synchronous>, transform_indices = @transform_15, window_bounds = array<i64: 1, 256>}, {pipeline_mode = #tpu.pipeline_mode<synchronous>, transform_indices = @transform_16, window_bounds = array<i64: 1, 256>}, {pipeline_mode = #tpu.pipeline_mode<synchronous>, transform_indices = @transform_17, window_bounds = array<i64: 256, 6>}, {pipeline_mode = #tpu.pipeline_mode<synchronous>, transform_indices = @transform_18, window_bounds = array<i64: 1, 6>}, {pipeline_mode = #tpu.pipeline_mode<synchronous>, transform_indices = @transform_19, window_bounds = array<i64: 200, 36>}, {pipeline_mode = #tpu.pipeline_mode<synchronous>, transform_indices = @transform_20, window_bounds = array<i64: 6, 36>}, {pipeline_mode = #tpu.pipeline_mode<synchronous>, transform_indices = @transform_21, window_bounds = array<i64: 36, 12>}, {pipeline_mode = #tpu.pipeline_mode<synchronous>, transform_indices = @transform_22, window_bounds = array<i64: 12, 6>}, {pipeline_mode = #tpu.pipeline_mode<synchronous>, transform_indices = @transform_23, window_bounds = array<i64: 200, 36>}, {pipeline_mode = #tpu.pipeline_mode<synchronous>, transform_indices = @transform_24, window_bounds = array<i64: 32, 4>}, {pipeline_mode = #tpu.pipeline_mode<synchronous>, transform_indices = @transform_25, window_bounds = array<i64: 8, 3>}, {pipeline_mode = #tpu.pipeline_mode<synchronous>, transform_indices = @transform_26, window_bounds = array<i64: 3, 6>}]} {
    %c0_i32 = arith.constant 0 : i32
    %0 = tpu.memref_slice %arg30[%c0_i32] : memref<2x!tpu.dma_semaphore, #tpu.memory_space<semaphore_mem>> -> memref<1x!tpu.dma_semaphore, #tpu.memory_space<semaphore_mem>>
    %1 = tpu.memref_squeeze %0 : memref<1x!tpu.dma_semaphore, #tpu.memory_space<semaphore_mem>> -> memref<!tpu.dma_semaphore, #tpu.memory_space<semaphore_mem>>
    tpu.enqueue_dma source(%arg10 : memref<1024x512xbf16, #tpu.memory_space<any>>) target(%arg28 : memref<1024x512xbf16, #tpu.memory_space<vmem>>) target_semaphore(%1 : memref<!tpu.dma_semaphore, #tpu.memory_space<semaphore_mem>>)
    %c1_i32 = arith.constant 1 : i32
    %2 = tpu.memref_slice %arg30[%c1_i32] : memref<2x!tpu.dma_semaphore, #tpu.memory_space<semaphore_mem>> -> memref<1x!tpu.dma_semaphore, #tpu.memory_space<semaphore_mem>>
    %3 = tpu.memref_squeeze %2 : memref<1x!tpu.dma_semaphore, #tpu.memory_space<semaphore_mem>> -> memref<!tpu.dma_semaphore, #tpu.memory_space<semaphore_mem>>
    tpu.enqueue_dma source(%arg14 : memref<512x256xbf16, #tpu.memory_space<any>>) target(%arg29 : memref<512x256xbf16, #tpu.memory_space<vmem>>) target_semaphore(%3 : memref<!tpu.dma_semaphore, #tpu.memory_space<semaphore_mem>>)
    %c0 = arith.constant 0 : index
    %c0_0 = arith.constant 0 : index
    %4 = vector.load %arg1[%c0, %c0_0] : memref<32x3xf32, #tpu.memory_space<vmem>>, vector<32x3xf32>
    %5 = tpu.concatenate %4, %4, %4 in 1 : vector<32x3xf32>, vector<32x3xf32>, vector<32x3xf32> -> vector<32x9xf32>
    %c0_1 = arith.constant 0 : index
    %c0_2 = arith.constant 0 : index
    %6 = vector.load %arg2[%c0_1, %c0_2] : memref<9x64xf32, #tpu.memory_space<vmem>>, vector<9x64xf32>
    %cst = arith.constant dense<0.000000e+00> : vector<32x64xf32>
    %7 = tpu.matmul %5, %6, %cst {dimension_numbers = #tpu.dot_dimension_numbers<[1], [0], [0], [1], [0, 0, 1, 1], [], []>} : vector<32x9xf32>, vector<9x64xf32>, vector<32x64xf32> -> vector<32x64xf32>
    %c0_3 = arith.constant 0 : index
    %c0_4 = arith.constant 0 : index
    %8 = vector.load %arg3[%c0_3, %c0_4] : memref<1x64xf32, #tpu.memory_space<vmem>>, vector<1x64xf32>
    %9 = vector.broadcast %8 : vector<1x64xf32> to vector<32x64xf32>
    %10 = arith.addf %7, %9 : vector<32x64xf32>
    %cst_5 = arith.constant 0.000000e+00 : f32
    %11 = vector.broadcast %cst_5 : f32 to vector<32x64xf32>
    %12 = arith.maximumf %10, %11 : vector<32x64xf32>
    %c0_6 = arith.constant 0 : index
    %c0_7 = arith.constant 0 : index
    %13 = vector.load %arg4[%c0_6, %c0_7] : memref<64x4xf32, #tpu.memory_space<vmem>>, vector<64x4xf32>
    %cst_8 = arith.constant dense<0.000000e+00> : vector<32x4xf32>
    %14 = tpu.matmul %12, %13, %cst_8 {dimension_numbers = #tpu.dot_dimension_numbers<[1], [0], [0], [1], [0, 0, 1, 1], [], []>} : vector<32x64xf32>, vector<64x4xf32>, vector<32x4xf32> -> vector<32x4xf32>
    %c0_9 = arith.constant 0 : index
    %c0_10 = arith.constant 0 : index
    %15 = vector.load %arg5[%c0_9, %c0_10] : memref<1x4xf32, #tpu.memory_space<vmem>>, vector<1x4xf32>
    %16 = vector.broadcast %15 : vector<1x4xf32> to vector<32x4xf32>
    %17 = arith.addf %14, %16 : vector<32x4xf32>
    %c0_11 = arith.constant 0 : index
    %c0_12 = arith.constant 0 : index
    %18 = vector.load %arg6[%c0_11, %c0_12] : memref<9x1024xf32, #tpu.memory_space<vmem>>, vector<9x1024xf32>
    %cst_13 = arith.constant dense<0.000000e+00> : vector<32x1024xf32>
    %19 = tpu.matmul %5, %18, %cst_13 {dimension_numbers = #tpu.dot_dimension_numbers<[1], [0], [0], [1], [0, 0, 1, 1], [], []>} : vector<32x9xf32>, vector<9x1024xf32>, vector<32x1024xf32> -> vector<32x1024xf32>
    %c0_14 = arith.constant 0 : index
    %c0_15 = arith.constant 0 : index
    %20 = vector.load %arg7[%c0_14, %c0_15] : memref<1x1024xf32, #tpu.memory_space<vmem>>, vector<1x1024xf32>
    %21 = vector.broadcast %20 : vector<1x1024xf32> to vector<32x1024xf32>
    %22 = arith.addf %19, %21 : vector<32x1024xf32>
    %cst_16 = arith.constant 0.000000e+00 : f32
    %23 = vector.broadcast %cst_16 : f32 to vector<32x1024xf32>
    %24 = arith.maximumf %22, %23 : vector<32x1024xf32>
    %c0_17 = arith.constant 0 : index
    %c0_18 = arith.constant 0 : index
    %25 = vector.load %arg8[%c0_17, %c0_18] : memref<4x4xf32, #tpu.memory_space<vmem>>, vector<4x4xf32>
    %cst_19 = arith.constant dense<0.000000e+00> : vector<32x4xf32>
    %26 = tpu.matmul %17, %25, %cst_19 {dimension_numbers = #tpu.dot_dimension_numbers<[1], [0], [0], [1], [0, 0, 1, 1], [], []>} : vector<32x4xf32>, vector<4x4xf32>, vector<32x4xf32> -> vector<32x4xf32>
    %c0_20 = arith.constant 0 : index
    %c0_21 = arith.constant 0 : index
    %27 = vector.load %arg9[%c0_20, %c0_21] : memref<1x4xf32, #tpu.memory_space<vmem>>, vector<1x4xf32>
    %28 = vector.broadcast %27 : vector<1x4xf32> to vector<32x4xf32>
    %29 = arith.addf %26, %28 : vector<32x4xf32>
    %30 = vector.extract_strided_slice %24 {offsets = [0, 0], sizes = [16, 1024], strides = [1, 1]} : vector<32x1024xf32> to vector<16x1024xf32>
    %cst_22 = arith.constant dense<0xFF800000> : vector<1024xf32>
    %31 = vector.multi_reduction <maximumf>, %30, %cst_22 [0] : vector<16x1024xf32> to vector<1024xf32>
    %32 = vector.shape_cast %31 : vector<1024xf32> to vector<1x1024xf32>
    %33 = vector.extract_strided_slice %29 {offsets = [0, 0], sizes = [16, 4], strides = [1, 1]} : vector<32x4xf32> to vector<16x4xf32>
    %cst_23 = arith.constant dense<0xFF800000> : vector<4xf32>
    %34 = vector.multi_reduction <maximumf>, %33, %cst_23 [0] : vector<16x4xf32> to vector<4xf32>
    %35 = vector.shape_cast %34 : vector<4xf32> to vector<1x4xf32>
    %36 = vector.broadcast %35 : vector<1x4xf32> to vector<16x4xf32>
    %37 = arith.subf %33, %36 : vector<16x4xf32>
    %38 = math.exp %37 : vector<16x4xf32>
    %cst_24 = arith.constant dense<0.000000e+00> : vector<4xf32>
    %39 = vector.multi_reduction <add>, %38, %cst_24 [0] : vector<16x4xf32> to vector<4xf32>
    %40 = vector.shape_cast %39 : vector<4xf32> to vector<1x4xf32>
    %41 = vector.broadcast %40 : vector<1x4xf32> to vector<16x4xf32>
    %42 = arith.divf %38, %41 : vector<16x4xf32>
    %43 = vector.extract_strided_slice %4 {offsets = [0, 0], sizes = [16, 3], strides = [1, 1]} : vector<32x3xf32> to vector<16x3xf32>
    %cst_25 = arith.constant dense<0.000000e+00> : vector<4x3xf32>
    %44 = tpu.matmul %42, %43, %cst_25 {dimension_numbers = #tpu.dot_dimension_numbers<[0], [0], [1], [1], [0, 1, 1, 1], [], []>} : vector<16x4xf32>, vector<16x3xf32>, vector<4x3xf32> -> vector<4x3xf32>
    %45 = vector.extract_strided_slice %24 {offsets = [16, 0], sizes = [16, 1024], strides = [1, 1]} : vector<32x1024xf32> to vector<16x1024xf32>
    %cst_26 = arith.constant dense<0xFF800000> : vector<1024xf32>
    %46 = vector.multi_reduction <maximumf>, %45, %cst_26 [0] : vector<16x1024xf32> to vector<1024xf32>
    %47 = vector.shape_cast %46 : vector<1024xf32> to vector<1x1024xf32>
    %48 = vector.extract_strided_slice %29 {offsets = [16, 0], sizes = [16, 4], strides = [1, 1]} : vector<32x4xf32> to vector<16x4xf32>
    %cst_27 = arith.constant dense<0xFF800000> : vector<4xf32>
    %49 = vector.multi_reduction <maximumf>, %48, %cst_27 [0] : vector<16x4xf32> to vector<4xf32>
    %50 = vector.shape_cast %49 : vector<4xf32> to vector<1x4xf32>
    %51 = vector.broadcast %50 : vector<1x4xf32> to vector<16x4xf32>
    %52 = arith.subf %48, %51 : vector<16x4xf32>
    %53 = math.exp %52 : vector<16x4xf32>
    %cst_28 = arith.constant dense<0.000000e+00> : vector<4xf32>
    %54 = vector.multi_reduction <add>, %53, %cst_28 [0] : vector<16x4xf32> to vector<4xf32>
    %55 = vector.shape_cast %54 : vector<4xf32> to vector<1x4xf32>
    %56 = vector.broadcast %55 : vector<1x4xf32> to vector<16x4xf32>
    %57 = arith.divf %53, %56 : vector<16x4xf32>
    %58 = vector.extract_strided_slice %4 {offsets = [16, 0], sizes = [16, 3], strides = [1, 1]} : vector<32x3xf32> to vector<16x3xf32>
    %cst_29 = arith.constant dense<0.000000e+00> : vector<4x3xf32>
    %59 = tpu.matmul %57, %58, %cst_29 {dimension_numbers = #tpu.dot_dimension_numbers<[0], [0], [1], [1], [0, 1, 1, 1], [], []>} : vector<16x4xf32>, vector<16x3xf32>, vector<4x3xf32> -> vector<4x3xf32>
    %60 = tpu.concatenate %42, %57 in 0 : vector<16x4xf32>, vector<16x4xf32> -> vector<32x4xf32>
    %c0_30 = arith.constant 0 : index
    %c0_31 = arith.constant 0 : index
    %61 = vector.load %arg25[%c0_30, %c0_31] : memref<32x4xf32, #tpu.memory_space<vmem>>, vector<32x4xf32>
    tpu.vector_store %arg25[%c0_30, %c0_31], %60 {strides = array<i32>} : memref<32x4xf32, #tpu.memory_space<vmem>>, vector<32x4xf32>,
    %62 = tpu.concatenate %44, %59 in 0 : vector<4x3xf32>, vector<4x3xf32> -> vector<8x3xf32>
    %c0_32 = arith.constant 0 : index
    %c0_33 = arith.constant 0 : index
    %63 = vector.load %arg26[%c0_32, %c0_33] : memref<8x3xf32, #tpu.memory_space<vmem>>, vector<8x3xf32>
    tpu.vector_store %arg26[%c0_32, %c0_33], %62 {strides = array<i32>} : memref<8x3xf32, #tpu.memory_space<vmem>>, vector<8x3xf32>,
    %64 = vector.extract_strided_slice %44 {offsets = [1, 0], sizes = [1, 3], strides = [1, 1]} : vector<4x3xf32> to vector<1x3xf32>
    %65 = vector.extract_strided_slice %44 {offsets = [0, 0], sizes = [1, 3], strides = [1, 1]} : vector<4x3xf32> to vector<1x3xf32>
    %66 = vector.extract_strided_slice %59 {offsets = [1, 0], sizes = [1, 3], strides = [1, 1]} : vector<4x3xf32> to vector<1x3xf32>
    %67 = vector.extract_strided_slice %59 {offsets = [0, 0], sizes = [1, 3], strides = [1, 1]} : vector<4x3xf32> to vector<1x3xf32>
    %68 = vector.extract_strided_slice %44 {offsets = [2, 0], sizes = [1, 3], strides = [1, 1]} : vector<4x3xf32> to vector<1x3xf32>
    %69 = vector.extract_strided_slice %44 {offsets = [0, 0], sizes = [1, 3], strides = [1, 1]} : vector<4x3xf32> to vector<1x3xf32>
    %70 = vector.extract_strided_slice %59 {offsets = [2, 0], sizes = [1, 3], strides = [1, 1]} : vector<4x3xf32> to vector<1x3xf32>
    %71 = vector.extract_strided_slice %59 {offsets = [0, 0], sizes = [1, 3], strides = [1, 1]} : vector<4x3xf32> to vector<1x3xf32>
    %72 = vector.extract_strided_slice %44 {offsets = [2, 0], sizes = [1, 3], strides = [1, 1]} : vector<4x3xf32> to vector<1x3xf32>
    %73 = vector.extract_strided_slice %44 {offsets = [1, 0], sizes = [1, 3], strides = [1, 1]} : vector<4x3xf32> to vector<1x3xf32>
    %74 = vector.extract_strided_slice %59 {offsets = [2, 0], sizes = [1, 3], strides = [1, 1]} : vector<4x3xf32> to vector<1x3xf32>
    %75 = vector.extract_strided_slice %59 {offsets = [1, 0], sizes = [1, 3], strides = [1, 1]} : vector<4x3xf32> to vector<1x3xf32>
    %76 = vector.extract_strided_slice %44 {offsets = [3, 0], sizes = [1, 3], strides = [1, 1]} : vector<4x3xf32> to vector<1x3xf32>
    %77 = vector.extract_strided_slice %44 {offsets = [0, 0], sizes = [1, 3], strides = [1, 1]} : vector<4x3xf32> to vector<1x3xf32>
    %78 = vector.extract_strided_slice %59 {offsets = [3, 0], sizes = [1, 3], strides = [1, 1]} : vector<4x3xf32> to vector<1x3xf32>
    %79 = vector.extract_strided_slice %59 {offsets = [0, 0], sizes = [1, 3], strides = [1, 1]} : vector<4x3xf32> to vector<1x3xf32>
    %80 = vector.extract_strided_slice %44 {offsets = [3, 0], sizes = [1, 3], strides = [1, 1]} : vector<4x3xf32> to vector<1x3xf32>
    %81 = vector.extract_strided_slice %44 {offsets = [1, 0], sizes = [1, 3], strides = [1, 1]} : vector<4x3xf32> to vector<1x3xf32>
    %82 = vector.extract_strided_slice %59 {offsets = [3, 0], sizes = [1, 3], strides = [1, 1]} : vector<4x3xf32> to vector<1x3xf32>
    %83 = vector.extract_strided_slice %59 {offsets = [1, 0], sizes = [1, 3], strides = [1, 1]} : vector<4x3xf32> to vector<1x3xf32>
    %84 = vector.extract_strided_slice %44 {offsets = [3, 0], sizes = [1, 3], strides = [1, 1]} : vector<4x3xf32> to vector<1x3xf32>
    %85 = vector.extract_strided_slice %44 {offsets = [2, 0], sizes = [1, 3], strides = [1, 1]} : vector<4x3xf32> to vector<1x3xf32>
    %86 = vector.extract_strided_slice %59 {offsets = [3, 0], sizes = [1, 3], strides = [1, 1]} : vector<4x3xf32> to vector<1x3xf32>
    %87 = vector.extract_strided_slice %59 {offsets = [2, 0], sizes = [1, 3], strides = [1, 1]} : vector<4x3xf32> to vector<1x3xf32>
    %88 = tpu.concatenate %64, %66, %68, %70, %72, %74, %76, %78, %80, %82, %84, %86 in 1 : vector<1x3xf32>, vector<1x3xf32>, vector<1x3xf32>, vector<1x3xf32>, vector<1x3xf32>, vector<1x3xf32>, vector<1x3xf32>, vector<1x3xf32>, vector<1x3xf32>, vector<1x3xf32>, vector<1x3xf32>, vector<1x3xf32> -> vector<1x36xf32>
    %89 = tpu.concatenate %65, %67, %69, %71, %73, %75, %77, %79, %81, %83, %85, %87 in 1 : vector<1x3xf32>, vector<1x3xf32>, vector<1x3xf32>, vector<1x3xf32>, vector<1x3xf32>, vector<1x3xf32>, vector<1x3xf32>, vector<1x3xf32>, vector<1x3xf32>, vector<1x3xf32>, vector<1x3xf32>, vector<1x3xf32> -> vector<1x36xf32>
    %90 = arith.subf %88, %89 : vector<1x36xf32>
    %91 = arith.mulf %90, %90 : vector<1x36xf32>
    %c0_34 = arith.constant 0 : index
    %c0_35 = arith.constant 0 : index
    %92 = vector.load %arg22[%c0_34, %c0_35] : memref<36x12xf32, #tpu.memory_space<vmem>>, vector<36x12xf32>
    %cst_36 = arith.constant dense<0.000000e+00> : vector<1x12xf32>
    %93 = tpu.matmul %91, %92, %cst_36 {dimension_numbers = #tpu.dot_dimension_numbers<[1], [0], [0], [1], [0, 0, 1, 1], [], []>} : vector<1x36xf32>, vector<36x12xf32>, vector<1x12xf32> -> vector<1x12xf32>
    %cst_37 = arith.constant 1.000000e-03 : f32
    %94 = vector.broadcast %cst_37 : f32 to vector<1x12xf32>
    %95 = arith.addf %94, %93 : vector<1x12xf32>
    %96 = math.sqrt %95 : vector<1x12xf32>
    %c0_38 = arith.constant 0 : index
    %c0_39 = arith.constant 0 : index
    %97 = vector.load %arg23[%c0_38, %c0_39] : memref<12x6xf32, #tpu.memory_space<vmem>>, vector<12x6xf32>
    %cst_40 = arith.constant dense<0.000000e+00> : vector<1x6xf32>
    %98 = tpu.matmul %96, %97, %cst_40 {dimension_numbers = #tpu.dot_dimension_numbers<[1], [0], [0], [1], [0, 0, 1, 1], [], []>} : vector<1x12xf32>, vector<12x6xf32>, vector<1x6xf32> -> vector<1x6xf32>
    %cst_41 = arith.constant 0.00999999977 : f32
    %99 = vector.broadcast %cst_41 : f32 to vector<1x6xf32>
    %100 = arith.divf %98, %99 : vector<1x6xf32>
    %101 = math.floor %100 : vector<1x6xf32>
    %cst_42 = arith.constant 1.500000e+01 : f32
    %cst_43 = arith.constant 2.000000e+02 : f32
    %102 = vector.broadcast %cst_42 : f32 to vector<1x6xf32>
    %103 = arith.maximumf %102, %101 : vector<1x6xf32>
    %104 = vector.broadcast %cst_43 : f32 to vector<1x6xf32>
    %105 = arith.minimumf %104, %103 : vector<1x6xf32>
    %106 = tpu.iota {dimensions = array<i32: 0>} : vector<200x1xi32>
    %107 = arith.sitofp %106 : vector<200x1xi32> to vector<200x1xf32>
    %cst_44 = arith.constant 1.000000e+00 : f32
    %108 = vector.broadcast %cst_44 : f32 to vector<1x6xf32>
    %109 = arith.subf %105, %108 : vector<1x6xf32>
    %110 = vector.broadcast %107 : vector<200x1xf32> to vector<200x6xf32>
    %111 = vector.broadcast %109 : vector<1x6xf32> to vector<200x6xf32>
    %112 = arith.divf %110, %111 : vector<200x6xf32>
    %c0_45 = arith.constant 0 : index
    %c0_46 = arith.constant 0 : index
    %113 = vector.load %arg21[%c0_45, %c0_46] : memref<6x36xf32, #tpu.memory_space<vmem>>, vector<6x36xf32>
    %cst_47 = arith.constant dense<0.000000e+00> : vector<200x36xf32>
    %114 = tpu.matmul %112, %113, %cst_47 {dimension_numbers = #tpu.dot_dimension_numbers<[1], [0], [0], [1], [0, 0, 1, 1], [], []>} : vector<200x6xf32>, vector<6x36xf32>, vector<200x36xf32> -> vector<200x36xf32>
    %c0_48 = arith.constant 0 : index
    %c0_49 = arith.constant 0 : index
    %115 = vector.load %arg20[%c0_48, %c0_49] : memref<200x36xf32, #tpu.memory_space<vmem>>, vector<200x36xf32>
    %116 = vector.broadcast %89 : vector<1x36xf32> to vector<200x36xf32>
    %117 = arith.addf %115, %116 : vector<200x36xf32>
    %118 = arith.subf %88, %89 : vector<1x36xf32>
    %119 = vector.broadcast %118 : vector<1x36xf32> to vector<200x36xf32>
    %120 = arith.mulf %119, %114 : vector<200x36xf32>
    %121 = arith.addf %117, %120 : vector<200x36xf32>
    %c0_50 = arith.constant 0 : index
    %c0_51 = arith.constant 0 : index
    %122 = vector.load %arg24[%c0_50, %c0_51] : memref<200x36xf32, #tpu.memory_space<vmem>>, vector<200x36xf32>
    tpu.vector_store %arg24[%c0_50, %c0_51], %121 {strides = array<i32>} : memref<200x36xf32, #tpu.memory_space<vmem>>, vector<200x36xf32>,
    %123 = tpu.concatenate %32, %47 in 0 : vector<1x1024xf32>, vector<1x1024xf32> -> vector<2x1024xf32>
    %c0_i32_52 = arith.constant 0 : i32
    %124 = tpu.memref_slice %arg30[%c0_i32_52] : memref<2x!tpu.dma_semaphore, #tpu.memory_space<semaphore_mem>> -> memref<1x!tpu.dma_semaphore, #tpu.memory_space<semaphore_mem>>
    %125 = tpu.memref_squeeze %124 : memref<1x!tpu.dma_semaphore, #tpu.memory_space<semaphore_mem>> -> memref<!tpu.dma_semaphore, #tpu.memory_space<semaphore_mem>>
    tpu.wait_dma2 semaphore(%125 : memref<!tpu.dma_semaphore, #tpu.memory_space<semaphore_mem>>) src(%arg10 : memref<1024x512xbf16, #tpu.memory_space<any>>) dst(%arg28 : memref<1024x512xbf16, #tpu.memory_space<vmem>>)
    %c1_i32_53 = arith.constant 1 : i32
    %126 = tpu.memref_slice %arg30[%c1_i32_53] : memref<2x!tpu.dma_semaphore, #tpu.memory_space<semaphore_mem>> -> memref<1x!tpu.dma_semaphore, #tpu.memory_space<semaphore_mem>>
    %127 = tpu.memref_squeeze %126 : memref<1x!tpu.dma_semaphore, #tpu.memory_space<semaphore_mem>> -> memref<!tpu.dma_semaphore, #tpu.memory_space<semaphore_mem>>
    tpu.wait_dma2 semaphore(%127 : memref<!tpu.dma_semaphore, #tpu.memory_space<semaphore_mem>>) src(%arg14 : memref<512x256xbf16, #tpu.memory_space<any>>) dst(%arg29 : memref<512x256xbf16, #tpu.memory_space<vmem>>)
    %c0_54 = arith.constant 0 : index
    %c0_55 = arith.constant 0 : index
    %128 = vector.load %arg28[%c0_54, %c0_55] : memref<1024x512xbf16, #tpu.memory_space<vmem>>, vector<1024x512xbf16>
    %129 = arith.truncf %123 : vector<2x1024xf32> to vector<2x1024xbf16>
    %cst_56 = arith.constant dense<0.000000e+00> : vector<2x512xf32>
    %130 = tpu.matmul %129, %128, %cst_56 {dimension_numbers = #tpu.dot_dimension_numbers<[1], [0], [0], [1], [0, 0, 1, 1], [], []>} : vector<2x1024xbf16>, vector<1024x512xbf16>, vector<2x512xf32> -> vector<2x512xf32>
    %c0_57 = arith.constant 0 : index
    %c0_58 = arith.constant 0 : index
    %131 = vector.load %arg11[%c0_57, %c0_58] : memref<1x512xf32, #tpu.memory_space<vmem>>, vector<1x512xf32>
    %132 = vector.broadcast %131 : vector<1x512xf32> to vector<2x512xf32>
    %133 = arith.addf %130, %132 : vector<2x512xf32>
    %cst_59 = arith.constant dense<0.000000e+00> : vector<512xf32>
    %134 = vector.multi_reduction <add>, %133, %cst_59 [0] : vector<2x512xf32> to vector<512xf32>
    %135 = vector.shape_cast %134 : vector<512xf32> to vector<1x512xf32>
    %cst_60 = arith.constant 2.000000e+00 : f32
    %136 = vector.broadcast %cst_60 : f32 to vector<1x512xf32>
    %137 = arith.divf %135, %136 : vector<1x512xf32>
    %138 = vector.broadcast %137 : vector<1x512xf32> to vector<2x512xf32>
    %139 = arith.subf %133, %138 : vector<2x512xf32>
    %140 = arith.mulf %139, %139 : vector<2x512xf32>
    %cst_61 = arith.constant dense<0.000000e+00> : vector<512xf32>
    %141 = vector.multi_reduction <add>, %140, %cst_61 [0] : vector<2x512xf32> to vector<512xf32>
    %142 = vector.shape_cast %141 : vector<512xf32> to vector<1x512xf32>
    %cst_62 = arith.constant 2.000000e+00 : f32
    %143 = vector.broadcast %cst_62 : f32 to vector<1x512xf32>
    %144 = arith.divf %142, %143 : vector<1x512xf32>
    %145 = vector.broadcast %137 : vector<1x512xf32> to vector<2x512xf32>
    %146 = arith.subf %133, %145 : vector<2x512xf32>
    %cst_63 = arith.constant 9.99999974E-6 : f32
    %147 = vector.broadcast %cst_63 : f32 to vector<1x512xf32>
    %148 = arith.addf %144, %147 : vector<1x512xf32>
    %149 = math.rsqrt %148 : vector<1x512xf32>
    %150 = vector.broadcast %149 : vector<1x512xf32> to vector<2x512xf32>
    %151 = arith.mulf %146, %150 : vector<2x512xf32>
    %c0_64 = arith.constant 0 : index
    %c0_65 = arith.constant 0 : index
    %152 = vector.load %arg12[%c0_64, %c0_65] : memref<1x512xf32, #tpu.memory_space<vmem>>, vector<1x512xf32>
    %153 = vector.broadcast %152 : vector<1x512xf32> to vector<2x512xf32>
    %154 = arith.mulf %151, %153 : vector<2x512xf32>
    %c0_66 = arith.constant 0 : index
    %c0_67 = arith.constant 0 : index
    %155 = vector.load %arg13[%c0_66, %c0_67] : memref<1x512xf32, #tpu.memory_space<vmem>>, vector<1x512xf32>
    %156 = vector.broadcast %155 : vector<1x512xf32> to vector<2x512xf32>
    %157 = arith.addf %154, %156 : vector<2x512xf32>
    %cst_68 = arith.constant 0.000000e+00 : f32
    %158 = vector.broadcast %cst_68 : f32 to vector<2x512xf32>
    %159 = arith.maximumf %157, %158 : vector<2x512xf32>
    %c0_69 = arith.constant 0 : index
    %c0_70 = arith.constant 0 : index
    %160 = vector.load %arg29[%c0_69, %c0_70] : memref<512x256xbf16, #tpu.memory_space<vmem>>, vector<512x256xbf16>
    %161 = arith.truncf %159 : vector<2x512xf32> to vector<2x512xbf16>
    %cst_71 = arith.constant dense<0.000000e+00> : vector<2x256xf32>
    %162 = tpu.matmul %161, %160, %cst_71 {dimension_numbers = #tpu.dot_dimension_numbers<[1], [0], [0], [1], [0, 0, 1, 1], [], []>} : vector<2x512xbf16>, vector<512x256xbf16>, vector<2x256xf32> -> vector<2x256xf32>
    %c0_72 = arith.constant 0 : index
    %c0_73 = arith.constant 0 : index
    %163 = vector.load %arg15[%c0_72, %c0_73] : memref<1x256xf32, #tpu.memory_space<vmem>>, vector<1x256xf32>
    %164 = vector.broadcast %163 : vector<1x256xf32> to vector<2x256xf32>
    %165 = arith.addf %162, %164 : vector<2x256xf32>
    %cst_74 = arith.constant dense<0.000000e+00> : vector<256xf32>
    %166 = vector.multi_reduction <add>, %165, %cst_74 [0] : vector<2x256xf32> to vector<256xf32>
    %167 = vector.shape_cast %166 : vector<256xf32> to vector<1x256xf32>
    %cst_75 = arith.constant 2.000000e+00 : f32
    %168 = vector.broadcast %cst_75 : f32 to vector<1x256xf32>
    %169 = arith.divf %167, %168 : vector<1x256xf32>
    %170 = vector.broadcast %169 : vector<1x256xf32> to vector<2x256xf32>
    %171 = arith.subf %165, %170 : vector<2x256xf32>
    %172 = arith.mulf %171, %171 : vector<2x256xf32>
    %cst_76 = arith.constant dense<0.000000e+00> : vector<256xf32>
    %173 = vector.multi_reduction <add>, %172, %cst_76 [0] : vector<2x256xf32> to vector<256xf32>
    %174 = vector.shape_cast %173 : vector<256xf32> to vector<1x256xf32>
    %cst_77 = arith.constant 2.000000e+00 : f32
    %175 = vector.broadcast %cst_77 : f32 to vector<1x256xf32>
    %176 = arith.divf %174, %175 : vector<1x256xf32>
    %177 = vector.broadcast %169 : vector<1x256xf32> to vector<2x256xf32>
    %178 = arith.subf %165, %177 : vector<2x256xf32>
    %cst_78 = arith.constant 9.99999974E-6 : f32
    %179 = vector.broadcast %cst_78 : f32 to vector<1x256xf32>
    %180 = arith.addf %176, %179 : vector<1x256xf32>
    %181 = math.rsqrt %180 : vector<1x256xf32>
    %182 = vector.broadcast %181 : vector<1x256xf32> to vector<2x256xf32>
    %183 = arith.mulf %178, %182 : vector<2x256xf32>
    %c0_79 = arith.constant 0 : index
    %c0_80 = arith.constant 0 : index
    %184 = vector.load %arg16[%c0_79, %c0_80] : memref<1x256xf32, #tpu.memory_space<vmem>>, vector<1x256xf32>
    %185 = vector.broadcast %184 : vector<1x256xf32> to vector<2x256xf32>
    %186 = arith.mulf %183, %185 : vector<2x256xf32>
    %c0_81 = arith.constant 0 : index
    %c0_82 = arith.constant 0 : index
    %187 = vector.load %arg17[%c0_81, %c0_82] : memref<1x256xf32, #tpu.memory_space<vmem>>, vector<1x256xf32>
    %188 = vector.broadcast %187 : vector<1x256xf32> to vector<2x256xf32>
    %189 = arith.addf %186, %188 : vector<2x256xf32>
    %cst_83 = arith.constant 0.000000e+00 : f32
    %190 = vector.broadcast %cst_83 : f32 to vector<2x256xf32>
    %191 = arith.maximumf %189, %190 : vector<2x256xf32>
    %c0_84 = arith.constant 0 : index
    %c0_85 = arith.constant 0 : index
    %192 = vector.load %arg18[%c0_84, %c0_85] : memref<256x6xf32, #tpu.memory_space<vmem>>, vector<256x6xf32>
    %cst_86 = arith.constant dense<0.000000e+00> : vector<2x6xf32>
    %193 = tpu.matmul %191, %192, %cst_86 {dimension_numbers = #tpu.dot_dimension_numbers<[1], [0], [0], [1], [0, 0, 1, 1], [], []>} : vector<2x256xf32>, vector<256x6xf32>, vector<2x6xf32> -> vector<2x6xf32>
    %c0_87 = arith.constant 0 : index
    %c0_88 = arith.constant 0 : index
    %194 = vector.load %arg19[%c0_87, %c0_88] : memref<1x6xf32, #tpu.memory_space<vmem>>, vector<1x6xf32>
    %195 = vector.broadcast %194 : vector<1x6xf32> to vector<2x6xf32>
    %196 = arith.addf %193, %195 : vector<2x6xf32>
    %cst_89 = arith.constant 0.000000e+00 : f32
    %197 = vector.broadcast %cst_89 : f32 to vector<2x6xf32>
    %198 = arith.subf %197, %196 : vector<2x6xf32>
    %199 = math.exp %198 : vector<2x6xf32>
    %cst_90 = arith.constant 1.000000e+00 : f32
    %200 = vector.broadcast %cst_90 : f32 to vector<2x6xf32>
    %201 = arith.addf %200, %199 : vector<2x6xf32>
    %cst_91 = arith.constant 1.000000e+00 : f32
    %202 = vector.broadcast %cst_91 : f32 to vector<2x6xf32>
    %203 = arith.divf %202, %201 : vector<2x6xf32>
    %204 = tpu.concatenate %203, %105 in 0 : vector<2x6xf32>, vector<1x6xf32> -> vector<3x6xf32>
    %c0_92 = arith.constant 0 : index
    %c0_93 = arith.constant 0 : index
    %205 = vector.load %arg27[%c0_92, %c0_93] : memref<3x6xf32, #tpu.memory_space<vmem>>, vector<3x6xf32>
    tpu.vector_store %arg27[%c0_92, %c0_93], %204 {strides = array<i32>} : memref<3x6xf32, #tpu.memory_space<vmem>>, vector<3x6xf32>,
    return
  }
  func.func @transform_0(%arg0: i32) -> (i32, i32) {
    %c0_i32 = arith.constant 0 : i32
    %c0_i32_0 = arith.constant 0 : i32
    %c0_i32_1 = arith.constant 0 : i32
    return %c0_i32, %c0_i32_0 : i32, i32
  }
  func.func @transform_1(%arg0: i32) -> (i32, i32) {
    %c0_i32 = arith.constant 0 : i32
    %c0_i32_0 = arith.constant 0 : i32
    %c0_i32_1 = arith.constant 0 : i32
    return %c0_i32, %c0_i32_0 : i32, i32
  }
  func.func @transform_2(%arg0: i32) -> (i32, i32) {
    %c0_i32 = arith.constant 0 : i32
    %c0_i32_0 = arith.constant 0 : i32
    %c0_i32_1 = arith.constant 0 : i32
    return %c0_i32, %c0_i32_0 : i32, i32
  }
  func.func @transform_3(%arg0: i32) -> (i32, i32) {
    %c0_i32 = arith.constant 0 : i32
    %c0_i32_0 = arith.constant 0 : i32
    %c0_i32_1 = arith.constant 0 : i32
    return %c0_i32, %c0_i32_0 : i32, i32
  }
  func.func @transform_4(%arg0: i32) -> (i32, i32) {
    %c0_i32 = arith.constant 0 : i32
    %c0_i32_0 = arith.constant 0 : i32
    %c0_i32_1 = arith.constant 0 : i32
    return %c0_i32, %c0_i32_0 : i32, i32
  }
  func.func @transform_5(%arg0: i32) -> (i32, i32) {
    %c0_i32 = arith.constant 0 : i32
    %c0_i32_0 = arith.constant 0 : i32
    %c0_i32_1 = arith.constant 0 : i32
    return %c0_i32, %c0_i32_0 : i32, i32
  }
  func.func @transform_6(%arg0: i32) -> (i32, i32) {
    %c0_i32 = arith.constant 0 : i32
    %c0_i32_0 = arith.constant 0 : i32
    %c0_i32_1 = arith.constant 0 : i32
    return %c0_i32, %c0_i32_0 : i32, i32
  }
  func.func @transform_7(%arg0: i32) -> (i32, i32) {
    %c0_i32 = arith.constant 0 : i32
    %c0_i32_0 = arith.constant 0 : i32
    %c0_i32_1 = arith.constant 0 : i32
    return %c0_i32, %c0_i32_0 : i32, i32
  }
  func.func @transform_8(%arg0: i32) -> (i32, i32) {
    %c0_i32 = arith.constant 0 : i32
    %c0_i32_0 = arith.constant 0 : i32
    %c0_i32_1 = arith.constant 0 : i32
    return %c0_i32, %c0_i32_0 : i32, i32
  }
  func.func @transform_10(%arg0: i32) -> (i32, i32) {
    %c0_i32 = arith.constant 0 : i32
    %c0_i32_0 = arith.constant 0 : i32
    %c0_i32_1 = arith.constant 0 : i32
    return %c0_i32, %c0_i32_0 : i32, i32
  }
  func.func @transform_11(%arg0: i32) -> (i32, i32) {
    %c0_i32 = arith.constant 0 : i32
    %c0_i32_0 = arith.constant 0 : i32
    %c0_i32_1 = arith.constant 0 : i32
    return %c0_i32, %c0_i32_0 : i32, i32
  }
  func.func @transform_12(%arg0: i32) -> (i32, i32) {
    %c0_i32 = arith.constant 0 : i32
    %c0_i32_0 = arith.constant 0 : i32
    %c0_i32_1 = arith.constant 0 : i32
    return %c0_i32, %c0_i32_0 : i32, i32
  }
  func.func @transform_14(%arg0: i32) -> (i32, i32) {
    %c0_i32 = arith.constant 0 : i32
    %c0_i32_0 = arith.constant 0 : i32
    %c0_i32_1 = arith.constant 0 : i32
    return %c0_i32, %c0_i32_0 : i32, i32
  }
  func.func @transform_15(%arg0: i32) -> (i32, i32) {
    %c0_i32 = arith.constant 0 : i32
    %c0_i32_0 = arith.constant 0 : i32
    %c0_i32_1 = arith.constant 0 : i32
    return %c0_i32, %c0_i32_0 : i32, i32
  }
  func.func @transform_16(%arg0: i32) -> (i32, i32) {
    %c0_i32 = arith.constant 0 : i32
    %c0_i32_0 = arith.constant 0 : i32
    %c0_i32_1 = arith.constant 0 : i32
    return %c0_i32, %c0_i32_0 : i32, i32
  }
  func.func @transform_17(%arg0: i32) -> (i32, i32) {
    %c0_i32 = arith.constant 0 : i32
    %c0_i32_0 = arith.constant 0 : i32
    %c0_i32_1 = arith.constant 0 : i32
    return %c0_i32, %c0_i32_0 : i32, i32
  }
  func.func @transform_18(%arg0: i32) -> (i32, i32) {
    %c0_i32 = arith.constant 0 : i32
    %c0_i32_0 = arith.constant 0 : i32
    %c0_i32_1 = arith.constant 0 : i32
    return %c0_i32, %c0_i32_0 : i32, i32
  }
  func.func @transform_19(%arg0: i32) -> (i32, i32) {
    %c0_i32 = arith.constant 0 : i32
    %c0_i32_0 = arith.constant 0 : i32
    %c0_i32_1 = arith.constant 0 : i32
    return %c0_i32, %c0_i32_0 : i32, i32
  }
  func.func @transform_20(%arg0: i32) -> (i32, i32) {
    %c0_i32 = arith.constant 0 : i32
    %c0_i32_0 = arith.constant 0 : i32
    %c0_i32_1 = arith.constant 0 : i32
    return %c0_i32, %c0_i32_0 : i32, i32
  }
  func.func @transform_21(%arg0: i32) -> (i32, i32) {
    %c0_i32 = arith.constant 0 : i32
    %c0_i32_0 = arith.constant 0 : i32
    %c0_i32_1 = arith.constant 0 : i32
    return %c0_i32, %c0_i32_0 : i32, i32
  }
  func.func @transform_22(%arg0: i32) -> (i32, i32) {
    %c0_i32 = arith.constant 0 : i32
    %c0_i32_0 = arith.constant 0 : i32
    %c0_i32_1 = arith.constant 0 : i32
    return %c0_i32, %c0_i32_0 : i32, i32
  }
  func.func @transform_23(%arg0: i32) -> (i32, i32) {
    %c0_i32 = arith.constant 0 : i32
    %c0_i32_0 = arith.constant 0 : i32
    %c0_i32_1 = arith.constant 0 : i32
    return %c0_i32, %c0_i32_0 : i32, i32
  }
  func.func @transform_24(%arg0: i32) -> (i32, i32) {
    %c0_i32 = arith.constant 0 : i32
    %c0_i32_0 = arith.constant 0 : i32
    %c0_i32_1 = arith.constant 0 : i32
    return %c0_i32, %c0_i32_0 : i32, i32
  }
  func.func @transform_25(%arg0: i32) -> (i32, i32) {
    %c0_i32 = arith.constant 0 : i32
    %c0_i32_0 = arith.constant 0 : i32
    %c0_i32_1 = arith.constant 0 : i32
    return %c0_i32, %c0_i32_0 : i32, i32
  }
  func.func @transform_26(%arg0: i32) -> (i32, i32) {
    %c0_i32 = arith.constant 0 : i32
    %c0_i32_0 = arith.constant 0 : i32
    %c0_i32_1 = arith.constant 0 : i32
    return %c0_i32, %c0_i32_0 : i32, i32
  }
}

</mosaic_0001>

<bundles_post_ra>
// kernel: _forward_main.1
= control target key start
LH: loop header
LB: loop body
LE: loop exit
PB: predicated region body
PF: predicated region fallthrough
CT: control target
= control target key end

     0   :  { %s11244_s0 = inlined_call_operand.vmem [shape: f32[32,3], index: 0, kind: input, shape index: {}]   ;;  %s11245_s1 = inlined_call_operand.vmem [shape: f32[9,64], index: 1, kind: input, shape index: {}]   ;;  %s11246_s2 = inlined_call_operand.vmem [shape: f32[1,64], index: 2, kind: input, shape index: {}]   ;;  %s11247_s3 = inlined_call_operand.vmem [shape: f32[64,4], index: 3, kind: input, shape index: {}]   ;;  %s11248_s4 = inlined_call_operand.vmem [shape: f32[1,4], index: 4, kind: input, shape index: {}]   ;;  %s11249_s5 = inlined_call_operand.vmem [shape: f32[9,1024], index: 5, kind: input, shape index: {}]   ;;  %s11250_s6 = inlined_call_operand.vmem [shape: f32[1,1024], index: 6, kind: input, shape index: {}]   ;;  %s11251_s7 = inlined_call_operand.vmem [shape: f32[4,4], index: 7, kind: input, shape index: {}]   ;;  %s11252_s8 = inlined_call_operand.vmem [shape: f32[1,4], index: 8, kind: input, shape index: {}]   ;;  %s11253_s9 = inlined_call_operand.vmem [shape: bf16[1024,512], index: 9, kind: input, shape index: {}]   ;;  %s11254_s10 = inlined_call_operand.vmem [shape: f32[1,512], index: 10, kind: input, shape index: {}]   ;;  %s11255_s11 = inlined_call_operand.vmem [shape: f32[1,512], index: 11, kind: input, shape index: {}]   ;;  %s11256_s12 = inlined_call_operand.vmem [shape: f32[1,512], index: 12, kind: input, shape index: {}]   ;;  %s11257_s13 = inlined_call_operand.vmem [shape: bf16[512,256], index: 13, kind: input, shape index: {}]   ;;  %s11258_s14 = inlined_call_operand.vmem [shape: f32[1,256], index: 14, kind: input, shape index: {}]   ;;  %s11259_s15 = inlined_call_operand.vmem [shape: f32[1,256], index: 15, kind: input, shape index: {}]   ;;  %s11260_s16 = inlined_call_operand.vmem [shape: f32[1,256], index: 16, kind: input, shape index: {}]   ;;  %s11261_s17 = inlined_call_operand.vmem [shape: f32[256,6], index: 17, kind: input, shape index: {}]   ;;  %s11262_s18 = inlined_call_operand.vmem [shape: f32[1,6], index: 18, kind: input, shape index: {}]   ;;  %s11263_s19 = inlined_call_operand.vmem [shape: f32[200,36], index: 19, kind: input, shape index: {}]   ;;  %s11264_s20 = inlined_call_operand.vmem [shape: f32[6,36], index: 20, kind: input, shape index: {}]   ;;  %s11265_s21 = inlined_call_operand.vmem [shape: f32[36,12], index: 21, kind: input, shape index: {}]   ;;  %s11266_s22 = inlined_call_operand.vmem [shape: f32[12,6], index: 22, kind: input, shape index: {}]   ;;  %s11267_s23 = inlined_call_operand.vmem [shape: f32[200,36], index: 23, kind: output, shape index: {0}]   ;;  %s11268_s24 = inlined_call_operand.vmem [shape: f32[32,4], index: 24, kind: output, shape index: {1}]   ;;  %s11269_s25 = inlined_call_operand.vmem [shape: f32[8,3], index: 25, kind: output, shape index: {2}]   ;;  %s11270_s26 = inlined_call_operand.vmem [shape: f32[3,6], index: 26, kind: output, shape index: {3}]  }
   0x1   :  { %11276 = sst [smem:[#allocation9_spill]] %s11244_s0 }
   0x2   :  { %11277 = sst [smem:[#allocation10_spill]] %s11245_s1 }
   0x3   :  { %11278 = sst [smem:[#allocation11_spill]] %s11246_s2 }
   0x4   :  { %11279 = sst [smem:[#allocation12_spill]] %s11247_s3 }
   0x5   :  { %11280 = sst [smem:[#allocation13_spill]] %s11248_s4 }
   0x6   :  { %11281 = sst [smem:[#allocation14_spill]] %s11249_s5 }
   0x7   :  { %11282 = sst [smem:[#allocation15_spill]] %s11250_s6 }
   0x8   :  { %11283 = sst [smem:[#allocation16_spill]] %s11251_s7 }
   0x9   :  { %11284 = sst [smem:[#allocation17_spill]] %s11252_s8 }
   0xa   :  { %11285 = sst [smem:[#allocation18_spill]] %s11253_s9 }
   0xb   :  { %11286 = sst [smem:[#allocation19_spill]] %s11254_s10  ;;  %s11287_s7 = sld [smem:[#allocation18_spill]] }
  0x11   :  { %v91_v0 = vld [vmem:[%s11287_s7] sm:$0xf]  ;;  %v93_v1 = vld [vmem:[%s11287_s7 + $0x10] sm:$0xf]  ;;  %v95_v2 = vld [vmem:[%s11287_s7 + $0x4] sm:$0xf] }
  0x12   :  { %92 = vst [vmem:[#allocation2] sm:$0xf] %v91_v0  ;;  %94 = vst [vmem:[#allocation2 + $0x4] sm:$0xf] %v93_v1  ;;  %v97_v3 = vld [vmem:[%s11287_s7 + $0x14] sm:$0xf] }
  0x13   :  { %96 = vst [vmem:[#allocation2 + $0x8] sm:$0xf] %v95_v2  ;;  %v99_v4 = vld [vmem:[%s11287_s7 + $0x8] sm:$0xf]  ;;  %v101_v5 = vld [vmem:[%s11287_s7 + $0x18] sm:$0xf] }
  0x14   :  { %98 = vst [vmem:[#allocation2 + $0xc] sm:$0xf] %v97_v3  ;;  %100 = vst [vmem:[#allocation2 + $0x10] sm:$0xf] %v99_v4  ;;  %v103_v6 = vld [vmem:[%s11287_s7 + $0xc] sm:$0xf] }
  0x15   :  { %102 = vst [vmem:[#allocation2 + $0x14] sm:$0xf] %v101_v5  ;;  %v105_v7 = vld [vmem:[%s11287_s7 + $0x1c] sm:$0xff]   ;;  %v109_v8 = vld [vmem:[%s11287_s7 + $0x30] sm:$0xf] }
  0x16   :  { %104 = vst [vmem:[#allocation2 + $0x18] sm:$0xf] %v103_v6  ;;  %106 = vst [vmem:[#allocation2 + $0x1c] sm:$0xff] %v105_v7   ;;  %v111_v9 = vld [vmem:[%s11287_s7 + $0x24] sm:$0xf]  ;;  %v121_v14 = vld [vmem:[%s11287_s7 + $0x3c] sm:$0xff]  }
  0x17   :  { %110 = vst [vmem:[#allocation2 + $0x24] sm:$0xf] %v109_v8  ;;  %v113_v10 = vld [vmem:[%s11287_s7 + $0x34] sm:$0xf]  ;;  %v115_v11 = vld [vmem:[%s11287_s7 + $0x28] sm:$0xf] }
  0x18   :  { %112 = vst [vmem:[#allocation2 + $0x28] sm:$0xf] %v111_v9  ;;  %114 = vst [vmem:[#allocation2 + $0x2c] sm:$0xf] %v113_v10  ;;  %v117_v12 = vld [vmem:[%s11287_s7 + $0x38] sm:$0xf] }
  0x19   :  { %116 = vst [vmem:[#allocation2 + $0x30] sm:$0xf] %v115_v11  ;;  %v119_v13 = vld [vmem:[%s11287_s7 + $0x2c] sm:$0xf]  ;;  %118 = vst [vmem:[#allocation2 + $0x34] sm:$0xf] %v117_v12 }
  0x1a   :  { %120 = vst [vmem:[#allocation2 + $0x38] sm:$0xf] %v119_v13  ;;  %122 = vst [vmem:[#allocation2 + $0x3c] sm:$0xff] %v121_v14   ;;  %v125_v15 = vld [vmem:[%s11287_s7 + $0x50] sm:$0xf]  ;;  %v137_v21 = vld [vmem:[%s11287_s7 + $0x5c] sm:$0xff]  }
  0x1b   :  { %v127_v16 = vld [vmem:[%s11287_s7 + $0x44] sm:$0xf]  ;;  %v129_v17 = vld [vmem:[%s11287_s7 + $0x54] sm:$0xf]  ;;  %126 = vst [vmem:[#allocation2 + $0x44] sm:$0xf] %v125_v15 }
  0x1c   :  { %128 = vst [vmem:[#allocation2 + $0x48] sm:$0xf] %v127_v16  ;;  %130 = vst [vmem:[#allocation2 + $0x4c] sm:$0xf] %v129_v17  ;;  %v131_v18 = vld [vmem:[%s11287_s7 + $0x48] sm:$0xf] }
  0x1d   :  { %v133_v19 = vld [vmem:[%s11287_s7 + $0x58] sm:$0xf]  ;;  %v135_v20 = vld [vmem:[%s11287_s7 + $0x4c] sm:$0xf]  ;;  %132 = vst [vmem:[#allocation2 + $0x50] sm:$0xf] %v131_v18 }
  0x1e   :  { %134 = vst [vmem:[#allocation2 + $0x54] sm:$0xf] %v133_v19  ;;  %136 = vst [vmem:[#allocation2 + $0x58] sm:$0xf] %v135_v20  ;;  %v141_v22 = vld [vmem:[%s11287_s7 + $0x70] sm:$0xf] }
  0x1f   :  { %v143_v23 = vld [vmem:[%s11287_s7 + $0x64] sm:$0xf]  ;;  %138 = vst [vmem:[#allocation2 + $0x5c] sm:$0xff] %v137_v21   ;;  %142 = vst [vmem:[#allocation2 + $0x64] sm:$0xf] %v141_v22  ;;  %v153_v28 = vld [vmem:[%s11287_s7 + $0x7c] sm:$0xff]  }
  0x20   :  { %144 = vst [vmem:[#allocation2 + $0x68] sm:$0xf] %v143_v23  ;;  %v145_v24 = vld [vmem:[%s11287_s7 + $0x74] sm:$0xf]  ;;  %v147_v25 = vld [vmem:[%s11287_s7 + $0x68] sm:$0xf] }
  0x21   :  { %v149_v26 = vld [vmem:[%s11287_s7 + $0x78] sm:$0xf]  ;;  %146 = vst [vmem:[#allocation2 + $0x6c] sm:$0xf] %v145_v24  ;;  %148 = vst [vmem:[#allocation2 + $0x70] sm:$0xf] %v147_v25 }
  0x22   :  { %150 = vst [vmem:[#allocation2 + $0x74] sm:$0xf] %v149_v26  ;;  %v151_v27 = vld [vmem:[%s11287_s7 + $0x6c] sm:$0xf]  ;;  %v157_v29 = vld [vmem:[%s11287_s7 + $0x90] sm:$0xf] }
  0x23   :  { %152 = vst [vmem:[#allocation2 + $0x78] sm:$0xf] %v151_v27  ;;  %154 = vst [vmem:[#allocation2 + $0x7c] sm:$0xff] %v153_v28   ;;  %v159_v30 = vld [vmem:[%s11287_s7 + $0x84] sm:$0xf]  ;;  %v169_v35 = vld [vmem:[%s11287_s7 + $0x9c] sm:$0xff]  }
  0x24   :  { %158 = vst [vmem:[#allocation2 + $0x84] sm:$0xf] %v157_v29  ;;  %v161_v31 = vld [vmem:[%s11287_s7 + $0x94] sm:$0xf]  ;;  %v163_v32 = vld [vmem:[%s11287_s7 + $0x88] sm:$0xf] }
  0x25   :  { %160 = vst [vmem:[#allocation2 + $0x88] sm:$0xf] %v159_v30  ;;  %162 = vst [vmem:[#allocation2 + $0x8c] sm:$0xf] %v161_v31  ;;  %v165_v33 = vld [vmem:[%s11287_s7 + $0x98] sm:$0xf] }
  0x26   :  { %164 = vst [vmem:[#allocation2 + $0x90] sm:$0xf] %v163_v32  ;;  %v167_v34 = vld [vmem:[%s11287_s7 + $0x8c] sm:$0xf]  ;;  %166 = vst [vmem:[#allocation2 + $0x94] sm:$0xf] %v165_v33 }
  0x27   :  { %168 = vst [vmem:[#allocation2 + $0x98] sm:$0xf] %v167_v34  ;;  %170 = vst [vmem:[#allocation2 + $0x9c] sm:$0xff] %v169_v35   ;;  %v173_v36 = vld [vmem:[%s11287_s7 + $0xb0] sm:$0xf]  ;;  %v185_v42 = vld [vmem:[%s11287_s7 + $0xbc] sm:$0xff]  }
  0x28   :  { %v175_v37 = vld [vmem:[%s11287_s7 + $0xa4] sm:$0xf]  ;;  %v177_v38 = vld [vmem:[%s11287_s7 + $0xb4] sm:$0xf]  ;;  %174 = vst [vmem:[#allocation2 + $0xa4] sm:$0xf] %v173_v36 }
  0x29   :  { %176 = vst [vmem:[#allocation2 + $0xa8] sm:$0xf] %v175_v37  ;;  %178 = vst [vmem:[#allocation2 + $0xac] sm:$0xf] %v177_v38  ;;  %v179_v39 = vld [vmem:[%s11287_s7 + $0xa8] sm:$0xf] }
  0x2a   :  { %v181_v40 = vld [vmem:[%s11287_s7 + $0xb8] sm:$0xf]  ;;  %v183_v41 = vld [vmem:[%s11287_s7 + $0xac] sm:$0xf]  ;;  %180 = vst [vmem:[#allocation2 + $0xb0] sm:$0xf] %v179_v39 }
  0x2b   :  { %182 = vst [vmem:[#allocation2 + $0xb4] sm:$0xf] %v181_v40  ;;  %184 = vst [vmem:[#allocation2 + $0xb8] sm:$0xf] %v183_v41  ;;  %v189_v43 = vld [vmem:[%s11287_s7 + $0xd0] sm:$0xf] }
  0x2c   :  { %v191_v44 = vld [vmem:[%s11287_s7 + $0xc4] sm:$0xf]  ;;  %186 = vst [vmem:[#allocation2 + $0xbc] sm:$0xff] %v185_v42   ;;  %190 = vst [vmem:[#allocation2 + $0xc4] sm:$0xf] %v189_v43  ;;  %v201_v49 = vld [vmem:[%s11287_s7 + $0xdc] sm:$0xff]  }
  0x2d   :  { %192 = vst [vmem:[#allocation2 + $0xc8] sm:$0xf] %v191_v44  ;;  %v193_v45 = vld [vmem:[%s11287_s7 + $0xd4] sm:$0xf]  ;;  %v195_v46 = vld [vmem:[%s11287_s7 + $0xc8] sm:$0xf] }
  0x2e   :  { %v197_v47 = vld [vmem:[%s11287_s7 + $0xd8] sm:$0xf]  ;;  %194 = vst [vmem:[#allocation2 + $0xcc] sm:$0xf] %v193_v45  ;;  %196 = vst [vmem:[#allocation2 + $0xd0] sm:$0xf] %v195_v46 }
  0x2f   :  { %198 = vst [vmem:[#allocation2 + $0xd4] sm:$0xf] %v197_v47  ;;  %v199_v48 = vld [vmem:[%s11287_s7 + $0xcc] sm:$0xf]  ;;  %v205_v50 = vld [vmem:[%s11287_s7 + $0xf0] sm:$0xf] }
  0x30   :  { %200 = vst [vmem:[#allocation2 + $0xd8] sm:$0xf] %v199_v48  ;;  %202 = vst [vmem:[#allocation2 + $0xdc] sm:$0xff] %v201_v49   ;;  %v207_v51 = vld [vmem:[%s11287_s7 + $0xe4] sm:$0xf]  ;;  %v217_v56 = vld [vmem:[%s11287_s7 + $0xfc] sm:$0xff]  }
  0x31   :  { %206 = vst [vmem:[#allocation2 + $0xe4] sm:$0xf] %v205_v50  ;;  %v209_v52 = vld [vmem:[%s11287_s7 + $0xf4] sm:$0xf]  ;;  %v211_v53 = vld [vmem:[%s11287_s7 + $0xe8] sm:$0xf] }
  0x32   :  { %208 = vst [vmem:[#allocation2 + $0xe8] sm:$0xf] %v207_v51  ;;  %210 = vst [vmem:[#allocation2 + $0xec] sm:$0xf] %v209_v52  ;;  %v213_v54 = vld [vmem:[%s11287_s7 + $0xf8] sm:$0xf] }
  0x33   :  { %212 = vst [vmem:[#allocation2 + $0xf0] sm:$0xf] %v211_v53  ;;  %v215_v55 = vld [vmem:[%s11287_s7 + $0xec] sm:$0xf]  ;;  %214 = vst [vmem:[#allocation2 + $0xf4] sm:$0xf] %v213_v54 }
  0x34   :  { %216 = vst [vmem:[#allocation2 + $0xf8] sm:$0xf] %v215_v55  ;;  %218 = vst [vmem:[#allocation2 + $0xfc] sm:$0xff] %v217_v56   ;;  %v221_v57 = vld [vmem:[%s11287_s7 + $0x110] sm:$0xf]  ;;  %v233_v63 = vld [vmem:[%s11287_s7 + $0x11c] sm:$0xff]  }
  0x35   :  { %v223_v58 = vld [vmem:[%s11287_s7 + $0x104] sm:$0xf]  ;;  %v225_v59 = vld [vmem:[%s11287_s7 + $0x114] sm:$0xf]  ;;  %222 = vst [vmem:[#allocation2 + $0x104] sm:$0xf] %v221_v57 }
  0x36   :  { %224 = vst [vmem:[#allocation2 + $0x108] sm:$0xf] %v223_v58  ;;  %226 = vst [vmem:[#allocation2 + $0x10c] sm:$0xf] %v225_v59  ;;  %v227_v60 = vld [vmem:[%s11287_s7 + $0x108] sm:$0xf] }
  0x37   :  { %v229_v61 = vld [vmem:[%s11287_s7 + $0x118] sm:$0xf]  ;;  %v231_v62 = vld [vmem:[%s11287_s7 + $0x10c] sm:$0xf]  ;;  %228 = vst [vmem:[#allocation2 + $0x110] sm:$0xf] %v227_v60 }
  0x38   :  { %230 = vst [vmem:[#allocation2 + $0x114] sm:$0xf] %v229_v61  ;;  %232 = vst [vmem:[#allocation2 + $0x118] sm:$0xf] %v231_v62  ;;  %v237_v0 = vld [vmem:[%s11287_s7 + $0x130] sm:$0xf] }
  0x39   :  { %v239_v1 = vld [vmem:[%s11287_s7 + $0x124] sm:$0xf]  ;;  %234 = vst [vmem:[#allocation2 + $0x11c] sm:$0xff] %v233_v63   ;;  %238 = vst [vmem:[#allocation2 + $0x124] sm:$0xf] %v237_v0  ;;  %v249_v6 = vld [vmem:[%s11287_s7 + $0x13c] sm:$0xff]  }
  0x3a   :  { %240 = vst [vmem:[#allocation2 + $0x128] sm:$0xf] %v239_v1  ;;  %v241_v2 = vld [vmem:[%s11287_s7 + $0x134] sm:$0xf]  ;;  %v243_v3 = vld [vmem:[%s11287_s7 + $0x128] sm:$0xf] }
  0x3b   :  { %v245_v4 = vld [vmem:[%s11287_s7 + $0x138] sm:$0xf]  ;;  %242 = vst [vmem:[#allocation2 + $0x12c] sm:$0xf] %v241_v2  ;;  %244 = vst [vmem:[#allocation2 + $0x130] sm:$0xf] %v243_v3 }
  0x3c   :  { %246 = vst [vmem:[#allocation2 + $0x134] sm:$0xf] %v245_v4  ;;  %v247_v5 = vld [vmem:[%s11287_s7 + $0x12c] sm:$0xf]  ;;  %v253_v7 = vld [vmem:[%s11287_s7 + $0x150] sm:$0xf] }
  0x3d   :  { %248 = vst [vmem:[#allocation2 + $0x138] sm:$0xf] %v247_v5  ;;  %250 = vst [vmem:[#allocation2 + $0x13c] sm:$0xff] %v249_v6   ;;  %v255_v8 = vld [vmem:[%s11287_s7 + $0x144] sm:$0xf]  ;;  %v265_v13 = vld [vmem:[%s11287_s7 + $0x15c] sm:$0xff]  }
  0x3e   :  { %254 = vst [vmem:[#allocation2 + $0x144] sm:$0xf] %v253_v7  ;;  %v257_v9 = vld [vmem:[%s11287_s7 + $0x154] sm:$0xf]  ;;  %v259_v10 = vld [vmem:[%s11287_s7 + $0x148] sm:$0xf] }
  0x3f   :  { %256 = vst [vmem:[#allocation2 + $0x148] sm:$0xf] %v255_v8  ;;  %258 = vst [vmem:[#allocation2 + $0x14c] sm:$0xf] %v257_v9  ;;  %v261_v11 = vld [vmem:[%s11287_s7 + $0x158] sm:$0xf] }
  0x40   :  { %260 = vst [vmem:[#allocation2 + $0x150] sm:$0xf] %v259_v10  ;;  %v263_v12 = vld [vmem:[%s11287_s7 + $0x14c] sm:$0xf]  ;;  %262 = vst [vmem:[#allocation2 + $0x154] sm:$0xf] %v261_v11 }
  0x41   :  { %264 = vst [vmem:[#allocation2 + $0x158] sm:$0xf] %v263_v12  ;;  %266 = vst [vmem:[#allocation2 + $0x15c] sm:$0xff] %v265_v13   ;;  %v269_v14 = vld [vmem:[%s11287_s7 + $0x170] sm:$0xf]  ;;  %v281_v20 = vld [vmem:[%s11287_s7 + $0x17c] sm:$0xff]  }
  0x42   :  { %v271_v15 = vld [vmem:[%s11287_s7 + $0x164] sm:$0xf]  ;;  %v273_v16 = vld [vmem:[%s11287_s7 + $0x174] sm:$0xf]  ;;  %270 = vst [vmem:[#allocation2 + $0x164] sm:$0xf] %v269_v14 }
  0x43   :  { %272 = vst [vmem:[#allocation2 + $0x168] sm:$0xf] %v271_v15  ;;  %274 = vst [vmem:[#allocation2 + $0x16c] sm:$0xf] %v273_v16  ;;  %v275_v17 = vld [vmem:[%s11287_s7 + $0x168] sm:$0xf] }
  0x44   :  { %v277_v18 = vld [vmem:[%s11287_s7 + $0x178] sm:$0xf]  ;;  %v279_v19 = vld [vmem:[%s11287_s7 + $0x16c] sm:$0xf]  ;;  %276 = vst [vmem:[#allocation2 + $0x170] sm:$0xf] %v275_v17 }
  0x45   :  { %278 = vst [vmem:[#allocation2 + $0x174] sm:$0xf] %v277_v18  ;;  %280 = vst [vmem:[#allocation2 + $0x178] sm:$0xf] %v279_v19  ;;  %v285_v21 = vld [vmem:[%s11287_s7 + $0x190] sm:$0xf] }
  0x46   :  { %v287_v22 = vld [vmem:[%s11287_s7 + $0x184] sm:$0xf]  ;;  %282 = vst [vmem:[#allocation2 + $0x17c] sm:$0xff] %v281_v20   ;;  %286 = vst [vmem:[#allocation2 + $0x184] sm:$0xf] %v285_v21  ;;  %v297_v27 = vld [vmem:[%s11287_s7 + $0x19c] sm:$0xff]  }
  0x47   :  { %288 = vst [vmem:[#allocation2 + $0x188] sm:$0xf] %v287_v22  ;;  %v289_v23 = vld [vmem:[%s11287_s7 + $0x194] sm:$0xf]  ;;  %v291_v24 = vld [vmem:[%s11287_s7 + $0x188] sm:$0xf] }
  0x48   :  { %v293_v25 = vld [vmem:[%s11287_s7 + $0x198] sm:$0xf]  ;;  %290 = vst [vmem:[#allocation2 + $0x18c] sm:$0xf] %v289_v23  ;;  %292 = vst [vmem:[#allocation2 + $0x190] sm:$0xf] %v291_v24 }
  0x49   :  { %294 = vst [vmem:[#allocation2 + $0x194] sm:$0xf] %v293_v25  ;;  %v295_v26 = vld [vmem:[%s11287_s7 + $0x18c] sm:$0xf]  ;;  %v301_v28 = vld [vmem:[%s11287_s7 + $0x1b0] sm:$0xf] }
  0x4a   :  { %296 = vst [vmem:[#allocation2 + $0x198] sm:$0xf] %v295_v26  ;;  %298 = vst [vmem:[#allocation2 + $0x19c] sm:$0xff] %v297_v27   ;;  %v303_v29 = vld [vmem:[%s11287_s7 + $0x1a4] sm:$0xf]  ;;  %v313_v34 = vld [vmem:[%s11287_s7 + $0x1bc] sm:$0xff]  }
  0x4b   :  { %302 = vst [vmem:[#allocation2 + $0x1a4] sm:$0xf] %v301_v28  ;;  %v305_v30 = vld [vmem:[%s11287_s7 + $0x1b4] sm:$0xf]  ;;  %v307_v31 = vld [vmem:[%s11287_s7 + $0x1a8] sm:$0xf] }
  0x4c   :  { %304 = vst [vmem:[#allocation2 + $0x1a8] sm:$0xf] %v303_v29  ;;  %306 = vst [vmem:[#allocation2 + $0x1ac] sm:$0xf] %v305_v30  ;;  %v309_v32 = vld [vmem:[%s11287_s7 + $0x1b8] sm:$0xf] }
  0x4d   :  { %308 = vst [vmem:[#allocation2 + $0x1b0] sm:$0xf] %v307_v31  ;;  %v311_v33 = vld [vmem:[%s11287_s7 + $0x1ac] sm:$0xf]  ;;  %310 = vst [vmem:[#allocation2 + $0x1b4] sm:$0xf] %v309_v32 }
  0x4e   :  { %312 = vst [vmem:[#allocation2 + $0x1b8] sm:$0xf] %v311_v33  ;;  %314 = vst [vmem:[#allocation2 + $0x1bc] sm:$0xff] %v313_v34   ;;  %v317_v35 = vld [vmem:[%s11287_s7 + $0x1d0] sm:$0xf]  ;;  %v329_v41 = vld [vmem:[%s11287_s7 + $0x1dc] sm:$0xff]  }
  0x4f   :  { %v319_v36 = vld [vmem:[%s11287_s7 + $0x1c4] sm:$0xf]  ;;  %v321_v37 = vld [vmem:[%s11287_s7 + $0x1d4] sm:$0xf]  ;;  %318 = vst [vmem:[#allocation2 + $0x1c4] sm:$0xf] %v317_v35 }
  0x50   :  { %320 = vst [vmem:[#allocation2 + $0x1c8] sm:$0xf] %v319_v36  ;;  %322 = vst [vmem:[#allocation2 + $0x1cc] sm:$0xf] %v321_v37  ;;  %v323_v38 = vld [vmem:[%s11287_s7 + $0x1c8] sm:$0xf] }
  0x51   :  { %v325_v39 = vld [vmem:[%s11287_s7 + $0x1d8] sm:$0xf]  ;;  %v327_v40 = vld [vmem:[%s11287_s7 + $0x1cc] sm:$0xf]  ;;  %324 = vst [vmem:[#allocation2 + $0x1d0] sm:$0xf] %v323_v38 }
  0x52   :  { %326 = vst [vmem:[#allocation2 + $0x1d4] sm:$0xf] %v325_v39  ;;  %328 = vst [vmem:[#allocation2 + $0x1d8] sm:$0xf] %v327_v40  ;;  %v333_v42 = vld [vmem:[%s11287_s7 + $0x1f0] sm:$0xf] }
  0x53   :  { %v335_v43 = vld [vmem:[%s11287_s7 + $0x1e4] sm:$0xf]  ;;  %330 = vst [vmem:[#allocation2 + $0x1dc] sm:$0xff] %v329_v41   ;;  %334 = vst [vmem:[#allocation2 + $0x1e4] sm:$0xf] %v333_v42  ;;  %v345_v48 = vld [vmem:[%s11287_s7 + $0x1fc] sm:$0xff]  }
  0x54   :  { %336 = vst [vmem:[#allocation2 + $0x1e8] sm:$0xf] %v335_v43  ;;  %v337_v44 = vld [vmem:[%s11287_s7 + $0x1f4] sm:$0xf]  ;;  %v339_v45 = vld [vmem:[%s11287_s7 + $0x1e8] sm:$0xf] }
  0x55   :  { %v341_v46 = vld [vmem:[%s11287_s7 + $0x1f8] sm:$0xf]  ;;  %338 = vst [vmem:[#allocation2 + $0x1ec] sm:$0xf] %v337_v44  ;;  %340 = vst [vmem:[#allocation2 + $0x1f0] sm:$0xf] %v339_v45 }
  0x56   :  { %342 = vst [vmem:[#allocation2 + $0x1f4] sm:$0xf] %v341_v46  ;;  %v343_v47 = vld [vmem:[%s11287_s7 + $0x1ec] sm:$0xf]  ;;  %v349_v49 = vld [vmem:[%s11287_s7 + $0x210] sm:$0xf] }
  0x57   :  { %344 = vst [vmem:[#allocation2 + $0x1f8] sm:$0xf] %v343_v47  ;;  %346 = vst [vmem:[#allocation2 + $0x1fc] sm:$0xff] %v345_v48   ;;  %v351_v50 = vld [vmem:[%s11287_s7 + $0x204] sm:$0xf]  ;;  %v361_v55 = vld [vmem:[%s11287_s7 + $0x21c] sm:$0xff]  }
  0x58   :  { %350 = vst [vmem:[#allocation2 + $0x204] sm:$0xf] %v349_v49  ;;  %v353_v51 = vld [vmem:[%s11287_s7 + $0x214] sm:$0xf]  ;;  %v355_v52 = vld [vmem:[%s11287_s7 + $0x208] sm:$0xf] }
  0x59   :  { %352 = vst [vmem:[#allocation2 + $0x208] sm:$0xf] %v351_v50  ;;  %354 = vst [vmem:[#allocation2 + $0x20c] sm:$0xf] %v353_v51  ;;  %v357_v53 = vld [vmem:[%s11287_s7 + $0x218] sm:$0xf] }
  0x5a   :  { %356 = vst [vmem:[#allocation2 + $0x210] sm:$0xf] %v355_v52  ;;  %v359_v54 = vld [vmem:[%s11287_s7 + $0x20c] sm:$0xf]  ;;  %358 = vst [vmem:[#allocation2 + $0x214] sm:$0xf] %v357_v53 }
  0x5b   :  { %360 = vst [vmem:[#allocation2 + $0x218] sm:$0xf] %v359_v54  ;;  %362 = vst [vmem:[#allocation2 + $0x21c] sm:$0xff] %v361_v55   ;;  %v365_v56 = vld [vmem:[%s11287_s7 + $0x230] sm:$0xf]  ;;  %v377_v62 = vld [vmem:[%s11287_s7 + $0x23c] sm:$0xff]  }
  0x5c   :  { %v367_v57 = vld [vmem:[%s11287_s7 + $0x224] sm:$0xf]  ;;  %v369_v58 = vld [vmem:[%s11287_s7 + $0x234] sm:$0xf]  ;;  %366 = vst [vmem:[#allocation2 + $0x224] sm:$0xf] %v365_v56 }
  0x5d   :  { %368 = vst [vmem:[#allocation2 + $0x228] sm:$0xf] %v367_v57  ;;  %370 = vst [vmem:[#allocation2 + $0x22c] sm:$0xf] %v369_v58  ;;  %v371_v59 = vld [vmem:[%s11287_s7 + $0x228] sm:$0xf] }
  0x5e   :  { %v373_v60 = vld [vmem:[%s11287_s7 + $0x238] sm:$0xf]  ;;  %v375_v61 = vld [vmem:[%s11287_s7 + $0x22c] sm:$0xf]  ;;  %372 = vst [vmem:[#allocation2 + $0x230] sm:$0xf] %v371_v59 }
  0x5f   :  { %374 = vst [vmem:[#allocation2 + $0x234] sm:$0xf] %v373_v60  ;;  %376 = vst [vmem:[#allocation2 + $0x238] sm:$0xf] %v375_v61  ;;  %v381_v63 = vld [vmem:[%s11287_s7 + $0x250] sm:$0xf] }
  0x60   :  { %v383_v0 = vld [vmem:[%s11287_s7 + $0x244] sm:$0xf]  ;;  %378 = vst [vmem:[#allocation2 + $0x23c] sm:$0xff] %v377_v62   ;;  %382 = vst [vmem:[#allocation2 + $0x244] sm:$0xf] %v381_v63  ;;  %v393_v5 = vld [vmem:[%s11287_s7 + $0x25c] sm:$0xff]  }
  0x61   :  { %384 = vst [vmem:[#allocation2 + $0x248] sm:$0xf] %v383_v0  ;;  %v385_v1 = vld [vmem:[%s11287_s7 + $0x254] sm:$0xf]  ;;  %v387_v2 = vld [vmem:[%s11287_s7 + $0x248] sm:$0xf] }
  0x62   :  { %v389_v3 = vld [vmem:[%s11287_s7 + $0x258] sm:$0xf]  ;;  %386 = vst [vmem:[#allocation2 + $0x24c] sm:$0xf] %v385_v1  ;;  %388 = vst [vmem:[#allocation2 + $0x250] sm:$0xf] %v387_v2 }
  0x63   :  { %390 = vst [vmem:[#allocation2 + $0x254] sm:$0xf] %v389_v3  ;;  %v391_v4 = vld [vmem:[%s11287_s7 + $0x24c] sm:$0xf]  ;;  %v397_v6 = vld [vmem:[%s11287_s7 + $0x270] sm:$0xf] }
  0x64   :  { %392 = vst [vmem:[#allocation2 + $0x258] sm:$0xf] %v391_v4  ;;  %394 = vst [vmem:[#allocation2 + $0x25c] sm:$0xff] %v393_v5   ;;  %v399_v7 = vld [vmem:[%s11287_s7 + $0x264] sm:$0xf]  ;;  %v409_v12 = vld [vmem:[%s11287_s7 + $0x27c] sm:$0xff]  }
  0x65   :  { %398 = vst [vmem:[#allocation2 + $0x264] sm:$0xf] %v397_v6  ;;  %v401_v8 = vld [vmem:[%s11287_s7 + $0x274] sm:$0xf]  ;;  %v403_v9 = vld [vmem:[%s11287_s7 + $0x268] sm:$0xf] }
  0x66   :  { %400 = vst [vmem:[#allocation2 + $0x268] sm:$0xf] %v399_v7  ;;  %402 = vst [vmem:[#allocation2 + $0x26c] sm:$0xf] %v401_v8  ;;  %v405_v10 = vld [vmem:[%s11287_s7 + $0x278] sm:$0xf] }
  0x67   :  { %404 = vst [vmem:[#allocation2 + $0x270] sm:$0xf] %v403_v9  ;;  %v407_v11 = vld [vmem:[%s11287_s7 + $0x26c] sm:$0xf]  ;;  %406 = vst [vmem:[#allocation2 + $0x274] sm:$0xf] %v405_v10 }
  0x68   :  { %408 = vst [vmem:[#allocation2 + $0x278] sm:$0xf] %v407_v11  ;;  %410 = vst [vmem:[#allocation2 + $0x27c] sm:$0xff] %v409_v12   ;;  %v413_v13 = vld [vmem:[%s11287_s7 + $0x290] sm:$0xf]  ;;  %v425_v19 = vld [vmem:[%s11287_s7 + $0x29c] sm:$0xff]  }
  0x69   :  { %v415_v14 = vld [vmem:[%s11287_s7 + $0x284] sm:$0xf]  ;;  %v417_v15 = vld [vmem:[%s11287_s7 + $0x294] sm:$0xf]  ;;  %414 = vst [vmem:[#allocation2 + $0x284] sm:$0xf] %v413_v13 }
  0x6a   :  { %416 = vst [vmem:[#allocation2 + $0x288] sm:$0xf] %v415_v14  ;;  %418 = vst [vmem:[#allocation2 + $0x28c] sm:$0xf] %v417_v15  ;;  %v419_v16 = vld [vmem:[%s11287_s7 + $0x288] sm:$0xf] }
  0x6b   :  { %v421_v17 = vld [vmem:[%s11287_s7 + $0x298] sm:$0xf]  ;;  %v423_v18 = vld [vmem:[%s11287_s7 + $0x28c] sm:$0xf]  ;;  %420 = vst [vmem:[#allocation2 + $0x290] sm:$0xf] %v419_v16 }
  0x6c   :  { %422 = vst [vmem:[#allocation2 + $0x294] sm:$0xf] %v421_v17  ;;  %424 = vst [vmem:[#allocation2 + $0x298] sm:$0xf] %v423_v18  ;;  %v429_v20 = vld [vmem:[%s11287_s7 + $0x2b0] sm:$0xf] }
  0x6d   :  { %v431_v21 = vld [vmem:[%s11287_s7 + $0x2a4] sm:$0xf]  ;;  %426 = vst [vmem:[#allocation2 + $0x29c] sm:$0xff] %v425_v19   ;;  %430 = vst [vmem:[#allocation2 + $0x2a4] sm:$0xf] %v429_v20  ;;  %v441_v26 = vld [vmem:[%s11287_s7 + $0x2bc] sm:$0xff]  }
  0x6e   :  { %432 = vst [vmem:[#allocation2 + $0x2a8] sm:$0xf] %v431_v21  ;;  %v433_v22 = vld [vmem:[%s11287_s7 + $0x2b4] sm:$0xf]  ;;  %v435_v23 = vld [vmem:[%s11287_s7 + $0x2a8] sm:$0xf] }
  0x6f   :  { %v437_v24 = vld [vmem:[%s11287_s7 + $0x2b8] sm:$0xf]  ;;  %434 = vst [vmem:[#allocation2 + $0x2ac] sm:$0xf] %v433_v22  ;;  %436 = vst [vmem:[#allocation2 + $0x2b0] sm:$0xf] %v435_v23 }
  0x70   :  { %438 = vst [vmem:[#allocation2 + $0x2b4] sm:$0xf] %v437_v24  ;;  %v439_v25 = vld [vmem:[%s11287_s7 + $0x2ac] sm:$0xf]  ;;  %v445_v27 = vld [vmem:[%s11287_s7 + $0x2d0] sm:$0xf] }
  0x71   :  { %440 = vst [vmem:[#allocation2 + $0x2b8] sm:$0xf] %v439_v25  ;;  %442 = vst [vmem:[#allocation2 + $0x2bc] sm:$0xff] %v441_v26   ;;  %v447_v28 = vld [vmem:[%s11287_s7 + $0x2c4] sm:$0xf]  ;;  %v457_v33 = vld [vmem:[%s11287_s7 + $0x2dc] sm:$0xff]  }
  0x72   :  { %446 = vst [vmem:[#allocation2 + $0x2c4] sm:$0xf] %v445_v27  ;;  %v449_v29 = vld [vmem:[%s11287_s7 + $0x2d4] sm:$0xf]  ;;  %v451_v30 = vld [vmem:[%s11287_s7 + $0x2c8] sm:$0xf] }
  0x73   :  { %448 = vst [vmem:[#allocation2 + $0x2c8] sm:$0xf] %v447_v28  ;;  %450 = vst [vmem:[#allocation2 + $0x2cc] sm:$0xf] %v449_v29  ;;  %v453_v31 = vld [vmem:[%s11287_s7 + $0x2d8] sm:$0xf] }
  0x74   :  { %452 = vst [vmem:[#allocation2 + $0x2d0] sm:$0xf] %v451_v30  ;;  %v455_v32 = vld [vmem:[%s11287_s7 + $0x2cc] sm:$0xf]  ;;  %454 = vst [vmem:[#allocation2 + $0x2d4] sm:$0xf] %v453_v31 }
  0x75   :  { %456 = vst [vmem:[#allocation2 + $0x2d8] sm:$0xf] %v455_v32  ;;  %458 = vst [vmem:[#allocation2 + $0x2dc] sm:$0xff] %v457_v33   ;;  %v461_v34 = vld [vmem:[%s11287_s7 + $0x2f0] sm:$0xf]  ;;  %v473_v40 = vld [vmem:[%s11287_s7 + $0x2fc] sm:$0xff]  }
  0x76   :  { %v463_v35 = vld [vmem:[%s11287_s7 + $0x2e4] sm:$0xf]  ;;  %v465_v36 = vld [vmem:[%s11287_s7 + $0x2f4] sm:$0xf]  ;;  %462 = vst [vmem:[#allocation2 + $0x2e4] sm:$0xf] %v461_v34 }
  0x77   :  { %464 = vst [vmem:[#allocation2 + $0x2e8] sm:$0xf] %v463_v35  ;;  %466 = vst [vmem:[#allocation2 + $0x2ec] sm:$0xf] %v465_v36  ;;  %v467_v37 = vld [vmem:[%s11287_s7 + $0x2e8] sm:$0xf] }
  0x78   :  { %v469_v38 = vld [vmem:[%s11287_s7 + $0x2f8] sm:$0xf]  ;;  %v471_v39 = vld [vmem:[%s11287_s7 + $0x2ec] sm:$0xf]  ;;  %468 = vst [vmem:[#allocation2 + $0x2f0] sm:$0xf] %v467_v37 }
  0x79   :  { %470 = vst [vmem:[#allocation2 + $0x2f4] sm:$0xf] %v469_v38  ;;  %472 = vst [vmem:[#allocation2 + $0x2f8] sm:$0xf] %v471_v39  ;;  %v477_v41 = vld [vmem:[%s11287_s7 + $0x310] sm:$0xf] }
  0x7a   :  { %v479_v42 = vld [vmem:[%s11287_s7 + $0x304] sm:$0xf]  ;;  %474 = vst [vmem:[#allocation2 + $0x2fc] sm:$0xff] %v473_v40   ;;  %478 = vst [vmem:[#allocation2 + $0x304] sm:$0xf] %v477_v41  ;;  %v489_v47 = vld [vmem:[%s11287_s7 + $0x31c] sm:$0xff]  }
  0x7b   :  { %480 = vst [vmem:[#allocation2 + $0x308] sm:$0xf] %v479_v42  ;;  %v481_v43 = vld [vmem:[%s11287_s7 + $0x314] sm:$0xf]  ;;  %v483_v44 = vld [vmem:[%s11287_s7 + $0x308] sm:$0xf] }
  0x7c   :  { %v485_v45 = vld [vmem:[%s11287_s7 + $0x318] sm:$0xf]  ;;  %482 = vst [vmem:[#allocation2 + $0x30c] sm:$0xf] %v481_v43  ;;  %484 = vst [vmem:[#allocation2 + $0x310] sm:$0xf] %v483_v44 }
  0x7d   :  { %486 = vst [vmem:[#allocation2 + $0x314] sm:$0xf] %v485_v45  ;;  %v487_v46 = vld [vmem:[%s11287_s7 + $0x30c] sm:$0xf]  ;;  %v493_v48 = vld [vmem:[%s11287_s7 + $0x330] sm:$0xf] }
  0x7e   :  { %488 = vst [vmem:[#allocation2 + $0x318] sm:$0xf] %v487_v46  ;;  %490 = vst [vmem:[#allocation2 + $0x31c] sm:$0xff] %v489_v47   ;;  %v495_v49 = vld [vmem:[%s11287_s7 + $0x324] sm:$0xf]  ;;  %v505_v54 = vld [vmem:[%s11287_s7 + $0x33c] sm:$0xff]  }
  0x7f   :  { %494 = vst [vmem:[#allocation2 + $0x324] sm:$0xf] %v493_v48  ;;  %v497_v50 = vld [vmem:[%s11287_s7 + $0x334] sm:$0xf]  ;;  %v499_v51 = vld [vmem:[%s11287_s7 + $0x328] sm:$0xf] }
  0x80   :  { %496 = vst [vmem:[#allocation2 + $0x328] sm:$0xf] %v495_v49  ;;  %498 = vst [vmem:[#allocation2 + $0x32c] sm:$0xf] %v497_v50  ;;  %v501_v52 = vld [vmem:[%s11287_s7 + $0x338] sm:$0xf] }
  0x81   :  { %500 = vst [vmem:[#allocation2 + $0x330] sm:$0xf] %v499_v51  ;;  %v503_v53 = vld [vmem:[%s11287_s7 + $0x32c] sm:$0xf]  ;;  %502 = vst [vmem:[#allocation2 + $0x334] sm:$0xf] %v501_v52 }
  0x82   :  { %504 = vst [vmem:[#allocation2 + $0x338] sm:$0xf] %v503_v53  ;;  %506 = vst [vmem:[#allocation2 + $0x33c] sm:$0xff] %v505_v54   ;;  %v509_v55 = vld [vmem:[%s11287_s7 + $0x350] sm:$0xf]  ;;  %v521_v61 = vld [vmem:[%s11287_s7 + $0x35c] sm:$0xff]  }
  0x83   :  { %v511_v56 = vld [vmem:[%s11287_s7 + $0x344] sm:$0xf]  ;;  %v513_v57 = vld [vmem:[%s11287_s7 + $0x354] sm:$0xf]  ;;  %510 = vst [vmem:[#allocation2 + $0x344] sm:$0xf] %v509_v55 }
  0x84   :  { %512 = vst [vmem:[#allocation2 + $0x348] sm:$0xf] %v511_v56  ;;  %514 = vst [vmem:[#allocation2 + $0x34c] sm:$0xf] %v513_v57  ;;  %v515_v58 = vld [vmem:[%s11287_s7 + $0x348] sm:$0xf] }
  0x85   :  { %v517_v59 = vld [vmem:[%s11287_s7 + $0x358] sm:$0xf]  ;;  %v519_v60 = vld [vmem:[%s11287_s7 + $0x34c] sm:$0xf]  ;;  %516 = vst [vmem:[#allocation2 + $0x350] sm:$0xf] %v515_v58 }
  0x86   :  { %518 = vst [vmem:[#allocation2 + $0x354] sm:$0xf] %v517_v59  ;;  %520 = vst [vmem:[#allocation2 + $0x358] sm:$0xf] %v519_v60  ;;  %v525_v62 = vld [vmem:[%s11287_s7 + $0x370] sm:$0xf] }
  0x87   :  { %v527_v63 = vld [vmem:[%s11287_s7 + $0x364] sm:$0xf]  ;;  %522 = vst [vmem:[#allocation2 + $0x35c] sm:$0xff] %v521_v61   ;;  %526 = vst [vmem:[#allocation2 + $0x364] sm:$0xf] %v525_v62  ;;  %v537_v4 = vld [vmem:[%s11287_s7 + $0x37c] sm:$0xff]  }
  0x88   :  { %528 = vst [vmem:[#allocation2 + $0x368] sm:$0xf] %v527_v63  ;;  %v529_v0 = vld [vmem:[%s11287_s7 + $0x374] sm:$0xf]  ;;  %v531_v1 = vld [vmem:[%s11287_s7 + $0x368] sm:$0xf] }
  0x89   :  { %v533_v2 = vld [vmem:[%s11287_s7 + $0x378] sm:$0xf]  ;;  %530 = vst [vmem:[#allocation2 + $0x36c] sm:$0xf] %v529_v0  ;;  %532 = vst [vmem:[#allocation2 + $0x370] sm:$0xf] %v531_v1 }
  0x8a   :  { %534 = vst [vmem:[#allocation2 + $0x374] sm:$0xf] %v533_v2  ;;  %v535_v3 = vld [vmem:[%s11287_s7 + $0x36c] sm:$0xf]  ;;  %v541_v5 = vld [vmem:[%s11287_s7 + $0x390] sm:$0xf] }
  0x8b   :  { %536 = vst [vmem:[#allocation2 + $0x378] sm:$0xf] %v535_v3  ;;  %538 = vst [vmem:[#allocation2 + $0x37c] sm:$0xff] %v537_v4   ;;  %v543_v6 = vld [vmem:[%s11287_s7 + $0x384] sm:$0xf]  ;;  %v553_v11 = vld [vmem:[%s11287_s7 + $0x39c] sm:$0xff]  }
  0x8c   :  { %542 = vst [vmem:[#allocation2 + $0x384] sm:$0xf] %v541_v5  ;;  %v545_v7 = vld [vmem:[%s11287_s7 + $0x394] sm:$0xf]  ;;  %v547_v8 = vld [vmem:[%s11287_s7 + $0x388] sm:$0xf] }
  0x8d   :  { %544 = vst [vmem:[#allocation2 + $0x388] sm:$0xf] %v543_v6  ;;  %546 = vst [vmem:[#allocation2 + $0x38c] sm:$0xf] %v545_v7  ;;  %v549_v9 = vld [vmem:[%s11287_s7 + $0x398] sm:$0xf] }
  0x8e   :  { %548 = vst [vmem:[#allocation2 + $0x390] sm:$0xf] %v547_v8  ;;  %v551_v10 = vld [vmem:[%s11287_s7 + $0x38c] sm:$0xf]  ;;  %550 = vst [vmem:[#allocation2 + $0x394] sm:$0xf] %v549_v9 }
  0x8f   :  { %552 = vst [vmem:[#allocation2 + $0x398] sm:$0xf] %v551_v10  ;;  %554 = vst [vmem:[#allocation2 + $0x39c] sm:$0xff] %v553_v11   ;;  %v557_v12 = vld [vmem:[%s11287_s7 + $0x3b0] sm:$0xf]  ;;  %v569_v18 = vld [vmem:[%s11287_s7 + $0x3bc] sm:$0xff]  }
  0x90   :  { %v559_v13 = vld [vmem:[%s11287_s7 + $0x3a4] sm:$0xf]  ;;  %v561_v14 = vld [vmem:[%s11287_s7 + $0x3b4] sm:$0xf]  ;;  %558 = vst [vmem:[#allocation2 + $0x3a4] sm:$0xf] %v557_v12 }
  0x91   :  { %560 = vst [vmem:[#allocation2 + $0x3a8] sm:$0xf] %v559_v13  ;;  %562 = vst [vmem:[#allocation2 + $0x3ac] sm:$0xf] %v561_v14  ;;  %v563_v15 = vld [vmem:[%s11287_s7 + $0x3a8] sm:$0xf] }
  0x92   :  { %v565_v16 = vld [vmem:[%s11287_s7 + $0x3b8] sm:$0xf]  ;;  %v567_v17 = vld [vmem:[%s11287_s7 + $0x3ac] sm:$0xf]  ;;  %564 = vst [vmem:[#allocation2 + $0x3b0] sm:$0xf] %v563_v15 }
  0x93   :  { %566 = vst [vmem:[#allocation2 + $0x3b4] sm:$0xf] %v565_v16  ;;  %568 = vst [vmem:[#allocation2 + $0x3b8] sm:$0xf] %v567_v17  ;;  %v573_v19 = vld [vmem:[%s11287_s7 + $0x3d0] sm:$0xf] }
  0x94   :  { %v575_v20 = vld [vmem:[%s11287_s7 + $0x3c4] sm:$0xf]  ;;  %570 = vst [vmem:[#allocation2 + $0x3bc] sm:$0xff] %v569_v18   ;;  %574 = vst [vmem:[#allocation2 + $0x3c4] sm:$0xf] %v573_v19  ;;  %v585_v25 = vld [vmem:[%s11287_s7 + $0x3dc] sm:$0xff]  }
  0x95   :  { %576 = vst [vmem:[#allocation2 + $0x3c8] sm:$0xf] %v575_v20  ;;  %v577_v21 = vld [vmem:[%s11287_s7 + $0x3d4] sm:$0xf]  ;;  %v579_v22 = vld [vmem:[%s11287_s7 + $0x3c8] sm:$0xf] }
  0x96   :  { %v581_v23 = vld [vmem:[%s11287_s7 + $0x3d8] sm:$0xf]  ;;  %578 = vst [vmem:[#allocation2 + $0x3cc] sm:$0xf] %v577_v21  ;;  %580 = vst [vmem:[#allocation2 + $0x3d0] sm:$0xf] %v579_v22 }
  0x97   :  { %582 = vst [vmem:[#allocation2 + $0x3d4] sm:$0xf] %v581_v23  ;;  %v583_v24 = vld [vmem:[%s11287_s7 + $0x3cc] sm:$0xf]  ;;  %v589_v26 = vld [vmem:[%s11287_s7 + $0x3f0] sm:$0xf] }
  0x98   :  { %584 = vst [vmem:[#allocation2 + $0x3d8] sm:$0xf] %v583_v24  ;;  %586 = vst [vmem:[#allocation2 + $0x3dc] sm:$0xff] %v585_v25   ;;  %v591_v27 = vld [vmem:[%s11287_s7 + $0x3e4] sm:$0xf]  ;;  %v601_v32 = vld [vmem:[%s11287_s7 + $0x3fc] sm:$0xff]  }
  0x99   :  { %590 = vst [vmem:[#allocation2 + $0x3e4] sm:$0xf] %v589_v26  ;;  %v593_v28 = vld [vmem:[%s11287_s7 + $0x3f4] sm:$0xf]  ;;  %v595_v29 = vld [vmem:[%s11287_s7 + $0x3e8] sm:$0xf] }
  0x9a   :  { %592 = vst [vmem:[#allocation2 + $0x3e8] sm:$0xf] %v591_v27  ;;  %594 = vst [vmem:[#allocation2 + $0x3ec] sm:$0xf] %v593_v28  ;;  %v597_v30 = vld [vmem:[%s11287_s7 + $0x3f8] sm:$0xf] }
  0x9b   :  { %596 = vst [vmem:[#allocation2 + $0x3f0] sm:$0xf] %v595_v29  ;;  %v599_v31 = vld [vmem:[%s11287_s7 + $0x3ec] sm:$0xf]  ;;  %598 = vst [vmem:[#allocation2 + $0x3f4] sm:$0xf] %v597_v30 }
  0x9c   :  { %600 = vst [vmem:[#allocation2 + $0x3f8] sm:$0xf] %v599_v31  ;;  %602 = vst [vmem:[#allocation2 + $0x3fc] sm:$0xff] %v601_v32   ;;  %v605_v33 = vld [vmem:[%s11287_s7 + $0x410] sm:$0xf]  ;;  %v617_v39 = vld [vmem:[%s11287_s7 + $0x41c] sm:$0xff]  }
  0x9d   :  { %v607_v34 = vld [vmem:[%s11287_s7 + $0x404] sm:$0xf]  ;;  %v609_v35 = vld [vmem:[%s11287_s7 + $0x414] sm:$0xf]  ;;  %606 = vst [vmem:[#allocation2 + $0x404] sm:$0xf] %v605_v33 }
  0x9e   :  { %608 = vst [vmem:[#allocation2 + $0x408] sm:$0xf] %v607_v34  ;;  %610 = vst [vmem:[#allocation2 + $0x40c] sm:$0xf] %v609_v35  ;;  %v611_v36 = vld [vmem:[%s11287_s7 + $0x408] sm:$0xf] }
  0x9f   :  { %v613_v37 = vld [vmem:[%s11287_s7 + $0x418] sm:$0xf]  ;;  %v615_v38 = vld [vmem:[%s11287_s7 + $0x40c] sm:$0xf]  ;;  %612 = vst [vmem:[#allocation2 + $0x410] sm:$0xf] %v611_v36 }
  0xa0   :  { %614 = vst [vmem:[#allocation2 + $0x414] sm:$0xf] %v613_v37  ;;  %616 = vst [vmem:[#allocation2 + $0x418] sm:$0xf] %v615_v38  ;;  %v621_v40 = vld [vmem:[%s11287_s7 + $0x430] sm:$0xf] }
  0xa1   :  { %v623_v41 = vld [vmem:[%s11287_s7 + $0x424] sm:$0xf]  ;;  %618 = vst [vmem:[#allocation2 + $0x41c] sm:$0xff] %v617_v39   ;;  %622 = vst [vmem:[#allocation2 + $0x424] sm:$0xf] %v621_v40  ;;  %v633_v46 = vld [vmem:[%s11287_s7 + $0x43c] sm:$0xff]  }
  0xa2   :  { %624 = vst [vmem:[#allocation2 + $0x428] sm:$0xf] %v623_v41  ;;  %v625_v42 = vld [vmem:[%s11287_s7 + $0x434] sm:$0xf]  ;;  %v627_v43 = vld [vmem:[%s11287_s7 + $0x428] sm:$0xf] }
  0xa3   :  { %v629_v44 = vld [vmem:[%s11287_s7 + $0x438] sm:$0xf]  ;;  %626 = vst [vmem:[#allocation2 + $0x42c] sm:$0xf] %v625_v42  ;;  %628 = vst [vmem:[#allocation2 + $0x430] sm:$0xf] %v627_v43 }
  0xa4   :  { %630 = vst [vmem:[#allocation2 + $0x434] sm:$0xf] %v629_v44  ;;  %v631_v45 = vld [vmem:[%s11287_s7 + $0x42c] sm:$0xf]  ;;  %v637_v47 = vld [vmem:[%s11287_s7 + $0x450] sm:$0xf] }
  0xa5   :  { %632 = vst [vmem:[#allocation2 + $0x438] sm:$0xf] %v631_v45  ;;  %634 = vst [vmem:[#allocation2 + $0x43c] sm:$0xff] %v633_v46   ;;  %v639_v48 = vld [vmem:[%s11287_s7 + $0x444] sm:$0xf]  ;;  %v649_v53 = vld [vmem:[%s11287_s7 + $0x45c] sm:$0xff]  }
  0xa6   :  { %638 = vst [vmem:[#allocation2 + $0x444] sm:$0xf] %v637_v47  ;;  %v641_v49 = vld [vmem:[%s11287_s7 + $0x454] sm:$0xf]  ;;  %v643_v50 = vld [vmem:[%s11287_s7 + $0x448] sm:$0xf] }
  0xa7   :  { %640 = vst [vmem:[#allocation2 + $0x448] sm:$0xf] %v639_v48  ;;  %642 = vst [vmem:[#allocation2 + $0x44c] sm:$0xf] %v641_v49  ;;  %v645_v51 = vld [vmem:[%s11287_s7 + $0x458] sm:$0xf] }
  0xa8   :  { %644 = vst [vmem:[#allocation2 + $0x450] sm:$0xf] %v643_v50  ;;  %v647_v52 = vld [vmem:[%s11287_s7 + $0x44c] sm:$0xf]  ;;  %646 = vst [vmem:[#allocation2 + $0x454] sm:$0xf] %v645_v51 }
  0xa9   :  { %648 = vst [vmem:[#allocation2 + $0x458] sm:$0xf] %v647_v52  ;;  %650 = vst [vmem:[#allocation2 + $0x45c] sm:$0xff] %v649_v53   ;;  %v653_v54 = vld [vmem:[%s11287_s7 + $0x470] sm:$0xf]  ;;  %v665_v60 = vld [vmem:[%s11287_s7 + $0x47c] sm:$0xff]  }
  0xaa   :  { %v655_v55 = vld [vmem:[%s11287_s7 + $0x464] sm:$0xf]  ;;  %v657_v56 = vld [vmem:[%s11287_s7 + $0x474] sm:$0xf]  ;;  %654 = vst [vmem:[#allocation2 + $0x464] sm:$0xf] %v653_v54 }
  0xab   :  { %656 = vst [vmem:[#allocation2 + $0x468] sm:$0xf] %v655_v55  ;;  %658 = vst [vmem:[#allocation2 + $0x46c] sm:$0xf] %v657_v56  ;;  %v659_v57 = vld [vmem:[%s11287_s7 + $0x468] sm:$0xf] }
  0xac   :  { %v661_v58 = vld [vmem:[%s11287_s7 + $0x478] sm:$0xf]  ;;  %v663_v59 = vld [vmem:[%s11287_s7 + $0x46c] sm:$0xf]  ;;  %660 = vst [vmem:[#allocation2 + $0x470] sm:$0xf] %v659_v57 }
  0xad   :  { %662 = vst [vmem:[#allocation2 + $0x474] sm:$0xf] %v661_v58  ;;  %664 = vst [vmem:[#allocation2 + $0x478] sm:$0xf] %v663_v59  ;;  %v669_v61 = vld [vmem:[%s11287_s7 + $0x490] sm:$0xf] }
  0xae   :  { %v671_v62 = vld [vmem:[%s11287_s7 + $0x484] sm:$0xf]  ;;  %666 = vst [vmem:[#allocation2 + $0x47c] sm:$0xff] %v665_v60   ;;  %670 = vst [vmem:[#allocation2 + $0x484] sm:$0xf] %v669_v61  ;;  %v681_v3 = vld [vmem:[%s11287_s7 + $0x49c] sm:$0xff]  }
  0xaf   :  { %672 = vst [vmem:[#allocation2 + $0x488] sm:$0xf] %v671_v62  ;;  %v673_v63 = vld [vmem:[%s11287_s7 + $0x494] sm:$0xf]  ;;  %v675_v0 = vld [vmem:[%s11287_s7 + $0x488] sm:$0xf] }
  0xb0   :  { %v677_v1 = vld [vmem:[%s11287_s7 + $0x498] sm:$0xf]  ;;  %674 = vst [vmem:[#allocation2 + $0x48c] sm:$0xf] %v673_v63  ;;  %676 = vst [vmem:[#allocation2 + $0x490] sm:$0xf] %v675_v0 }
  0xb1   :  { %678 = vst [vmem:[#allocation2 + $0x494] sm:$0xf] %v677_v1  ;;  %v679_v2 = vld [vmem:[%s11287_s7 + $0x48c] sm:$0xf]  ;;  %v685_v4 = vld [vmem:[%s11287_s7 + $0x4b0] sm:$0xf] }
  0xb2   :  { %680 = vst [vmem:[#allocation2 + $0x498] sm:$0xf] %v679_v2  ;;  %682 = vst [vmem:[#allocation2 + $0x49c] sm:$0xff] %v681_v3   ;;  %v687_v5 = vld [vmem:[%s11287_s7 + $0x4a4] sm:$0xf]  ;;  %v697_v10 = vld [vmem:[%s11287_s7 + $0x4bc] sm:$0xff]  }
  0xb3   :  { %686 = vst [vmem:[#allocation2 + $0x4a4] sm:$0xf] %v685_v4  ;;  %v689_v6 = vld [vmem:[%s11287_s7 + $0x4b4] sm:$0xf]  ;;  %v691_v7 = vld [vmem:[%s11287_s7 + $0x4a8] sm:$0xf] }
  0xb4   :  { %688 = vst [vmem:[#allocation2 + $0x4a8] sm:$0xf] %v687_v5  ;;  %690 = vst [vmem:[#allocation2 + $0x4ac] sm:$0xf] %v689_v6  ;;  %v693_v8 = vld [vmem:[%s11287_s7 + $0x4b8] sm:$0xf] }
  0xb5   :  { %692 = vst [vmem:[#allocation2 + $0x4b0] sm:$0xf] %v691_v7  ;;  %v695_v9 = vld [vmem:[%s11287_s7 + $0x4ac] sm:$0xf]  ;;  %694 = vst [vmem:[#allocation2 + $0x4b4] sm:$0xf] %v693_v8 }
  0xb6   :  { %696 = vst [vmem:[#allocation2 + $0x4b8] sm:$0xf] %v695_v9  ;;  %698 = vst [vmem:[#allocation2 + $0x4bc] sm:$0xff] %v697_v10   ;;  %v701_v11 = vld [vmem:[%s11287_s7 + $0x4d0] sm:$0xf]  ;;  %v713_v17 = vld [vmem:[%s11287_s7 + $0x4dc] sm:$0xff]  }
  0xb7   :  { %v703_v12 = vld [vmem:[%s11287_s7 + $0x4c4] sm:$0xf]  ;;  %v705_v13 = vld [vmem:[%s11287_s7 + $0x4d4] sm:$0xf]  ;;  %702 = vst [vmem:[#allocation2 + $0x4c4] sm:$0xf] %v701_v11 }
  0xb8   :  { %704 = vst [vmem:[#allocation2 + $0x4c8] sm:$0xf] %v703_v12  ;;  %706 = vst [vmem:[#allocation2 + $0x4cc] sm:$0xf] %v705_v13  ;;  %v707_v14 = vld [vmem:[%s11287_s7 + $0x4c8] sm:$0xf] }
  0xb9   :  { %v709_v15 = vld [vmem:[%s11287_s7 + $0x4d8] sm:$0xf]  ;;  %v711_v16 = vld [vmem:[%s11287_s7 + $0x4cc] sm:$0xf]  ;;  %708 = vst [vmem:[#allocation2 + $0x4d0] sm:$0xf] %v707_v14 }
  0xba   :  { %710 = vst [vmem:[#allocation2 + $0x4d4] sm:$0xf] %v709_v15  ;;  %712 = vst [vmem:[#allocation2 + $0x4d8] sm:$0xf] %v711_v16  ;;  %v717_v18 = vld [vmem:[%s11287_s7 + $0x4f0] sm:$0xf] }
  0xbb   :  { %v719_v19 = vld [vmem:[%s11287_s7 + $0x4e4] sm:$0xf]  ;;  %714 = vst [vmem:[#allocation2 + $0x4dc] sm:$0xff] %v713_v17   ;;  %718 = vst [vmem:[#allocation2 + $0x4e4] sm:$0xf] %v717_v18  ;;  %v729_v24 = vld [vmem:[%s11287_s7 + $0x4fc] sm:$0xff]  }
  0xbc   :  { %720 = vst [vmem:[#allocation2 + $0x4e8] sm:$0xf] %v719_v19  ;;  %v721_v20 = vld [vmem:[%s11287_s7 + $0x4f4] sm:$0xf]  ;;  %v723_v21 = vld [vmem:[%s11287_s7 + $0x4e8] sm:$0xf] }
  0xbd   :  { %v725_v22 = vld [vmem:[%s11287_s7 + $0x4f8] sm:$0xf]  ;;  %722 = vst [vmem:[#allocation2 + $0x4ec] sm:$0xf] %v721_v20  ;;  %724 = vst [vmem:[#allocation2 + $0x4f0] sm:$0xf] %v723_v21 }
  0xbe   :  { %726 = vst [vmem:[#allocation2 + $0x4f4] sm:$0xf] %v725_v22  ;;  %v727_v23 = vld [vmem:[%s11287_s7 + $0x4ec] sm:$0xf]  ;;  %v733_v25 = vld [vmem:[%s11287_s7 + $0x510] sm:$0xf] }
  0xbf   :  { %728 = vst [vmem:[#allocation2 + $0x4f8] sm:$0xf] %v727_v23  ;;  %730 = vst [vmem:[#allocation2 + $0x4fc] sm:$0xff] %v729_v24   ;;  %v735_v26 = vld [vmem:[%s11287_s7 + $0x504] sm:$0xf]  ;;  %v745_v31 = vld [vmem:[%s11287_s7 + $0x51c] sm:$0xff]  }
  0xc0   :  { %734 = vst [vmem:[#allocation2 + $0x504] sm:$0xf] %v733_v25  ;;  %v737_v27 = vld [vmem:[%s11287_s7 + $0x514] sm:$0xf]  ;;  %v739_v28 = vld [vmem:[%s11287_s7 + $0x508] sm:$0xf] }
  0xc1   :  { %736 = vst [vmem:[#allocation2 + $0x508] sm:$0xf] %v735_v26  ;;  %738 = vst [vmem:[#allocation2 + $0x50c] sm:$0xf] %v737_v27  ;;  %v741_v29 = vld [vmem:[%s11287_s7 + $0x518] sm:$0xf] }
  0xc2   :  { %740 = vst [vmem:[#allocation2 + $0x510] sm:$0xf] %v739_v28  ;;  %v743_v30 = vld [vmem:[%s11287_s7 + $0x50c] sm:$0xf]  ;;  %742 = vst [vmem:[#allocation2 + $0x514] sm:$0xf] %v741_v29 }
  0xc3   :  { %744 = vst [vmem:[#allocation2 + $0x518] sm:$0xf] %v743_v30  ;;  %746 = vst [vmem:[#allocation2 + $0x51c] sm:$0xff] %v745_v31   ;;  %v749_v32 = vld [vmem:[%s11287_s7 + $0x530] sm:$0xf]  ;;  %v761_v38 = vld [vmem:[%s11287_s7 + $0x53c] sm:$0xff]  }
  0xc4   :  { %v751_v33 = vld [vmem:[%s11287_s7 + $0x524] sm:$0xf]  ;;  %v753_v34 = vld [vmem:[%s11287_s7 + $0x534] sm:$0xf]  ;;  %750 = vst [vmem:[#allocation2 + $0x524] sm:$0xf] %v749_v32 }
  0xc5   :  { %752 = vst [vmem:[#allocation2 + $0x528] sm:$0xf] %v751_v33  ;;  %754 = vst [vmem:[#allocation2 + $0x52c] sm:$0xf] %v753_v34  ;;  %v755_v35 = vld [vmem:[%s11287_s7 + $0x528] sm:$0xf] }
  0xc6   :  { %v757_v36 = vld [vmem:[%s11287_s7 + $0x538] sm:$0xf]  ;;  %v759_v37 = vld [vmem:[%s11287_s7 + $0x52c] sm:$0xf]  ;;  %756 = vst [vmem:[#allocation2 + $0x530] sm:$0xf] %v755_v35 }
  0xc7   :  { %758 = vst [vmem:[#allocation2 + $0x534] sm:$0xf] %v757_v36  ;;  %760 = vst [vmem:[#allocation2 + $0x538] sm:$0xf] %v759_v37  ;;  %v765_v39 = vld [vmem:[%s11287_s7 + $0x550] sm:$0xf] }
  0xc8   :  { %v767_v40 = vld [vmem:[%s11287_s7 + $0x544] sm:$0xf]  ;;  %762 = vst [vmem:[#allocation2 + $0x53c] sm:$0xff] %v761_v38   ;;  %766 = vst [vmem:[#allocation2 + $0x544] sm:$0xf] %v765_v39  ;;  %v777_v45 = vld [vmem:[%s11287_s7 + $0x55c] sm:$0xff]  }
  0xc9   :  { %768 = vst [vmem:[#allocation2 + $0x548] sm:$0xf] %v767_v40  ;;  %v769_v41 = vld [vmem:[%s11287_s7 + $0x554] sm:$0xf]  ;;  %v771_v42 = vld [vmem:[%s11287_s7 + $0x548] sm:$0xf] }
  0xca   :  { %v773_v43 = vld [vmem:[%s11287_s7 + $0x558] sm:$0xf]  ;;  %770 = vst [vmem:[#allocation2 + $0x54c] sm:$0xf] %v769_v41  ;;  %772 = vst [vmem:[#allocation2 + $0x550] sm:$0xf] %v771_v42 }
  0xcb   :  { %774 = vst [vmem:[#allocation2 + $0x554] sm:$0xf] %v773_v43  ;;  %v775_v44 = vld [vmem:[%s11287_s7 + $0x54c] sm:$0xf]  ;;  %v781_v46 = vld [vmem:[%s11287_s7 + $0x570] sm:$0xf] }
  0xcc   :  { %776 = vst [vmem:[#allocation2 + $0x558] sm:$0xf] %v775_v44  ;;  %778 = vst [vmem:[#allocation2 + $0x55c] sm:$0xff] %v777_v45   ;;  %v783_v47 = vld [vmem:[%s11287_s7 + $0x564] sm:$0xf]  ;;  %v793_v52 = vld [vmem:[%s11287_s7 + $0x57c] sm:$0xff]  }
  0xcd   :  { %782 = vst [vmem:[#allocation2 + $0x564] sm:$0xf] %v781_v46  ;;  %v785_v48 = vld [vmem:[%s11287_s7 + $0x574] sm:$0xf]  ;;  %v787_v49 = vld [vmem:[%s11287_s7 + $0x568] sm:$0xf] }
  0xce   :  { %784 = vst [vmem:[#allocation2 + $0x568] sm:$0xf] %v783_v47  ;;  %786 = vst [vmem:[#allocation2 + $0x56c] sm:$0xf] %v785_v48  ;;  %v789_v50 = vld [vmem:[%s11287_s7 + $0x578] sm:$0xf] }
  0xcf   :  { %788 = vst [vmem:[#allocation2 + $0x570] sm:$0xf] %v787_v49  ;;  %v791_v51 = vld [vmem:[%s11287_s7 + $0x56c] sm:$0xf]  ;;  %790 = vst [vmem:[#allocation2 + $0x574] sm:$0xf] %v789_v50 }
  0xd0   :  { %792 = vst [vmem:[#allocation2 + $0x578] sm:$0xf] %v791_v51  ;;  %794 = vst [vmem:[#allocation2 + $0x57c] sm:$0xff] %v793_v52   ;;  %v797_v53 = vld [vmem:[%s11287_s7 + $0x590] sm:$0xf]  ;;  %v809_v59 = vld [vmem:[%s11287_s7 + $0x59c] sm:$0xff]  }
  0xd1   :  { %v799_v54 = vld [vmem:[%s11287_s7 + $0x584] sm:$0xf]  ;;  %v801_v55 = vld [vmem:[%s11287_s7 + $0x594] sm:$0xf]  ;;  %798 = vst [vmem:[#allocation2 + $0x584] sm:$0xf] %v797_v53 }
  0xd2   :  { %800 = vst [vmem:[#allocation2 + $0x588] sm:$0xf] %v799_v54  ;;  %802 = vst [vmem:[#allocation2 + $0x58c] sm:$0xf] %v801_v55  ;;  %v803_v56 = vld [vmem:[%s11287_s7 + $0x588] sm:$0xf] }
  0xd3   :  { %v805_v57 = vld [vmem:[%s11287_s7 + $0x598] sm:$0xf]  ;;  %v807_v58 = vld [vmem:[%s11287_s7 + $0x58c] sm:$0xf]  ;;  %804 = vst [vmem:[#allocation2 + $0x590] sm:$0xf] %v803_v56 }
  0xd4   :  { %806 = vst [vmem:[#allocation2 + $0x594] sm:$0xf] %v805_v57  ;;  %808 = vst [vmem:[#allocation2 + $0x598] sm:$0xf] %v807_v58  ;;  %v813_v60 = vld [vmem:[%s11287_s7 + $0x5b0] sm:$0xf] }
  0xd5   :  { %v815_v61 = vld [vmem:[%s11287_s7 + $0x5a4] sm:$0xf]  ;;  %810 = vst [vmem:[#allocation2 + $0x59c] sm:$0xff] %v809_v59   ;;  %814 = vst [vmem:[#allocation2 + $0x5a4] sm:$0xf] %v813_v60  ;;  %v825_v2 = vld [vmem:[%s11287_s7 + $0x5bc] sm:$0xff]  }
  0xd6   :  { %816 = vst [vmem:[#allocation2 + $0x5a8] sm:$0xf] %v815_v61  ;;  %v817_v62 = vld [vmem:[%s11287_s7 + $0x5b4] sm:$0xf]  ;;  %v819_v63 = vld [vmem:[%s11287_s7 + $0x5a8] sm:$0xf] }
  0xd7   :  { %v821_v0 = vld [vmem:[%s11287_s7 + $0x5b8] sm:$0xf]  ;;  %818 = vst [vmem:[#allocation2 + $0x5ac] sm:$0xf] %v817_v62  ;;  %820 = vst [vmem:[#allocation2 + $0x5b0] sm:$0xf] %v819_v63 }
  0xd8   :  { %822 = vst [vmem:[#allocation2 + $0x5b4] sm:$0xf] %v821_v0  ;;  %v823_v1 = vld [vmem:[%s11287_s7 + $0x5ac] sm:$0xf]  ;;  %v829_v3 = vld [vmem:[%s11287_s7 + $0x5d0] sm:$0xf] }
  0xd9   :  { %824 = vst [vmem:[#allocation2 + $0x5b8] sm:$0xf] %v823_v1  ;;  %826 = vst [vmem:[#allocation2 + $0x5bc] sm:$0xff] %v825_v2   ;;  %v831_v4 = vld [vmem:[%s11287_s7 + $0x5c4] sm:$0xf]  ;;  %v841_v9 = vld [vmem:[%s11287_s7 + $0x5dc] sm:$0xff]  }
  0xda   :  { %830 = vst [vmem:[#allocation2 + $0x5c4] sm:$0xf] %v829_v3  ;;  %v833_v5 = vld [vmem:[%s11287_s7 + $0x5d4] sm:$0xf]  ;;  %v835_v6 = vld [vmem:[%s11287_s7 + $0x5c8] sm:$0xf] }
  0xdb   :  { %832 = vst [vmem:[#allocation2 + $0x5c8] sm:$0xf] %v831_v4  ;;  %834 = vst [vmem:[#allocation2 + $0x5cc] sm:$0xf] %v833_v5  ;;  %v837_v7 = vld [vmem:[%s11287_s7 + $0x5d8] sm:$0xf] }
  0xdc   :  { %836 = vst [vmem:[#allocation2 + $0x5d0] sm:$0xf] %v835_v6  ;;  %v839_v8 = vld [vmem:[%s11287_s7 + $0x5cc] sm:$0xf]  ;;  %838 = vst [vmem:[#allocation2 + $0x5d4] sm:$0xf] %v837_v7 }
  0xdd   :  { %840 = vst [vmem:[#allocation2 + $0x5d8] sm:$0xf] %v839_v8  ;;  %842 = vst [vmem:[#allocation2 + $0x5dc] sm:$0xff] %v841_v9   ;;  %v845_v10 = vld [vmem:[%s11287_s7 + $0x5f0] sm:$0xf]  ;;  %v857_v16 = vld [vmem:[%s11287_s7 + $0x5fc] sm:$0xff]  }
  0xde   :  { %v847_v11 = vld [vmem:[%s11287_s7 + $0x5e4] sm:$0xf]  ;;  %v849_v12 = vld [vmem:[%s11287_s7 + $0x5f4] sm:$0xf]  ;;  %846 = vst [vmem:[#allocation2 + $0x5e4] sm:$0xf] %v845_v10 }
  0xdf   :  { %848 = vst [vmem:[#allocation2 + $0x5e8] sm:$0xf] %v847_v11  ;;  %850 = vst [vmem:[#allocation2 + $0x5ec] sm:$0xf] %v849_v12  ;;  %v851_v13 = vld [vmem:[%s11287_s7 + $0x5e8] sm:$0xf] }
  0xe0   :  { %v853_v14 = vld [vmem:[%s11287_s7 + $0x5f8] sm:$0xf]  ;;  %v855_v15 = vld [vmem:[%s11287_s7 + $0x5ec] sm:$0xf]  ;;  %852 = vst [vmem:[#allocation2 + $0x5f0] sm:$0xf] %v851_v13 }
  0xe1   :  { %854 = vst [vmem:[#allocation2 + $0x5f4] sm:$0xf] %v853_v14  ;;  %856 = vst [vmem:[#allocation2 + $0x5f8] sm:$0xf] %v855_v15  ;;  %v861_v17 = vld [vmem:[%s11287_s7 + $0x610] sm:$0xf] }
  0xe2   :  { %v863_v18 = vld [vmem:[%s11287_s7 + $0x604] sm:$0xf]  ;;  %858 = vst [vmem:[#allocation2 + $0x5fc] sm:$0xff] %v857_v16   ;;  %862 = vst [vmem:[#allocation2 + $0x604] sm:$0xf] %v861_v17  ;;  %v873_v23 = vld [vmem:[%s11287_s7 + $0x61c] sm:$0xff]  }
  0xe3   :  { %864 = vst [vmem:[#allocation2 + $0x608] sm:$0xf] %v863_v18  ;;  %v865_v19 = vld [vmem:[%s11287_s7 + $0x614] sm:$0xf]  ;;  %v867_v20 = vld [vmem:[%s11287_s7 + $0x608] sm:$0xf] }
  0xe4   :  { %v869_v21 = vld [vmem:[%s11287_s7 + $0x618] sm:$0xf]  ;;  %866 = vst [vmem:[#allocation2 + $0x60c] sm:$0xf] %v865_v19  ;;  %868 = vst [vmem:[#allocation2 + $0x610] sm:$0xf] %v867_v20 }
  0xe5   :  { %870 = vst [vmem:[#allocation2 + $0x614] sm:$0xf] %v869_v21  ;;  %v871_v22 = vld [vmem:[%s11287_s7 + $0x60c] sm:$0xf]  ;;  %v877_v24 = vld [vmem:[%s11287_s7 + $0x630] sm:$0xf] }
  0xe6   :  { %872 = vst [vmem:[#allocation2 + $0x618] sm:$0xf] %v871_v22  ;;  %874 = vst [vmem:[#allocation2 + $0x61c] sm:$0xff] %v873_v23   ;;  %v879_v25 = vld [vmem:[%s11287_s7 + $0x624] sm:$0xf]  ;;  %v889_v30 = vld [vmem:[%s11287_s7 + $0x63c] sm:$0xff]  }
  0xe7   :  { %878 = vst [vmem:[#allocation2 + $0x624] sm:$0xf] %v877_v24  ;;  %v881_v26 = vld [vmem:[%s11287_s7 + $0x634] sm:$0xf]  ;;  %v883_v27 = vld [vmem:[%s11287_s7 + $0x628] sm:$0xf] }
  0xe8   :  { %880 = vst [vmem:[#allocation2 + $0x628] sm:$0xf] %v879_v25  ;;  %882 = vst [vmem:[#allocation2 + $0x62c] sm:$0xf] %v881_v26  ;;  %v885_v28 = vld [vmem:[%s11287_s7 + $0x638] sm:$0xf] }
  0xe9   :  { %884 = vst [vmem:[#allocation2 + $0x630] sm:$0xf] %v883_v27  ;;  %v887_v29 = vld [vmem:[%s11287_s7 + $0x62c] sm:$0xf]  ;;  %886 = vst [vmem:[#allocation2 + $0x634] sm:$0xf] %v885_v28 }
  0xea   :  { %888 = vst [vmem:[#allocation2 + $0x638] sm:$0xf] %v887_v29  ;;  %890 = vst [vmem:[#allocation2 + $0x63c] sm:$0xff] %v889_v30   ;;  %v893_v31 = vld [vmem:[%s11287_s7 + $0x650] sm:$0xf]  ;;  %v905_v37 = vld [vmem:[%s11287_s7 + $0x65c] sm:$0xff]  }
  0xeb   :  { %v895_v32 = vld [vmem:[%s11287_s7 + $0x644] sm:$0xf]  ;;  %v897_v33 = vld [vmem:[%s11287_s7 + $0x654] sm:$0xf]  ;;  %894 = vst [vmem:[#allocation2 + $0x644] sm:$0xf] %v893_v31 }
  0xec   :  { %896 = vst [vmem:[#allocation2 + $0x648] sm:$0xf] %v895_v32  ;;  %898 = vst [vmem:[#allocation2 + $0x64c] sm:$0xf] %v897_v33  ;;  %v899_v34 = vld [vmem:[%s11287_s7 + $0x648] sm:$0xf] }
  0xed   :  { %v901_v35 = vld [vmem:[%s11287_s7 + $0x658] sm:$0xf]  ;;  %v903_v36 = vld [vmem:[%s11287_s7 + $0x64c] sm:$0xf]  ;;  %900 = vst [vmem:[#allocation2 + $0x650] sm:$0xf] %v899_v34 }
  0xee   :  { %902 = vst [vmem:[#allocation2 + $0x654] sm:$0xf] %v901_v35  ;;  %904 = vst [vmem:[#allocation2 + $0x658] sm:$0xf] %v903_v36  ;;  %v909_v38 = vld [vmem:[%s11287_s7 + $0x670] sm:$0xf] }
  0xef   :  { %v911_v39 = vld [vmem:[%s11287_s7 + $0x664] sm:$0xf]  ;;  %906 = vst [vmem:[#allocation2 + $0x65c] sm:$0xff] %v905_v37   ;;  %910 = vst [vmem:[#allocation2 + $0x664] sm:$0xf] %v909_v38  ;;  %v921_v44 = vld [vmem:[%s11287_s7 + $0x67c] sm:$0xff]  }
  0xf0   :  { %912 = vst [vmem:[#allocation2 + $0x668] sm:$0xf] %v911_v39  ;;  %v913_v40 = vld [vmem:[%s11287_s7 + $0x674] sm:$0xf]  ;;  %v915_v41 = vld [vmem:[%s11287_s7 + $0x668] sm:$0xf] }
  0xf1   :  { %v917_v42 = vld [vmem:[%s11287_s7 + $0x678] sm:$0xf]  ;;  %914 = vst [vmem:[#allocation2 + $0x66c] sm:$0xf] %v913_v40  ;;  %916 = vst [vmem:[#allocation2 + $0x670] sm:$0xf] %v915_v41 }
  0xf2   :  { %918 = vst [vmem:[#allocation2 + $0x674] sm:$0xf] %v917_v42  ;;  %v919_v43 = vld [vmem:[%s11287_s7 + $0x66c] sm:$0xf]  ;;  %v925_v45 = vld [vmem:[%s11287_s7 + $0x690] sm:$0xf] }
  0xf3   :  { %920 = vst [vmem:[#allocation2 + $0x678] sm:$0xf] %v919_v43  ;;  %922 = vst [vmem:[#allocation2 + $0x67c] sm:$0xff] %v921_v44   ;;  %v927_v46 = vld [vmem:[%s11287_s7 + $0x684] sm:$0xf]  ;;  %v937_v51 = vld [vmem:[%s11287_s7 + $0x69c] sm:$0xff]  }
  0xf4   :  { %926 = vst [vmem:[#allocation2 + $0x684] sm:$0xf] %v925_v45  ;;  %v929_v47 = vld [vmem:[%s11287_s7 + $0x694] sm:$0xf]  ;;  %v931_v48 = vld [vmem:[%s11287_s7 + $0x688] sm:$0xf] }
  0xf5   :  { %928 = vst [vmem:[#allocation2 + $0x688] sm:$0xf] %v927_v46  ;;  %930 = vst [vmem:[#allocation2 + $0x68c] sm:$0xf] %v929_v47  ;;  %v933_v49 = vld [vmem:[%s11287_s7 + $0x698] sm:$0xf] }
  0xf6   :  { %932 = vst [vmem:[#allocation2 + $0x690] sm:$0xf] %v931_v48  ;;  %v935_v50 = vld [vmem:[%s11287_s7 + $0x68c] sm:$0xf]  ;;  %934 = vst [vmem:[#allocation2 + $0x694] sm:$0xf] %v933_v49 }
  0xf7   :  { %936 = vst [vmem:[#allocation2 + $0x698] sm:$0xf] %v935_v50  ;;  %938 = vst [vmem:[#allocation2 + $0x69c] sm:$0xff] %v937_v51   ;;  %v941_v52 = vld [vmem:[%s11287_s7 + $0x6b0] sm:$0xf]  ;;  %v953_v58 = vld [vmem:[%s11287_s7 + $0x6bc] sm:$0xff]  }
  0xf8   :  { %v943_v53 = vld [vmem:[%s11287_s7 + $0x6a4] sm:$0xf]  ;;  %v945_v54 = vld [vmem:[%s11287_s7 + $0x6b4] sm:$0xf]  ;;  %942 = vst [vmem:[#allocation2 + $0x6a4] sm:$0xf] %v941_v52 }
  0xf9   :  { %944 = vst [vmem:[#allocation2 + $0x6a8] sm:$0xf] %v943_v53  ;;  %946 = vst [vmem:[#allocation2 + $0x6ac] sm:$0xf] %v945_v54  ;;  %v947_v55 = vld [vmem:[%s11287_s7 + $0x6a8] sm:$0xf] }
  0xfa   :  { %v949_v56 = vld [vmem:[%s11287_s7 + $0x6b8] sm:$0xf]  ;;  %v951_v57 = vld [vmem:[%s11287_s7 + $0x6ac] sm:$0xf]  ;;  %948 = vst [vmem:[#allocation2 + $0x6b0] sm:$0xf] %v947_v55 }
  0xfb   :  { %950 = vst [vmem:[#allocation2 + $0x6b4] sm:$0xf] %v949_v56  ;;  %952 = vst [vmem:[#allocation2 + $0x6b8] sm:$0xf] %v951_v57  ;;  %v957_v59 = vld [vmem:[%s11287_s7 + $0x6d0] sm:$0xf] }
  0xfc   :  { %v959_v60 = vld [vmem:[%s11287_s7 + $0x6c4] sm:$0xf]  ;;  %954 = vst [vmem:[#allocation2 + $0x6bc] sm:$0xff] %v953_v58   ;;  %958 = vst [vmem:[#allocation2 + $0x6c4] sm:$0xf] %v957_v59  ;;  %v969_v1 = vld [vmem:[%s11287_s7 + $0x6dc] sm:$0xff]  }
  0xfd   :  { %960 = vst [vmem:[#allocation2 + $0x6c8] sm:$0xf] %v959_v60  ;;  %v961_v61 = vld [vmem:[%s11287_s7 + $0x6d4] sm:$0xf]  ;;  %v963_v62 = vld [vmem:[%s11287_s7 + $0x6c8] sm:$0xf] }
  0xfe   :  { %v965_v63 = vld [vmem:[%s11287_s7 + $0x6d8] sm:$0xf]  ;;  %962 = vst [vmem:[#allocation2 + $0x6cc] sm:$0xf] %v961_v61  ;;  %964 = vst [vmem:[#allocation2 + $0x6d0] sm:$0xf] %v963_v62 }
  0xff   :  { %966 = vst [vmem:[#allocation2 + $0x6d4] sm:$0xf] %v965_v63  ;;  %v967_v0 = vld [vmem:[%s11287_s7 + $0x6cc] sm:$0xf]  ;;  %v973_v2 = vld [vmem:[%s11287_s7 + $0x6f0] sm:$0xf] }
 0x100   :  { %968 = vst [vmem:[#allocation2 + $0x6d8] sm:$0xf] %v967_v0  ;;  %970 = vst [vmem:[#allocation2 + $0x6dc] sm:$0xff] %v969_v1   ;;  %v975_v3 = vld [vmem:[%s11287_s7 + $0x6e4] sm:$0xf]  ;;  %v985_v8 = vld [vmem:[%s11287_s7 + $0x6fc] sm:$0xff]  }
 0x101   :  { %974 = vst [vmem:[#allocation2 + $0x6e4] sm:$0xf] %v973_v2  ;;  %v977_v4 = vld [vmem:[%s11287_s7 + $0x6f4] sm:$0xf]  ;;  %v979_v5 = vld [vmem:[%s11287_s7 + $0x6e8] sm:$0xf] }
 0x102   :  { %976 = vst [vmem:[#allocation2 + $0x6e8] sm:$0xf] %v975_v3  ;;  %978 = vst [vmem:[#allocation2 + $0x6ec] sm:$0xf] %v977_v4  ;;  %v981_v6 = vld [vmem:[%s11287_s7 + $0x6f8] sm:$0xf] }
 0x103   :  { %980 = vst [vmem:[#allocation2 + $0x6f0] sm:$0xf] %v979_v5  ;;  %v983_v7 = vld [vmem:[%s11287_s7 + $0x6ec] sm:$0xf]  ;;  %982 = vst [vmem:[#allocation2 + $0x6f4] sm:$0xf] %v981_v6 }
 0x104   :  { %984 = vst [vmem:[#allocation2 + $0x6f8] sm:$0xf] %v983_v7  ;;  %986 = vst [vmem:[#allocation2 + $0x6fc] sm:$0xff] %v985_v8   ;;  %v989_v9 = vld [vmem:[%s11287_s7 + $0x710] sm:$0xf]  ;;  %v1001_v15 = vld [vmem:[%s11287_s7 + $0x71c] sm:$0xff]  }
 0x105   :  { %v991_v10 = vld [vmem:[%s11287_s7 + $0x704] sm:$0xf]  ;;  %v993_v11 = vld [vmem:[%s11287_s7 + $0x714] sm:$0xf]  ;;  %990 = vst [vmem:[#allocation2 + $0x704] sm:$0xf] %v989_v9 }
 0x106   :  { %992 = vst [vmem:[#allocation2 + $0x708] sm:$0xf] %v991_v10  ;;  %994 = vst [vmem:[#allocation2 + $0x70c] sm:$0xf] %v993_v11  ;;  %v995_v12 = vld [vmem:[%s11287_s7 + $0x708] sm:$0xf] }
 0x107   :  { %v997_v13 = vld [vmem:[%s11287_s7 + $0x718] sm:$0xf]  ;;  %v999_v14 = vld [vmem:[%s11287_s7 + $0x70c] sm:$0xf]  ;;  %996 = vst [vmem:[#allocation2 + $0x710] sm:$0xf] %v995_v12 }
 0x108   :  { %998 = vst [vmem:[#allocation2 + $0x714] sm:$0xf] %v997_v13  ;;  %1000 = vst [vmem:[#allocation2 + $0x718] sm:$0xf] %v999_v14  ;;  %v1005_v16 = vld [vmem:[%s11287_s7 + $0x730] sm:$0xf] }
 0x109   :  { %v1007_v17 = vld [vmem:[%s11287_s7 + $0x724] sm:$0xf]  ;;  %1002 = vst [vmem:[#allocation2 + $0x71c] sm:$0xff] %v1001_v15   ;;  %1006 = vst [vmem:[#allocation2 + $0x724] sm:$0xf] %v1005_v16  ;;  %v1017_v22 = vld [vmem:[%s11287_s7 + $0x73c] sm:$0xff]  }
 0x10a   :  { %1008 = vst [vmem:[#allocation2 + $0x728] sm:$0xf] %v1007_v17  ;;  %v1009_v18 = vld [vmem:[%s11287_s7 + $0x734] sm:$0xf]  ;;  %v1011_v19 = vld [vmem:[%s11287_s7 + $0x728] sm:$0xf] }
 0x10b   :  { %v1013_v20 = vld [vmem:[%s11287_s7 + $0x738] sm:$0xf]  ;;  %1010 = vst [vmem:[#allocation2 + $0x72c] sm:$0xf] %v1009_v18  ;;  %1012 = vst [vmem:[#allocation2 + $0x730] sm:$0xf] %v1011_v19 }
 0x10c   :  { %1014 = vst [vmem:[#allocation2 + $0x734] sm:$0xf] %v1013_v20  ;;  %v1015_v21 = vld [vmem:[%s11287_s7 + $0x72c] sm:$0xf]  ;;  %v1021_v23 = vld [vmem:[%s11287_s7 + $0x750] sm:$0xf] }
 0x10d   :  { %1016 = vst [vmem:[#allocation2 + $0x738] sm:$0xf] %v1015_v21  ;;  %1018 = vst [vmem:[#allocation2 + $0x73c] sm:$0xff] %v1017_v22   ;;  %v1023_v24 = vld [vmem:[%s11287_s7 + $0x744] sm:$0xf]  ;;  %v1033_v29 = vld [vmem:[%s11287_s7 + $0x75c] sm:$0xff]  }
 0x10e   :  { %1022 = vst [vmem:[#allocation2 + $0x744] sm:$0xf] %v1021_v23  ;;  %v1025_v25 = vld [vmem:[%s11287_s7 + $0x754] sm:$0xf]  ;;  %v1027_v26 = vld [vmem:[%s11287_s7 + $0x748] sm:$0xf] }
 0x10f   :  { %1024 = vst [vmem:[#allocation2 + $0x748] sm:$0xf] %v1023_v24  ;;  %1026 = vst [vmem:[#allocation2 + $0x74c] sm:$0xf] %v1025_v25  ;;  %v1029_v27 = vld [vmem:[%s11287_s7 + $0x758] sm:$0xf] }
 0x110   :  { %1028 = vst [vmem:[#allocation2 + $0x750] sm:$0xf] %v1027_v26  ;;  %v1031_v28 = vld [vmem:[%s11287_s7 + $0x74c] sm:$0xf]  ;;  %1030 = vst [vmem:[#allocation2 + $0x754] sm:$0xf] %v1029_v27 }
 0x111   :  { %1032 = vst [vmem:[#allocation2 + $0x758] sm:$0xf] %v1031_v28  ;;  %1034 = vst [vmem:[#allocation2 + $0x75c] sm:$0xff] %v1033_v29   ;;  %v1037_v30 = vld [vmem:[%s11287_s7 + $0x770] sm:$0xf]  ;;  %v1049_v36 = vld [vmem:[%s11287_s7 + $0x77c] sm:$0xff]  }
 0x112   :  { %v1039_v31 = vld [vmem:[%s11287_s7 + $0x764] sm:$0xf]  ;;  %v1041_v32 = vld [vmem:[%s11287_s7 + $0x774] sm:$0xf]  ;;  %1038 = vst [vmem:[#allocation2 + $0x764] sm:$0xf] %v1037_v30 }
 0x113   :  { %1040 = vst [vmem:[#allocation2 + $0x768] sm:$0xf] %v1039_v31  ;;  %1042 = vst [vmem:[#allocation2 + $0x76c] sm:$0xf] %v1041_v32  ;;  %v1043_v33 = vld [vmem:[%s11287_s7 + $0x768] sm:$0xf] }
 0x114   :  { %v1045_v34 = vld [vmem:[%s11287_s7 + $0x778] sm:$0xf]  ;;  %v1047_v35 = vld [vmem:[%s11287_s7 + $0x76c] sm:$0xf]  ;;  %1044 = vst [vmem:[#allocation2 + $0x770] sm:$0xf] %v1043_v33 }
 0x115   :  { %1046 = vst [vmem:[#allocation2 + $0x774] sm:$0xf] %v1045_v34  ;;  %1048 = vst [vmem:[#allocation2 + $0x778] sm:$0xf] %v1047_v35  ;;  %v1053_v37 = vld [vmem:[%s11287_s7 + $0x790] sm:$0xf] }
 0x116   :  { %v1055_v38 = vld [vmem:[%s11287_s7 + $0x784] sm:$0xf]  ;;  %1050 = vst [vmem:[#allocation2 + $0x77c] sm:$0xff] %v1049_v36   ;;  %1054 = vst [vmem:[#allocation2 + $0x784] sm:$0xf] %v1053_v37  ;;  %v1065_v43 = vld [vmem:[%s11287_s7 + $0x79c] sm:$0xff]  }
 0x117   :  { %1056 = vst [vmem:[#allocation2 + $0x788] sm:$0xf] %v1055_v38  ;;  %v1057_v39 = vld [vmem:[%s11287_s7 + $0x794] sm:$0xf]  ;;  %v1059_v40 = vld [vmem:[%s11287_s7 + $0x788] sm:$0xf] }
 0x118   :  { %v1061_v41 = vld [vmem:[%s11287_s7 + $0x798] sm:$0xf]  ;;  %1058 = vst [vmem:[#allocation2 + $0x78c] sm:$0xf] %v1057_v39  ;;  %1060 = vst [vmem:[#allocation2 + $0x790] sm:$0xf] %v1059_v40 }
 0x119   :  { %1062 = vst [vmem:[#allocation2 + $0x794] sm:$0xf] %v1061_v41  ;;  %v1063_v42 = vld [vmem:[%s11287_s7 + $0x78c] sm:$0xf]  ;;  %v1069_v44 = vld [vmem:[%s11287_s7 + $0x7b0] sm:$0xf] }
 0x11a   :  { %1064 = vst [vmem:[#allocation2 + $0x798] sm:$0xf] %v1063_v42  ;;  %1066 = vst [vmem:[#allocation2 + $0x79c] sm:$0xff] %v1065_v43   ;;  %v1071_v45 = vld [vmem:[%s11287_s7 + $0x7a4] sm:$0xf]  ;;  %v1081_v50 = vld [vmem:[%s11287_s7 + $0x7bc] sm:$0xff]  }
 0x11b   :  { %1070 = vst [vmem:[#allocation2 + $0x7a4] sm:$0xf] %v1069_v44  ;;  %v1073_v46 = vld [vmem:[%s11287_s7 + $0x7b4] sm:$0xf]  ;;  %v1075_v47 = vld [vmem:[%s11287_s7 + $0x7a8] sm:$0xf] }
 0x11c   :  { %1072 = vst [vmem:[#allocation2 + $0x7a8] sm:$0xf] %v1071_v45  ;;  %1074 = vst [vmem:[#allocation2 + $0x7ac] sm:$0xf] %v1073_v46  ;;  %v1077_v48 = vld [vmem:[%s11287_s7 + $0x7b8] sm:$0xf] }
 0x11d   :  { %1076 = vst [vmem:[#allocation2 + $0x7b0] sm:$0xf] %v1075_v47  ;;  %v1079_v49 = vld [vmem:[%s11287_s7 + $0x7ac] sm:$0xf]  ;;  %1078 = vst [vmem:[#allocation2 + $0x7b4] sm:$0xf] %v1077_v48 }
 0x11e   :  { %1080 = vst [vmem:[#allocation2 + $0x7b8] sm:$0xf] %v1079_v49  ;;  %1082 = vst [vmem:[#allocation2 + $0x7bc] sm:$0xff] %v1081_v50   ;;  %v1085_v51 = vld [vmem:[%s11287_s7 + $0x7d0] sm:$0xf]  ;;  %v1097_v57 = vld [vmem:[%s11287_s7 + $0x7dc] sm:$0xff]  }
 0x11f   :  { %v1087_v52 = vld [vmem:[%s11287_s7 + $0x7c4] sm:$0xf]  ;;  %v1089_v53 = vld [vmem:[%s11287_s7 + $0x7d4] sm:$0xf]  ;;  %1086 = vst [vmem:[#allocation2 + $0x7c4] sm:$0xf] %v1085_v51 }
 0x120   :  { %1088 = vst [vmem:[#allocation2 + $0x7c8] sm:$0xf] %v1087_v52  ;;  %1090 = vst [vmem:[#allocation2 + $0x7cc] sm:$0xf] %v1089_v53  ;;  %v1091_v54 = vld [vmem:[%s11287_s7 + $0x7c8] sm:$0xf] }
 0x121   :  { %v1093_v55 = vld [vmem:[%s11287_s7 + $0x7d8] sm:$0xf]  ;;  %v1095_v56 = vld [vmem:[%s11287_s7 + $0x7cc] sm:$0xf]  ;;  %1092 = vst [vmem:[#allocation2 + $0x7d0] sm:$0xf] %v1091_v54 }
 0x122   :  { %1094 = vst [vmem:[#allocation2 + $0x7d4] sm:$0xf] %v1093_v55  ;;  %1096 = vst [vmem:[#allocation2 + $0x7d8] sm:$0xf] %v1095_v56  ;;  %v1101_v58 = vld [vmem:[%s11287_s7 + $0x7f0] sm:$0xf] }
 0x123   :  { %v1103_v59 = vld [vmem:[%s11287_s7 + $0x7e4] sm:$0xf]  ;;  %1098 = vst [vmem:[#allocation2 + $0x7dc] sm:$0xff] %v1097_v57   ;;  %1102 = vst [vmem:[#allocation2 + $0x7e4] sm:$0xf] %v1101_v58 }
 0x124   :  { %1104 = vst [vmem:[#allocation2 + $0x7e8] sm:$0xf] %v1103_v59  ;;  %v1105_v60 = vld [vmem:[%s11287_s7 + $0x7f4] sm:$0xf]  ;;  %v1107_v61 = vld [vmem:[%s11287_s7 + $0x7e8] sm:$0xf] }
 0x125   :  { %v1109_v62 = vld [vmem:[%s11287_s7 + $0x7f8] sm:$0xf]  ;;  %1106 = vst [vmem:[#allocation2 + $0x7ec] sm:$0xf] %v1105_v60  ;;  %1108 = vst [vmem:[#allocation2 + $0x7f0] sm:$0xf] %v1107_v61 }
 0x126   :  { %1110 = vst [vmem:[#allocation2 + $0x7f4] sm:$0xf] %v1109_v62  ;;  %v1111_v63 = vld [vmem:[%s11287_s7 + $0x7ec] sm:$0xf]  ;;  %v1113_v0 = vld [vmem:[%s11287_s7 + $0x7fc] sm:$0xf] }
 0x127   :  { %1112 = vst [vmem:[#allocation2 + $0x7f8] sm:$0xf] %v1111_v63  ;;  %1114 = vst [vmem:[#allocation2 + $0x7fc] sm:$0xf] %v1113_v0 }
 0x128   :  { %4250 = vsyncadd [#allocation4], 32768  ;;  %v4269_v1 = vld [vmem:[%s11257_s13] sm:$0xf]  ;;  %v4271_v2 = vld [vmem:[%s11257_s13 + $0x8] sm:$0xf] }
 0x129   :  { %4270 = vst [vmem:[#allocation3] sm:$0xf] %v4269_v1  ;;  %4272 = vst [vmem:[#allocation3 + $0x4] sm:$0xf] %v4271_v2  ;;  %v4273_v3 = vld [vmem:[%s11257_s13 + $0x4] sm:$0xf] }
 0x12a   :  { %v4275_v4 = vld [vmem:[%s11257_s13 + $0xc] sm:$0xff]   ;;  %v4279_v5 = vld [vmem:[%s11257_s13 + $0x18] sm:$0xf]  ;;  %4274 = vst [vmem:[#allocation3 + $0x8] sm:$0xf] %v4273_v3  ;;  %v4283_v7 = vld [vmem:[%s11257_s13 + $0x1c] sm:$0xff]  }
 0x12b   :  { %4276 = vst [vmem:[#allocation3 + $0xc] sm:$0xff] %v4275_v4   ;;  %4280 = vst [vmem:[#allocation3 + $0x14] sm:$0xf] %v4279_v5  ;;  %v4281_v6 = vld [vmem:[%s11257_s13 + $0x14] sm:$0xf]  ;;  %v4291_v10 = vld [vmem:[%s11257_s13 + $0x2c] sm:$0xff]  }
 0x12c   :  { %v4287_v8 = vld [vmem:[%s11257_s13 + $0x28] sm:$0xf]  ;;  %4282 = vst [vmem:[#allocation3 + $0x18] sm:$0xf] %v4281_v6  ;;  %4284 = vst [vmem:[#allocation3 + $0x1c] sm:$0xff] %v4283_v7   ;;  %v4299_v13 = vld [vmem:[%s11257_s13 + $0x3c] sm:$0xff]  }
 0x12d   :  { %4288 = vst [vmem:[#allocation3 + $0x24] sm:$0xf] %v4287_v8  ;;  %v4289_v9 = vld [vmem:[%s11257_s13 + $0x24] sm:$0xf]  ;;  %v4295_v11 = vld [vmem:[%s11257_s13 + $0x38] sm:$0xf] }
 0x12e   :  { %4290 = vst [vmem:[#allocation3 + $0x28] sm:$0xf] %v4289_v9  ;;  %4292 = vst [vmem:[#allocation3 + $0x2c] sm:$0xff] %v4291_v10   ;;  %v4297_v12 = vld [vmem:[%s11257_s13 + $0x34] sm:$0xf]  ;;  %v4307_v16 = vld [vmem:[%s11257_s13 + $0x4c] sm:$0xff]  }
 0x12f   :  { %4296 = vst [vmem:[#allocation3 + $0x34] sm:$0xf] %v4295_v11  ;;  %v4303_v14 = vld [vmem:[%s11257_s13 + $0x48] sm:$0xf]  ;;  %4298 = vst [vmem:[#allocation3 + $0x38] sm:$0xf] %v4297_v12 }
 0x130   :  { %4300 = vst [vmem:[#allocation3 + $0x3c] sm:$0xff] %v4299_v13   ;;  %4304 = vst [vmem:[#allocation3 + $0x44] sm:$0xf] %v4303_v14  ;;  %v4305_v15 = vld [vmem:[%s11257_s13 + $0x44] sm:$0xf]  ;;  %v4315_v19 = vld [vmem:[%s11257_s13 + $0x5c] sm:$0xff]  }
 0x131   :  { %v4311_v17 = vld [vmem:[%s11257_s13 + $0x58] sm:$0xf]  ;;  %4306 = vst [vmem:[#allocation3 + $0x48] sm:$0xf] %v4305_v15  ;;  %4308 = vst [vmem:[#allocation3 + $0x4c] sm:$0xff] %v4307_v16   ;;  %v4323_v22 = vld [vmem:[%s11257_s13 + $0x6c] sm:$0xff]  }
 0x132   :  { %4312 = vst [vmem:[#allocation3 + $0x54] sm:$0xf] %v4311_v17  ;;  %v4313_v18 = vld [vmem:[%s11257_s13 + $0x54] sm:$0xf]  ;;  %v4319_v20 = vld [vmem:[%s11257_s13 + $0x68] sm:$0xf] }
 0x133   :  { %4314 = vst [vmem:[#allocation3 + $0x58] sm:$0xf] %v4313_v18  ;;  %4316 = vst [vmem:[#allocation3 + $0x5c] sm:$0xff] %v4315_v19   ;;  %v4321_v21 = vld [vmem:[%s11257_s13 + $0x64] sm:$0xf]  ;;  %v4331_v25 = vld [vmem:[%s11257_s13 + $0x7c] sm:$0xff]  }
 0x134   :  { %4320 = vst [vmem:[#allocation3 + $0x64] sm:$0xf] %v4319_v20  ;;  %v4327_v23 = vld [vmem:[%s11257_s13 + $0x78] sm:$0xf]  ;;  %4322 = vst [vmem:[#allocation3 + $0x68] sm:$0xf] %v4321_v21 }
 0x135   :  { %4324 = vst [vmem:[#allocation3 + $0x6c] sm:$0xff] %v4323_v22   ;;  %4328 = vst [vmem:[#allocation3 + $0x74] sm:$0xf] %v4327_v23  ;;  %v4329_v24 = vld [vmem:[%s11257_s13 + $0x74] sm:$0xf]  ;;  %v4339_v28 = vld [vmem:[%s11257_s13 + $0x8c] sm:$0xff]  }
 0x136   :  { %v4335_v26 = vld [vmem:[%s11257_s13 + $0x88] sm:$0xf]  ;;  %4330 = vst [vmem:[#allocation3 + $0x78] sm:$0xf] %v4329_v24  ;;  %4332 = vst [vmem:[#allocation3 + $0x7c] sm:$0xff] %v4331_v25   ;;  %v4347_v31 = vld [vmem:[%s11257_s13 + $0x9c] sm:$0xff]  }
 0x137   :  { %4336 = vst [vmem:[#allocation3 + $0x84] sm:$0xf] %v4335_v26  ;;  %v4337_v27 = vld [vmem:[%s11257_s13 + $0x84] sm:$0xf]  ;;  %v4343_v29 = vld [vmem:[%s11257_s13 + $0x98] sm:$0xf] }
 0x138   :  { %4338 = vst [vmem:[#allocation3 + $0x88] sm:$0xf] %v4337_v27  ;;  %4340 = vst [vmem:[#allocation3 + $0x8c] sm:$0xff] %v4339_v28   ;;  %v4345_v30 = vld [vmem:[%s11257_s13 + $0x94] sm:$0xf]  ;;  %v4355_v34 = vld [vmem:[%s11257_s13 + $0xac] sm:$0xff]  }
 0x139   :  { %4344 = vst [vmem:[#allocation3 + $0x94] sm:$0xf] %v4343_v29  ;;  %v4351_v32 = vld [vmem:[%s11257_s13 + $0xa8] sm:$0xf]  ;;  %4346 = vst [vmem:[#allocation3 + $0x98] sm:$0xf] %v4345_v30 }
 0x13a   :  { %4348 = vst [vmem:[#allocation3 + $0x9c] sm:$0xff] %v4347_v31   ;;  %4352 = vst [vmem:[#allocation3 + $0xa4] sm:$0xf] %v4351_v32  ;;  %v4353_v33 = vld [vmem:[%s11257_s13 + $0xa4] sm:$0xf]  ;;  %v4363_v37 = vld [vmem:[%s11257_s13 + $0xbc] sm:$0xff]  }
 0x13b   :  { %v4359_v35 = vld [vmem:[%s11257_s13 + $0xb8] sm:$0xf]  ;;  %4354 = vst [vmem:[#allocation3 + $0xa8] sm:$0xf] %v4353_v33  ;;  %4356 = vst [vmem:[#allocation3 + $0xac] sm:$0xff] %v4355_v34   ;;  %v4371_v40 = vld [vmem:[%s11257_s13 + $0xcc] sm:$0xff]  }
 0x13c   :  { %4360 = vst [vmem:[#allocation3 + $0xb4] sm:$0xf] %v4359_v35  ;;  %v4361_v36 = vld [vmem:[%s11257_s13 + $0xb4] sm:$0xf]  ;;  %v4367_v38 = vld [vmem:[%s11257_s13 + $0xc8] sm:$0xf] }
 0x13d   :  { %4362 = vst [vmem:[#allocation3 + $0xb8] sm:$0xf] %v4361_v36  ;;  %4364 = vst [vmem:[#allocation3 + $0xbc] sm:$0xff] %v4363_v37   ;;  %v4369_v39 = vld [vmem:[%s11257_s13 + $0xc4] sm:$0xf]  ;;  %v4379_v43 = vld [vmem:[%s11257_s13 + $0xdc] sm:$0xff]  }
 0x13e   :  { %4368 = vst [vmem:[#allocation3 + $0xc4] sm:$0xf] %v4367_v38  ;;  %v4375_v41 = vld [vmem:[%s11257_s13 + $0xd8] sm:$0xf]  ;;  %4370 = vst [vmem:[#allocation3 + $0xc8] sm:$0xf] %v4369_v39 }
 0x13f   :  { %4372 = vst [vmem:[#allocation3 + $0xcc] sm:$0xff] %v4371_v40   ;;  %4376 = vst [vmem:[#allocation3 + $0xd4] sm:$0xf] %v4375_v41  ;;  %v4377_v42 = vld [vmem:[%s11257_s13 + $0xd4] sm:$0xf]  ;;  %v4387_v46 = vld [vmem:[%s11257_s13 + $0xec] sm:$0xff]  }
 0x140   :  { %v4383_v44 = vld [vmem:[%s11257_s13 + $0xe8] sm:$0xf]  ;;  %4378 = vst [vmem:[#allocation3 + $0xd8] sm:$0xf] %v4377_v42  ;;  %4380 = vst [vmem:[#allocation3 + $0xdc] sm:$0xff] %v4379_v43   ;;  %v4395_v49 = vld [vmem:[%s11257_s13 + $0xfc] sm:$0xff]  }
 0x141   :  { %4384 = vst [vmem:[#allocation3 + $0xe4] sm:$0xf] %v4383_v44  ;;  %v4385_v45 = vld [vmem:[%s11257_s13 + $0xe4] sm:$0xf]  ;;  %v4391_v47 = vld [vmem:[%s11257_s13 + $0xf8] sm:$0xf] }
 0x142   :  { %4386 = vst [vmem:[#allocation3 + $0xe8] sm:$0xf] %v4385_v45  ;;  %4388 = vst [vmem:[#allocation3 + $0xec] sm:$0xff] %v4387_v46   ;;  %v4393_v48 = vld [vmem:[%s11257_s13 + $0xf4] sm:$0xf]  ;;  %v4403_v52 = vld [vmem:[%s11257_s13 + $0x10c] sm:$0xff]  }
 0x143   :  { %4392 = vst [vmem:[#allocation3 + $0xf4] sm:$0xf] %v4391_v47  ;;  %v4399_v50 = vld [vmem:[%s11257_s13 + $0x108] sm:$0xf]  ;;  %4394 = vst [vmem:[#allocation3 + $0xf8] sm:$0xf] %v4393_v48 }
 0x144   :  { %4396 = vst [vmem:[#allocation3 + $0xfc] sm:$0xff] %v4395_v49   ;;  %4400 = vst [vmem:[#allocation3 + $0x104] sm:$0xf] %v4399_v50  ;;  %v4401_v51 = vld [vmem:[%s11257_s13 + $0x104] sm:$0xf]  ;;  %v4411_v55 = vld [vmem:[%s11257_s13 + $0x11c] sm:$0xff]  }
 0x145   :  { %v4407_v53 = vld [vmem:[%s11257_s13 + $0x118] sm:$0xf]  ;;  %4402 = vst [vmem:[#allocation3 + $0x108] sm:$0xf] %v4401_v51  ;;  %4404 = vst [vmem:[#allocation3 + $0x10c] sm:$0xff] %v4403_v52   ;;  %v4419_v58 = vld [vmem:[%s11257_s13 + $0x12c] sm:$0xff]  }
 0x146   :  { %4408 = vst [vmem:[#allocation3 + $0x114] sm:$0xf] %v4407_v53  ;;  %v4409_v54 = vld [vmem:[%s11257_s13 + $0x114] sm:$0xf]  ;;  %v4415_v56 = vld [vmem:[%s11257_s13 + $0x128] sm:$0xf] }
 0x147   :  { %4410 = vst [vmem:[#allocation3 + $0x118] sm:$0xf] %v4409_v54  ;;  %4412 = vst [vmem:[#allocation3 + $0x11c] sm:$0xff] %v4411_v55   ;;  %v4417_v57 = vld [vmem:[%s11257_s13 + $0x124] sm:$0xf]  ;;  %v4427_v61 = vld [vmem:[%s11257_s13 + $0x13c] sm:$0xff]  }
 0x148   :  { %4416 = vst [vmem:[#allocation3 + $0x124] sm:$0xf] %v4415_v56  ;;  %v4423_v59 = vld [vmem:[%s11257_s13 + $0x138] sm:$0xf]  ;;  %4418 = vst [vmem:[#allocation3 + $0x128] sm:$0xf] %v4417_v57 }
 0x149   :  { %4420 = vst [vmem:[#allocation3 + $0x12c] sm:$0xff] %v4419_v58   ;;  %4424 = vst [vmem:[#allocation3 + $0x134] sm:$0xf] %v4423_v59  ;;  %v4425_v60 = vld [vmem:[%s11257_s13 + $0x134] sm:$0xf]  ;;  %v4435_v0 = vld [vmem:[%s11257_s13 + $0x14c] sm:$0xff]  }
 0x14a   :  { %v4431_v62 = vld [vmem:[%s11257_s13 + $0x148] sm:$0xf]  ;;  %4426 = vst [vmem:[#allocation3 + $0x138] sm:$0xf] %v4425_v60  ;;  %4428 = vst [vmem:[#allocation3 + $0x13c] sm:$0xff] %v4427_v61   ;;  %v4443_v3 = vld [vmem:[%s11257_s13 + $0x15c] sm:$0xff]  }
 0x14b   :  { %4432 = vst [vmem:[#allocation3 + $0x144] sm:$0xf] %v4431_v62  ;;  %v4433_v63 = vld [vmem:[%s11257_s13 + $0x144] sm:$0xf]  ;;  %v4439_v1 = vld [vmem:[%s11257_s13 + $0x158] sm:$0xf] }
 0x14c   :  { %4434 = vst [vmem:[#allocation3 + $0x148] sm:$0xf] %v4433_v63  ;;  %4436 = vst [vmem:[#allocation3 + $0x14c] sm:$0xff] %v4435_v0   ;;  %v4441_v2 = vld [vmem:[%s11257_s13 + $0x154] sm:$0xf]  ;;  %v4451_v6 = vld [vmem:[%s11257_s13 + $0x16c] sm:$0xff]  }
 0x14d   :  { %4440 = vst [vmem:[#allocation3 + $0x154] sm:$0xf] %v4439_v1  ;;  %v4447_v4 = vld [vmem:[%s11257_s13 + $0x168] sm:$0xf]  ;;  %4442 = vst [vmem:[#allocation3 + $0x158] sm:$0xf] %v4441_v2 }
 0x14e   :  { %4444 = vst [vmem:[#allocation3 + $0x15c] sm:$0xff] %v4443_v3   ;;  %4448 = vst [vmem:[#allocation3 + $0x164] sm:$0xf] %v4447_v4  ;;  %v4449_v5 = vld [vmem:[%s11257_s13 + $0x164] sm:$0xf]  ;;  %v4459_v9 = vld [vmem:[%s11257_s13 + $0x17c] sm:$0xff]  }
 0x14f   :  { %v4455_v7 = vld [vmem:[%s11257_s13 + $0x178] sm:$0xf]  ;;  %4450 = vst [vmem:[#allocation3 + $0x168] sm:$0xf] %v4449_v5  ;;  %4452 = vst [vmem:[#allocation3 + $0x16c] sm:$0xff] %v4451_v6   ;;  %v4467_v12 = vld [vmem:[%s11257_s13 + $0x18c] sm:$0xff]  }
 0x150   :  { %4456 = vst [vmem:[#allocation3 + $0x174] sm:$0xf] %v4455_v7  ;;  %v4457_v8 = vld [vmem:[%s11257_s13 + $0x174] sm:$0xf]  ;;  %v4463_v10 = vld [vmem:[%s11257_s13 + $0x188] sm:$0xf] }
 0x151   :  { %4458 = vst [vmem:[#allocation3 + $0x178] sm:$0xf] %v4457_v8  ;;  %4460 = vst [vmem:[#allocation3 + $0x17c] sm:$0xff] %v4459_v9   ;;  %v4465_v11 = vld [vmem:[%s11257_s13 + $0x184] sm:$0xf]  ;;  %v4475_v15 = vld [vmem:[%s11257_s13 + $0x19c] sm:$0xff]  }
 0x152   :  { %4464 = vst [vmem:[#allocation3 + $0x184] sm:$0xf] %v4463_v10  ;;  %v4471_v13 = vld [vmem:[%s11257_s13 + $0x198] sm:$0xf]  ;;  %4466 = vst [vmem:[#allocation3 + $0x188] sm:$0xf] %v4465_v11 }
 0x153   :  { %4468 = vst [vmem:[#allocation3 + $0x18c] sm:$0xff] %v4467_v12   ;;  %4472 = vst [vmem:[#allocation3 + $0x194] sm:$0xf] %v4471_v13  ;;  %v4473_v14 = vld [vmem:[%s11257_s13 + $0x194] sm:$0xf]  ;;  %v4483_v18 = vld [vmem:[%s11257_s13 + $0x1ac] sm:$0xff]  }
 0x154   :  { %v4479_v16 = vld [vmem:[%s11257_s13 + $0x1a8] sm:$0xf]  ;;  %4474 = vst [vmem:[#allocation3 + $0x198] sm:$0xf] %v4473_v14  ;;  %4476 = vst [vmem:[#allocation3 + $0x19c] sm:$0xff] %v4475_v15   ;;  %v4491_v21 = vld [vmem:[%s11257_s13 + $0x1bc] sm:$0xff]  }
 0x155   :  { %4480 = vst [vmem:[#allocation3 + $0x1a4] sm:$0xf] %v4479_v16  ;;  %v4481_v17 = vld [vmem:[%s11257_s13 + $0x1a4] sm:$0xf]  ;;  %v4487_v19 = vld [vmem:[%s11257_s13 + $0x1b8] sm:$0xf] }
 0x156   :  { %4482 = vst [vmem:[#allocation3 + $0x1a8] sm:$0xf] %v4481_v17  ;;  %4484 = vst [vmem:[#allocation3 + $0x1ac] sm:$0xff] %v4483_v18   ;;  %v4489_v20 = vld [vmem:[%s11257_s13 + $0x1b4] sm:$0xf]  ;;  %v4499_v24 = vld [vmem:[%s11257_s13 + $0x1cc] sm:$0xff]  }
 0x157   :  { %4488 = vst [vmem:[#allocation3 + $0x1b4] sm:$0xf] %v4487_v19  ;;  %v4495_v22 = vld [vmem:[%s11257_s13 + $0x1c8] sm:$0xf]  ;;  %4490 = vst [vmem:[#allocation3 + $0x1b8] sm:$0xf] %v4489_v20 }
 0x158   :  { %4492 = vst [vmem:[#allocation3 + $0x1bc] sm:$0xff] %v4491_v21   ;;  %4496 = vst [vmem:[#allocation3 + $0x1c4] sm:$0xf] %v4495_v22  ;;  %v4497_v23 = vld [vmem:[%s11257_s13 + $0x1c4] sm:$0xf]  ;;  %v4507_v27 = vld [vmem:[%s11257_s13 + $0x1dc] sm:$0xff]  }
 0x159   :  { %v4503_v25 = vld [vmem:[%s11257_s13 + $0x1d8] sm:$0xf]  ;;  %4498 = vst [vmem:[#allocation3 + $0x1c8] sm:$0xf] %v4497_v23  ;;  %4500 = vst [vmem:[#allocation3 + $0x1cc] sm:$0xff] %v4499_v24   ;;  %v4515_v30 = vld [vmem:[%s11257_s13 + $0x1ec] sm:$0xff]  }
 0x15a   :  { %4504 = vst [vmem:[#allocation3 + $0x1d4] sm:$0xf] %v4503_v25  ;;  %v4505_v26 = vld [vmem:[%s11257_s13 + $0x1d4] sm:$0xf]  ;;  %v4511_v28 = vld [vmem:[%s11257_s13 + $0x1e8] sm:$0xf] }
 0x15b   :  { %4506 = vst [vmem:[#allocation3 + $0x1d8] sm:$0xf] %v4505_v26  ;;  %4508 = vst [vmem:[#allocation3 + $0x1dc] sm:$0xff] %v4507_v27   ;;  %v4513_v29 = vld [vmem:[%s11257_s13 + $0x1e4] sm:$0xf]  ;;  %s11288_s8 = sld [smem:[#allocation9_spill]] }
 0x15c   :  { %4512 = vst [vmem:[#allocation3 + $0x1e4] sm:$0xf] %v4511_v28  ;;  %v4519_v31 = vld [vmem:[%s11257_s13 + $0x1f8] sm:$0xf]  ;;  %4514 = vst [vmem:[#allocation3 + $0x1e8] sm:$0xf] %v4513_v29 }
 0x15d   :  { %4516 = vst [vmem:[#allocation3 + $0x1ec] sm:$0xff] %v4515_v30   ;;  %4520 = vst [vmem:[#allocation3 + $0x1f4] sm:$0xf] %v4519_v31  ;;  %v4521_v32 = vld [vmem:[%s11257_s13 + $0x1f4] sm:$0xf]  ;;  %s8522_s4 = smov 3  }
 0x15e   :  { %v4523_v33 = vld [vmem:[%s11257_s13 + $0x1fc] sm:$0xf]  ;;  %4522 = vst [vmem:[#allocation3 + $0x1f8] sm:$0xf] %v4521_v32  ;;  %s8523_s29 = smov 6  }
 0x15f   :  { %4524 = vst [vmem:[#allocation3 + $0x1fc] sm:$0xf] %v4523_v33 }
 0x161   :  { %v10313_v34 = vld [vmem:[%s11288_s8] sm:$0xff]  ;;  %v10322_v35 = vld [vmem:[%s11288_s8 + $0x8] sm:$0xff] }
 0x162   :  { %4820 = vrot.lane.b32.xlu0 %v10313_v34, %s8522_s4  ;;  %4832 = vrot.lane.b32.xlu1 %v10313_v34, %s8523_s29 }
 0x163   :  { %4811 = vsyncadd [#allocation4 + $0x1], 8192  ;;  %vm4876_vm0 = vcmask 1040384   ;;  %s11289_s2 = sld [smem:[#allocation10_spill]]  ;;  %vm8524_vm1 = vmmov 1   ;;  %s11292_s1 = sld [smem:[#allocation12_spill]] }
 0x164   :  { %vm10332_vm2 = vmpackc.low %vm4876_vm0, %vm8524_vm1  ;;  %v10361_v48 = vld [vmem:[%s11288_s8 + $0x10] sm:$0xff]  ;;  %v10366_v49 = vld [vmem:[%s11288_s8 + $0x18] sm:$0xff]  ;;  %vm4844_vm3 = vcmask 23552   ;;  %vm4849_vm4 = vcmask 48128   ;;  %vm4863_vm5 = vcmask 72704   ;;  %s11294_s27 = sld [smem:[#allocation16_spill]] }
 0x165   :  { %vm5573_vm6 = vcmask 1043456   ;;  %s11295_s8 = sld [smem:[#allocation11_spill]]  ;;  %vm4984_vm7 = vcmask 523264   ;;  %v8525_v33 = vmov 0.0   ;;  %s11296_s13 = sld [smem:[#allocation13_spill]]  ;;  %vm5560_vm8 = vcmask 31744  }
 0x166   :  { %4822 = vrot.lane.b32.xlu0 %v10322_v35, %s8522_s4  ;;  %4834 = vrot.lane.b32.xlu1 %v10322_v35, %s8523_s29  ;;  %s11297_s5 = sld [smem:[#allocation15_spill]]  ;;  %vm8527_vm9 = vmmov 0   ;;  %vm5777_vm10 = vcmask 130048   ;;  %s8529_s30 = smov 18   ;;  %vm6089_vm11 = vcmask 97280   ;;  %vm6091_vm12 = vcmask 121856  }
 0x167   :  { %s8530_s7 = smov 24   ;;  %s8534_s9 = smov 15   ;;  %vm6093_vm13 = vcmask 146432   ;;  %vm6095_vm14 = vcmask 171008   ;;  %vm6097_vm15 = vcmask 195584  }
 0x169   :  { %v4854_v36 = vld [vmem:[%s11289_s2] sm:$0xff]  ;;  %v4855_v37 = vld [vmem:[%s11289_s2 + $0x8] sm:$0x1]  ;;  %v4971_v42 = vld [vmem:[%s11292_s1 + $0x10] sm:$0xff]  ;;  %s11293_s2 = sld [smem:[#allocation14_spill]] }
 0x16a   :  { %v8343_v39 = vpack.c.bf16 %v4855_v37, %v4854_v36  ;;  %v4969_v40 = vld [vmem:[%s11292_s1] sm:$0xff]  ;;  %v4970_v41 = vld [vmem:[%s11292_s1 + $0x8] sm:$0xff]  ;;  %v4972_v44 = vld [vmem:[%s11292_s1 + $0x18] sm:$0xff]  ;;  %4824 = vrot.lane.b32.xlu0 %v10361_v48, %s8522_s4 }
 0x16b   :  { %v8349_v43 = vpack.c.bf16 %v4970_v41, %v4969_v40  ;;  %v8353_v45 = vpack.c.bf16 %v4972_v44, %v4971_v42  ;;  %v4973_v46 = vld [vmem:[%s11292_s1 + $0x20] sm:$0xff]  ;;  %v4974_v47 = vld [vmem:[%s11292_s1 + $0x28] sm:$0xff]  ;;  %4826 = vrot.lane.b32.xlu1 %v10366_v49, %s8522_s4  ;;  %v4975_v3 = vld [vmem:[%s11292_s1 + $0x30] sm:$0xff] }
 0x16c   :  { %8345 = vmatprep.subr.msk.bf16.mxu0 %vm10332_vm2, %v8343_v39  ;;  %v8357_v50 = vpack.c.bf16 %v4974_v47, %v4973_v46  ;;  %v4976_v4 = vld [vmem:[%s11292_s1 + $0x38] sm:$0xff]  ;;  %v5552_v9 = vld [vmem:[%s11294_s27] sm:$0xf]  ;;  %s11298_s27 = sld [smem:[#allocation17_spill]] }
 0x16d   :  { %8350 = vmatprep.subr.bf16.mxu1 %v8349_v43  ;;  %8348 = vmatpush3.bf16.msk.msra.mxu0 %vm10332_vm2, %v8343_v39  ;;  %v8361_v5 = vpack.c.bf16 %v4976_v4, %v4975_v3  ;;  %v8016_v10 = vld [vmem:[%s11295_s8] ss:$0 sm:$0xff] }
 0x16e   :  { %8352 = vmatpush3.bf16.msra.mxu1 %v8349_v43  ;;  %4836 = vrot.lane.b32.xlu0 %v10361_v48, %s8523_s29  ;;  %v8022_v38 = vld [vmem:[%s11296_s13] ss:$0 sm:$0xff]  ;;  %s8535_s13 = smov 27  }
 0x16f   :  { %8354 = vmatprep.subr.bf16.mxu1 %v8353_v45  ;;  %4838 = vrot.lane.b32.xlu1 %v10366_v49, %s8523_s29  ;;  %v5083_v6 = vld [vmem:[%s11293_s2 + $0x8] sm:$0xff]  ;;  %v5082_v14 = vld [vmem:[%s11293_s2] sm:$0xff]  ;;  %v5085_v17 = vld [vmem:[%s11293_s2 + $0x18] sm:$0xff] }
 0x170   :  { %v5091_v7 = vld [vmem:[%s11293_s2 + $0x48] sm:$0x1]  ;;  %8224 = vmatprep.subr.msk.mxu0 %vm5573_vm6, %v5552_v9  ;;  %v5090_v15 = vld [vmem:[%s11293_s2 + $0x40] sm:$0x1]  ;;  %v5093_v18 = vld [vmem:[%s11293_s2 + $0x58] sm:$0x1] }
 0x171   :  { %v8365_v8 = vpack.c.bf16 %v5091_v7, %v5083_v6  ;;  %v8368_v20 = vpack.c.bf16 %v5090_v15, %v5082_v14  ;;  %v8371_v22 = vpack.c.bf16 %v5093_v18, %v5085_v17  ;;  %v5084_v29 = vld [vmem:[%s11293_s2 + $0x10] sm:$0xff]  ;;  %v5087_v31 = vld [vmem:[%s11293_s2 + $0x28] sm:$0xff]  ;;  %v5086_v39 = vld [vmem:[%s11293_s2 + $0x20] sm:$0xff] }
 0x172   :  { %8356 = vmatpush3.bf16.msra.mxu1 %v8353_v45  ;;  %v5092_v30 = vld [vmem:[%s11293_s2 + $0x50] sm:$0x1]  ;;  %v5095_v32 = vld [vmem:[%s11293_s2 + $0x68] sm:$0x1]  ;;  %v5094_v40 = vld [vmem:[%s11293_s2 + $0x60] sm:$0x1] }
 0x173   :  { %8358 = vmatprep.subr.bf16.mxu1 %v8357_v50  ;;  %v8374_v36 = vpack.c.bf16 %v5092_v30, %v5084_v29  ;;  %v8377_v37 = vpack.c.bf16 %v5095_v32, %v5087_v31  ;;  %v5089_v41 = vld [vmem:[%s11293_s2 + $0x38] sm:$0xff]  ;;  %v8380_v43 = vpack.c.bf16 %v5094_v40, %v5086_v39  ;;  %v5088_v45 = vld [vmem:[%s11293_s2 + $0x30] sm:$0xff] }
 0x174   :  { %v5097_v42 = vld [vmem:[%s11293_s2 + $0x78] sm:$0x1]  ;;  %v5096_v46 = vld [vmem:[%s11293_s2 + $0x70] sm:$0x1]  ;;  %s8533_s2 = smov 21  }
 0x175   :  { %v8383_v44 = vpack.c.bf16 %v5097_v42, %v5089_v41  ;;  %v8386_v47 = vpack.c.bf16 %v5096_v46, %v5088_v45 }
 0x176   :  { %8360 = vmatpush3.bf16.msra.mxu1 %v8357_v50  ;;  %v5100_v50 = vlaneseq }
 0x177   :  { %8362 = vmatprep.subr.bf16.mxu1 %v8361_v5 }
 0x17a   :  { %8364 = vmatpush3.bf16.msra.mxu1 %v8361_v5 }
 0x17b   :  { %8367 = vmatprep.subr.msk.bf16.mxu1 %vm10332_vm2, %v8365_v8 }
 0x1d4   :  { %v4821_v51 = vpop.permute.xlu0 %4820  ;;  %v4833_v52 = vpop.permute.xlu1 %4832 }
 0x1d5   :  { %v4845_v53 = vsel %vm4844_vm3, %v10313_v34, %v4821_v51 }
 0x1d6   :  { %v10383_v54 = vsel %vm4849_vm4, %v4845_v53, %v4833_v52 }
 0x1d7   :  { %8196 = vmatprep.mubr.msk.f32.mxu0 %vm4863_vm5, %v10383_v54 }
 0x1d8   :  { %v4823_v55 = vpop.permute.xlu0 %4822  ;;  %v4835_v56 = vpop.permute.xlu1 %4834 }
 0x1d9   :  { %v4846_v57 = vsel %vm4844_vm3, %v10322_v35, %v4823_v55  ;;  %v10541_v55 = vshrl.u32 %v5100_v50, 7 }
 0x1da   :  { %v10390_v58 = vsel %vm4849_vm4, %v4846_v57, %v4835_v56 }
 0x1db   :  { %8197 = vmatmul.mubr.msk.f32.vlgmr.msra.gmra.mrb[0].mxu0 %vm4863_vm5, %v10390_v58  ;;  %v10546_v56 = vsub.s32 0, %v10541_v55 }
 0x1dc   :  { %v4825_v59 = vpop.permute.xlu0 %4824  ;;  %8225 = vmatpush3.msk.msra.mxu0 %vm5573_vm6, %v5552_v9 }
 0x1dd   :  { %v4827_v60 = vpop.permute.xlu1 %4826  ;;  %v4847_v61 = vsel %vm4844_vm3, %v10361_v48, %v4825_v59  ;;  %v10554_v59 = vsub.s32 1, %v10541_v55 }
 0x1de   :  { %v4848_v62 = vsel %vm4844_vm3, %v10366_v49, %v4827_v60 }
 0x1e0   :  { %v4837_v63 = vpop.permute.xlu0 %4836 }
 0x1e1   :  { %v4839_v0 = vpop.permute.xlu1 %4838  ;;  %v10399_v1 = vsel %vm4849_vm4, %v4847_v61, %v4837_v63 }
 0x1e2   :  { %v10402_v2 = vsel %vm4849_vm4, %v4848_v62, %v4839_v0  ;;  %8199 = vmatprep.mubr.msk.f32.mxu0 %vm4863_vm5, %v10399_v1 }
 0x1e3   :  { %8200 = vmatmul.mubr.msk.f32.gmra.mrb[2].mxu0 %vm4863_vm5, %v10402_v2 }
 0x2ae   :  { %v8198_v11 = vpop.f32.mrb[0].mxu0 }
 0x2af   :  { %v4952_v12 = vadd.f32 %v8198_v11, %v8016_v10  ;;  %v4946_v13 = vpop.f32.mrb[1].mxu0 }
 0x2b0   :  { %v4947_v16 = vadd.f32 %v8016_v10, %v4946_v13 }
 0x2b1   :  { %v4966_v21 = vmax.f32 %v4952_v12, 0.0 }
 0x2b2   :  { %v4965_v19 = vmax.f32 %v4947_v16, 0.0 }
 0x2b4   :  { %8218 = vmatprep.mubr.msk.f32.mxu1 %vm4984_vm7, %v4965_v19  ;;  %v10563_v19 = vsub.s32 2, %v10541_v55 }
 0x2b5   :  { %8219 = vmatmul.mubr.msk.f32.vlgmr.msra.gmra.mrb[0].mxu1 %vm4984_vm7, %v4966_v21 }
 0x2b6   :  { %v8201_v23 = vpop.f32.mrb[2].mxu0  ;;  %8370 = vmatpush1.bf16.msk.msra.mxu1 %vm10332_vm2, %v8368_v20 }
 0x2b7   :  { %v4962_v24 = vadd.f32 %v8201_v23, %v8016_v10  ;;  %v4956_v25 = vpop.f32.mrb[3].mxu0  ;;  %8373 = vmatprep.subr.msk.bf16.mxu1 %vm10332_vm2, %v8371_v22  ;;  %v10566_v23 = vsub.s32 3, %v10541_v55 }
 0x2b8   :  { %v4957_v26 = vadd.f32 %v8016_v10, %v4956_v25 }
 0x2b9   :  { %v4968_v27 = vmax.f32 %v4962_v24, 0.0 }
 0x2ba   :  { %v4967_v28 = vmax.f32 %v4957_v26, 0.0 }
 0x2bc   :  { %8221 = vmatprep.mubr.msk.f32.mxu1 %vm4984_vm7, %v4967_v28 }
 0x2bd   :  { %8222 = vmatmul.mubr.msk.f32.gmra.mrb[2].mxu1 %vm4984_vm7, %v4968_v27  ;;  %vm8403_vm7 = vmpackc.low %vm5573_vm6, %vm8524_vm1  ;;  %vm6469_vm1 = vcmask 1045504  }
 0x2be   :  { %5228 = vmatprep.mubr.f32.mxu1 %v8525_v33 }
 0x2c1   :  { %8029 = vmatmul.mubr.msk.f32.vlgmr.msra.gmra.mrb[4].mxu1 %vm4863_vm5, %v10383_v54 }
 0x2c2   :  { %5234 = vmatprep.mubr.f32.mxu1 %v8525_v33  ;;  %8376 = vmatpush1.bf16.msk.msra.mxu1 %vm10332_vm2, %v8374_v36 }
 0x2c3   :  { %8379 = vmatprep.subr.msk.bf16.mxu1 %vm10332_vm2, %v8377_v37 }
 0x2c5   :  { %8030 = vmatmul.mubr.msk.f32.gmra.mrb[6].mxu1 %vm4863_vm5, %v10390_v58 }
 0x2c6   :  { %5240 = vmatprep.mubr.f32.mxu1 %v8525_v33 }
 0x2c9   :  { %8031 = vmatmul.mubr.msk.f32.gmra.mrb[8].mxu1 %vm4863_vm5, %v10399_v1 }
 0x2ca   :  { %5246 = vmatprep.mubr.f32.mxu1 %v8525_v33 }
 0x2cd   :  { %8032 = vmatmul.mubr.msk.f32.gmra.mrb[10].mxu1 %vm4863_vm5, %v10402_v2 }
 0x2ce   :  { %5317 = vmatprep.mubr.f32.mxu1 %v8525_v33 }
 0x2d1   :  { %8035 = vmatmul.mubr.msk.f32.vlgmr.msra.gmra.mrb[12].mxu1 %vm4863_vm5, %v10383_v54 }
 0x2d2   :  { %5323 = vmatprep.mubr.f32.mxu1 %v8525_v33  ;;  %8382 = vmatpush1.bf16.msk.msra.mxu1 %vm10332_vm2, %v8380_v43 }
 0x2d3   :  { %8385 = vmatprep.subr.msk.bf16.mxu1 %vm10332_vm2, %v8383_v44 }
 0x2d5   :  { %8036 = vmatmul.mubr.msk.f32.gmra.mrb[14].mxu1 %vm4863_vm5, %v10390_v58 }
 0x2d6   :  { %5329 = vmatprep.mubr.f32.mxu1 %v8525_v33 }
 0x2d9   :  { %8037 = vmatmul.mubr.msk.f32.gmra.mrb[16].mxu1 %vm4863_vm5, %v10399_v1 }
 0x2da   :  { %5335 = vmatprep.mubr.f32.mxu1 %v8525_v33 }
 0x2dd   :  { %8038 = vmatmul.mubr.msk.f32.gmra.mrb[18].mxu1 %vm4863_vm5, %v10402_v2 }
 0x2de   :  { %5406 = vmatprep.mubr.f32.mxu1 %v8525_v33 }
 0x2e1   :  { %8041 = vmatmul.mubr.msk.f32.vlgmr.msra.gmra.mrb[20].mxu1 %vm4863_vm5, %v10383_v54 }
 0x2e2   :  { %5412 = vmatprep.mubr.f32.mxu1 %v8525_v33  ;;  %8388 = vmatpush1.bf16.msk.msra.mxu1 %vm10332_vm2, %v8386_v47  ;;  %vm6101_vm2 = vcmask 244736  }
 0x2e5   :  { %8042 = vmatmul.mubr.msk.f32.gmra.mrb[22].mxu1 %vm4863_vm5, %v10390_v58 }
 0x2e6   :  { %5418 = vmatprep.mubr.f32.mxu1 %v8525_v33 }
 0x2e9   :  { %8043 = vmatmul.mubr.msk.f32.gmra.mrb[24].mxu1 %vm4863_vm5, %v10399_v1 }
 0x2ea   :  { %5424 = vmatprep.mubr.f32.mxu1 %v8525_v33 }
 0x2ed   :  { %8044 = vmatmul.mubr.msk.f32.gmra.mrb[26].mxu1 %vm4863_vm5, %v10402_v2 }
 0x2ee   :  { %5495 = vmatprep.mubr.f32.mxu1 %v8525_v33 }
 0x2f1   :  { %8047 = vmatmul.mubr.msk.f32.vlgmr.msra.gmra.mrb[28].mxu1 %vm4863_vm5, %v10383_v54 }
 0x2f2   :  { %5501 = vmatprep.mubr.f32.mxu1 %v8525_v33 }
 0x2f5   :  { %8048 = vmatmul.mubr.msk.f32.gmra.mrb[30].mxu1 %vm4863_vm5, %v10390_v58  ;;  %v10551_v58 = vld [vmem:[%s11297_s5] sm:$0xff]  ;;  %s8531_s5 = smov 30  }
 0x2f6   :  { %5507 = vmatprep.mubr.f32.mxu1 %v8525_v33  ;;  %v5103_v63 = vrot.slane %v10551_v58, %v10546_v56  ;;  %v5111_v31 = vrot.slane %v10551_v58, %v10563_v19  ;;  %v5115_v39 = vrot.slane %v10551_v58, %v10566_v23 }
 0x2f9   :  { %8049 = vmatmul.mubr.msk.f32.gmra.mrb[32].mxu1 %vm4863_vm5, %v10399_v1  ;;  %v5107_v1 = vrot.slane %v10551_v58, %v10554_v59 }
 0x2fa   :  { %5513 = vmatprep.mubr.f32.mxu1 %v8525_v33 }
 0x2fd   :  { %8050 = vmatmul.mubr.msk.f32.gmra.mrb[34].mxu1 %vm4863_vm5, %v10402_v2 }
 0x2fe   :  { %8256 = vmatprep.mubr.msk.f32.mxu1 %vm8527_vm9, %v8525_v33 }
 0x388   :  { %v8220_v51 = vpop.f32.mrb[0].mxu1 }
 0x389   :  { %v5063_v52 = vpop.f32.mrb[1].mxu1  ;;  %v5069_v54 = vadd.f32 %v8220_v51, %v8022_v38 }
 0x38a   :  { %v5064_v53 = vadd.f32 %v8022_v38, %v5063_v52 }
 0x38c   :  { %8226 = vmatprep.mubr.msk.f32.mxu0 %vm5560_vm8, %v5064_v53 }
 0x38d   :  { %8227 = vmatmul.mubr.msk.f32.vlgmr.msra.gmra.mrb[4].mxu0 %vm5560_vm8, %v5069_v54 }
 0x390   :  { %v8223_v57 = vpop.f32.mrb[2].mxu1 }
 0x391   :  { %v5079_v60 = vadd.f32 %v8223_v57, %v8022_v38  ;;  %v5073_v61 = vpop.f32.mrb[3].mxu1 }
 0x392   :  { %v5074_v62 = vadd.f32 %v8022_v38, %v5073_v61 }
 0x394   :  { %v5230_v0 = vpop.f32.mrb[4].mxu1  ;;  %8229 = vmatprep.mubr.msk.f32.mxu0 %vm5560_vm8, %v5074_v62 }
 0x395   :  { %v5232_v2 = vpop.f32.mrb[5].mxu1  ;;  %8230 = vmatmul.mubr.msk.f32.gmra.mrb[6].mxu0 %vm5560_vm8, %v5079_v60  ;;  %v5231_v3 = vadd.f32 %v5230_v0, %v5103_v63 }
 0x396   :  { %v5233_v4 = vadd.f32 %v5232_v2, %v5107_v1  ;;  %8236 = vmatprep.mubr.msk.f32.mxu0 %vm8527_vm9, %v8525_v33 }
 0x397   :  { %v5520_v9 = vmax.f32 %v5231_v3, 0.0 }
 0x398   :  { %v5236_v5 = vpop.f32.mrb[6].mxu1  ;;  %v5521_v11 = vmax.f32 %v5233_v4, 0.0 }
 0x399   :  { %v5237_v6 = vadd.f32 %v5236_v5, %v5103_v63  ;;  %v5238_v7 = vpop.f32.mrb[7].mxu1 }
 0x39a   :  { %v5239_v8 = vadd.f32 %v5238_v7, %v5107_v1 }
 0x39b   :  { %v5528_v10 = vmax.f32 %v5237_v6, 0.0 }
 0x39c   :  { %v5529_v12 = vmax.f32 %v5239_v8, 0.0  ;;  %v5242_v13 = vpop.f32.mrb[8].mxu1 }
 0x39d   :  { %v5662_v14 = vmax.f32 %v5520_v9, %v5528_v10  ;;  %v5244_v15 = vpop.f32.mrb[9].mxu1  ;;  %v5243_v18 = vadd.f32 %v5242_v13, %v5103_v63 }
 0x39e   :  { %v5669_v16 = vmax.f32 %v5521_v11, %v5529_v12  ;;  %v5245_v21 = vadd.f32 %v5244_v15, %v5107_v1  ;;  %v5118_v15 = vsub.s32 4, %v10541_v55 }
 0x39f   :  { %v5663_v17 = vrot.slane %v5662_v14, 4  ;;  %v5536_v29 = vmax.f32 %v5243_v18, 0.0 }
 0x3a0   :  { %v5670_v20 = vrot.slane %v5669_v16, 4  ;;  %v5248_v22 = vpop.f32.mrb[10].mxu1  ;;  %v5537_v32 = vmax.f32 %v5245_v21, 0.0  ;;  %v5122_v21 = vsub.s32 5, %v10541_v55 }
 0x3a1   :  { %v5664_v24 = vmax.f32 %v5662_v14, %v5663_v17  ;;  %v5249_v25 = vadd.f32 %v5248_v22, %v5103_v63  ;;  %v5250_v26 = vpop.f32.mrb[11].mxu1 }
 0x3a2   :  { %v5671_v27 = vmax.f32 %v5669_v16, %v5670_v20  ;;  %v5251_v28 = vadd.f32 %v5250_v26, %v5107_v1 }
 0x3a3   :  { %v5544_v30 = vmax.f32 %v5249_v25, 0.0  ;;  %v5665_v40 = vrot.slane %v5664_v24, 2 }
 0x3a4   :  { %v5545_v36 = vmax.f32 %v5251_v28, 0.0  ;;  %v5319_v37 = vpop.f32.mrb[12].mxu1  ;;  %v5672_v43 = vrot.slane %v5671_v27, 2 }
 0x3a5   :  { %v5851_v41 = vmax.f32 %v5536_v29, %v5544_v30  ;;  %v5321_v42 = vpop.f32.mrb[13].mxu1  ;;  %v5320_v46 = vadd.f32 %v5319_v37, %v5111_v31  ;;  %v5666_v51 = vmax.f32 %v5664_v24, %v5665_v40 }
 0x3a6   :  { %v5858_v44 = vmax.f32 %v5537_v32, %v5545_v36  ;;  %v5322_v38 = vadd.f32 %v5321_v42, %v5115_v39  ;;  %v5673_v57 = vmax.f32 %v5671_v27, %v5672_v43 }
 0x3a7   :  { %v5852_v45 = vrot.slane %v5851_v41, 4  ;;  %v5522_v63 = vmax.f32 %v5320_v46, 0.0  ;;  %v5667_v5 = vrot.slane %v5666_v51, 1 }
 0x3a8   :  { %v5859_v47 = vrot.slane %v5858_v44, 4  ;;  %v5325_v50 = vpop.f32.mrb[14].mxu1  ;;  %v5523_v2 = vmax.f32 %v5322_v38, 0.0  ;;  %v5674_v9 = vrot.slane %v5673_v57, 1 }
 0x3a9   :  { %v5853_v52 = vmax.f32 %v5851_v41, %v5852_v45  ;;  %v5326_v53 = vadd.f32 %v5325_v50, %v5111_v31  ;;  %v5327_v54 = vpop.f32.mrb[15].mxu1  ;;  %v5668_v22 = vmax.f32 %v5666_v51, %v5667_v5  ;;  %v5119_v41 = vrot.slane %v10551_v58, %v5118_v15 }
 0x3aa   :  { %v5860_v60 = vmax.f32 %v5858_v44, %v5859_v47  ;;  %v5328_v61 = vadd.f32 %v5327_v54, %v5115_v39  ;;  %v5675_v28 = vmax.f32 %v5673_v57, %v5674_v9 }
 0x3ab   :  { %v5854_v62 = vrot.slane %v5853_v52, 2  ;;  %v5530_v0 = vmax.f32 %v5326_v53, 0.0 }
 0x3ac   :  { %v5861_v1 = vrot.slane %v5860_v60, 2  ;;  %v5531_v3 = vmax.f32 %v5328_v61, 0.0  ;;  %v5331_v4 = vpop.f32.mrb[16].mxu1 }
 0x3ad   :  { %v5855_v6 = vmax.f32 %v5853_v52, %v5854_v62  ;;  %v5676_v7 = vmax.f32 %v5522_v63, %v5530_v0  ;;  %v5333_v8 = vpop.f32.mrb[17].mxu1  ;;  %v5332_v14 = vadd.f32 %v5331_v4, %v5111_v31 }
 0x3ae   :  { %v5862_v10 = vmax.f32 %v5860_v60, %v5861_v1  ;;  %v5683_v11 = vmax.f32 %v5523_v2, %v5531_v3  ;;  %v5334_v18 = vadd.f32 %v5333_v8, %v5115_v39 }
 0x3af   :  { %v5856_v12 = vrot.slane %v5855_v6, 1  ;;  %v5677_v13 = vrot.slane %v5676_v7, 4  ;;  %v5538_v37 = vmax.f32 %v5332_v14, 0.0 }
 0x3b0   :  { %v5863_v16 = vrot.slane %v5862_v10, 1  ;;  %v5684_v17 = vrot.slane %v5683_v11, 4  ;;  %v5337_v20 = vpop.f32.mrb[18].mxu1  ;;  %v5539_v43 = vmax.f32 %v5334_v18, 0.0 }
 0x3b1   :  { %v5857_v24 = vmax.f32 %v5855_v6, %v5856_v12  ;;  %v5678_v25 = vmax.f32 %v5676_v7, %v5677_v13  ;;  %v5338_v26 = vadd.f32 %v5337_v20, %v5111_v31  ;;  %v5339_v27 = vpop.f32.mrb[19].mxu1  ;;  %v5123_v31 = vrot.slane %v10551_v58, %v5122_v21 }
 0x3b2   :  { %v5864_v29 = vmax.f32 %v5862_v10, %v5863_v16  ;;  %v5685_v30 = vmax.f32 %v5683_v11, %v5684_v17  ;;  %v5340_v32 = vadd.f32 %v5339_v27, %v5115_v39  ;;  %v5126_v21 = vsub.s32 6, %v10541_v55 }
 0x3b3   :  { %v10575_v36 = vsel %vm4876_vm0, %v5668_v22, %v5857_v24  ;;  %v5546_v40 = vmax.f32 %v5338_v26, 0.0  ;;  %v5679_v46 = vrot.slane %v5678_v25, 2  ;;  %v5130_v27 = vsub.s32 7, %v10541_v55 }
 0x3b4   :  { %v10579_v42 = vsel %vm4876_vm0, %v5675_v28, %v5864_v29  ;;  %v5547_v44 = vmax.f32 %v5340_v32, 0.0  ;;  %v5408_v45 = vpop.f32.mrb[20].mxu1  ;;  %v5686_v50 = vrot.slane %v5685_v30, 2 }
 0x3b5   :  { %v5865_v47 = vmax.f32 %v5538_v37, %v5546_v40  ;;  %v5410_v38 = vpop.f32.mrb[21].mxu1  ;;  %v5409_v52 = vadd.f32 %v5408_v45, %v5119_v41  ;;  %v5680_v60 = vmax.f32 %v5678_v25, %v5679_v46 }
 0x3b6   :  { %v5872_v39 = vmax.f32 %v5539_v43, %v5547_v44  ;;  %v5411_v54 = vadd.f32 %v5410_v38, %v5123_v31  ;;  %v5687_v0 = vmax.f32 %v5685_v30, %v5686_v50  ;;  %v5127_v50 = vrot.slane %v10551_v58, %v5126_v21 }
 0x3b7   :  { %v5866_v51 = vrot.slane %v5865_v47, 4  ;;  %v5524_v4 = vmax.f32 %v5409_v52, 0.0  ;;  %v5681_v10 = vrot.slane %v5680_v60, 1 }
 0x3b8   :  { %v5873_v53 = vrot.slane %v5872_v39, 4  ;;  %v5414_v57 = vpop.f32.mrb[22].mxu1  ;;  %v5525_v7 = vmax.f32 %v5411_v54, 0.0  ;;  %v5688_v14 = vrot.slane %v5687_v0, 1 }
 0x3b9   :  { %v5867_v61 = vmax.f32 %v5865_v47, %v5866_v51  ;;  %v5415_v62 = vadd.f32 %v5414_v57, %v5119_v41  ;;  %v5416_v63 = vpop.f32.mrb[23].mxu1  ;;  %v5682_v28 = vmax.f32 %v5680_v60, %v5681_v10 }
 0x3ba   :  { %v5874_v1 = vmax.f32 %v5872_v39, %v5873_v53  ;;  %v5417_v2 = vadd.f32 %v5416_v63, %v5123_v31  ;;  %v5689_v40 = vmax.f32 %v5687_v0, %v5688_v14 }
 0x3bb   :  { %v5868_v3 = vrot.slane %v5867_v61, 2  ;;  %v5532_v5 = vmax.f32 %v5415_v62, 0.0 }
 0x3bc   :  { %v5875_v6 = vrot.slane %v5874_v1, 2  ;;  %v5533_v8 = vmax.f32 %v5417_v2, 0.0  ;;  %v5420_v9 = vpop.f32.mrb[24].mxu1 }
 0x3bd   :  { %v5869_v11 = vmax.f32 %v5867_v61, %v5868_v3  ;;  %v5690_v12 = vmax.f32 %v5524_v4, %v5532_v5  ;;  %v5422_v13 = vpop.f32.mrb[25].mxu1  ;;  %v5421_v20 = vadd.f32 %v5420_v9, %v5119_v41 }
 0x3be   :  { %v5876_v15 = vmax.f32 %v5874_v1, %v5875_v6  ;;  %v5697_v16 = vmax.f32 %v5525_v7, %v5533_v8  ;;  %v5423_v25 = vadd.f32 %v5422_v13, %v5123_v31 }
 0x3bf   :  { %v5870_v17 = vrot.slane %v5869_v11, 1  ;;  %v5691_v18 = vrot.slane %v5690_v12, 4  ;;  %v5540_v47 = vmax.f32 %v5421_v20, 0.0 }
 0x3c0   :  { %v5877_v22 = vrot.slane %v5876_v15, 1  ;;  %v5698_v24 = vrot.slane %v5697_v16, 4  ;;  %v5426_v26 = vpop.f32.mrb[26].mxu1  ;;  %v5541_v51 = vmax.f32 %v5423_v25, 0.0 }
 0x3c1   :  { %v5871_v29 = vmax.f32 %v5869_v11, %v5870_v17  ;;  %v5692_v30 = vmax.f32 %v5690_v12, %v5691_v18  ;;  %v5427_v32 = vadd.f32 %v5426_v26, %v5119_v41  ;;  %v5428_v37 = vpop.f32.mrb[27].mxu1  ;;  %v5131_v41 = vrot.slane %v10551_v58, %v5130_v27 }
 0x3c2   :  { %v5878_v43 = vmax.f32 %v5876_v15, %v5877_v22  ;;  %v5699_v44 = vmax.f32 %v5697_v16, %v5698_v24  ;;  %v5429_v45 = vadd.f32 %v5428_v37, %v5123_v31 }
 0x3c3   :  { %v10585_v46 = vsel %vm4876_vm0, %v5682_v28, %v5871_v29  ;;  %v5548_v38 = vmax.f32 %v5427_v32, 0.0  ;;  %v5693_v54 = vrot.slane %v5692_v30, 2 }
 0x3c4   :  { %v10589_v39 = vsel %vm4876_vm0, %v5689_v40, %v5878_v43  ;;  %v5549_v52 = vmax.f32 %v5429_v45, 0.0  ;;  %v5497_v53 = vpop.f32.mrb[28].mxu1  ;;  %v5700_v61 = vrot.slane %v5699_v44, 2 }
 0x3c5   :  { %v5879_v57 = vmax.f32 %v5540_v47, %v5548_v38  ;;  %v5499_v60 = vpop.f32.mrb[29].mxu1  ;;  %v5498_v63 = vadd.f32 %v5497_v53, %v5127_v50  ;;  %v5694_v3 = vmax.f32 %v5692_v30, %v5693_v54 }
 0x3c6   :  { %v5886_v31 = vmax.f32 %v5541_v51, %v5549_v52  ;;  %v5500_v1 = vadd.f32 %v5499_v60, %v5131_v41  ;;  %v5701_v7 = vmax.f32 %v5699_v44, %v5700_v61 }
 0x3c7   :  { %v5880_v62 = vrot.slane %v5879_v57, 4  ;;  %v5526_v11 = vmax.f32 %v5498_v63, 0.0  ;;  %v5695_v16 = vrot.slane %v5694_v3, 1 }
 0x3c8   :  { %v5887_v0 = vrot.slane %v5886_v31, 4  ;;  %v5503_v2 = vpop.f32.mrb[30].mxu1  ;;  %v5527_v13 = vmax.f32 %v5500_v1, 0.0  ;;  %v5702_v21 = vrot.slane %v5701_v7, 1 }
 0x3c9   :  { %v5881_v4 = vmax.f32 %v5879_v57, %v5880_v62  ;;  %v5504_v5 = vadd.f32 %v5503_v2, %v5127_v50  ;;  %v5505_v6 = vpop.f32.mrb[31].mxu1  ;;  %v5696_v37 = vmax.f32 %v5694_v3, %v5695_v16 }
 0x3ca   :  { %v5888_v8 = vmax.f32 %v5886_v31, %v5887_v0  ;;  %v5506_v9 = vadd.f32 %v5505_v6, %v5131_v41  ;;  %v5703_v47 = vmax.f32 %v5701_v7, %v5702_v21  ;;  %v8526_v21 = vmov 0.0|0.0  }
 0x3cb   :  { %v5882_v10 = vrot.slane %v5881_v4, 2  ;;  %v5534_v58 = vmax.f32 %v5504_v5, 0.0  ;;  %8389 = vmatprep.subr.bf16.mxu0 %v8526_v21  ;;  %8395 = vmatprep.subr.bf16.mxu1 %v8526_v21 }
 0x3cc   :  { %v5889_v12 = vrot.slane %v5888_v8, 2  ;;  %v5535_v14 = vmax.f32 %v5506_v9, 0.0  ;;  %v5509_v15 = vpop.f32.mrb[32].mxu1 }
 0x3cd   :  { %v5883_v17 = vmax.f32 %v5881_v4, %v5882_v10  ;;  %v5704_v18 = vmax.f32 %v5526_v11, %v5534_v58  ;;  %v5511_v20 = vpop.f32.mrb[33].mxu1  ;;  %v5510_v27 = vadd.f32 %v5509_v15, %v5127_v50 }
 0x3ce   :  { %v5890_v22 = vmax.f32 %v5888_v8, %v5889_v12  ;;  %v5711_v24 = vmax.f32 %v5527_v13, %v5535_v14  ;;  %v5512_v30 = vadd.f32 %v5511_v20, %v5131_v41  ;;  %v8390_v20 = vpack.c.bf16 %v10322_v35, %v10313_v34 }
 0x3cf   :  { %v5884_v25 = vrot.slane %v5883_v17, 1  ;;  %v5705_v26 = vrot.slane %v5704_v18, 4  ;;  %v5542_v54 = vmax.f32 %v5510_v27, 0.0 }
 0x3d0   :  { %v5891_v28 = vrot.slane %v5890_v22, 1  ;;  %v5712_v29 = vrot.slane %v5711_v24, 4  ;;  %v5515_v32 = vpop.f32.mrb[34].mxu1  ;;  %v5543_v61 = vmax.f32 %v5512_v30, 0.0  ;;  %8391 = vmatpush3.bf16.msra.mxu0 %v8390_v20 }
 0x3d1   :  { %v5885_v40 = vmax.f32 %v5883_v17, %v5884_v25  ;;  %v5706_v43 = vmax.f32 %v5704_v18, %v5705_v26  ;;  %v5516_v44 = vadd.f32 %v5515_v32, %v5127_v50  ;;  %v5517_v45 = vpop.f32.mrb[35].mxu1  ;;  %8392 = vmatprep.subr.bf16.mxu0 %v8526_v21 }
 0x3d2   :  { %v5892_v38 = vmax.f32 %v5890_v22, %v5891_v28  ;;  %v5713_v51 = vmax.f32 %v5711_v24, %v5712_v29  ;;  %v5518_v52 = vadd.f32 %v5517_v45, %v5131_v41  ;;  %v8051_v22 = vld [vmem:[%s11298_s27] ss:$0 sm:$0xff] }
 0x3d3   :  { %v10593_v53 = vsel %vm4876_vm0, %v5696_v37, %v5885_v40  ;;  %v5550_v57 = vmax.f32 %v5516_v44, 0.0  ;;  %v5707_v62 = vrot.slane %v5706_v43, 2 }
 0x3d4   :  { %v10596_v60 = vsel %vm4876_vm0, %v5703_v47, %v5892_v38  ;;  %v5551_v31 = vmax.f32 %v5518_v52, 0.0  ;;  %v5714_v0 = vrot.slane %v5713_v51, 2 }
 0x3d5   :  { %v5893_v63 = vmax.f32 %v5542_v54, %v5550_v57  ;;  %v5708_v3 = vmax.f32 %v5706_v43, %v5707_v62 }
 0x3d6   :  { %v5900_v1 = vmax.f32 %v5543_v61, %v5551_v31  ;;  %v5715_v5 = vmax.f32 %v5713_v51, %v5714_v0 }
 0x3d7   :  { %v5894_v50 = vrot.slane %v5893_v63, 4  ;;  %v5709_v8 = vrot.slane %v5708_v3, 1 }
 0x3d8   :  { %v5901_v2 = vrot.slane %v5900_v1, 4  ;;  %v5716_v10 = vrot.slane %v5715_v5, 1 }
 0x3d9   :  { %v5895_v4 = vmax.f32 %v5893_v63, %v5894_v50  ;;  %v5710_v13 = vmax.f32 %v5708_v3, %v5709_v8 }
 0x3da   :  { %v5902_v41 = vmax.f32 %v5900_v1, %v5901_v2  ;;  %v5717_v15 = vmax.f32 %v5715_v5, %v5716_v10 }
 0x3db   :  { %v5896_v6 = vrot.slane %v5895_v4, 2 }
 0x3dc   :  { %v5903_v7 = vrot.slane %v5902_v41, 2 }
 0x3dd   :  { %v5897_v9 = vmax.f32 %v5895_v4, %v5896_v6 }
 0x3de   :  { %v5904_v11 = vmax.f32 %v5902_v41, %v5903_v7 }
 0x3df   :  { %v5898_v58 = vrot.slane %v5897_v9, 1 }
 0x3e0   :  { %v5905_v12 = vrot.slane %v5904_v11, 1 }
 0x3e1   :  { %v5899_v14 = vmax.f32 %v5897_v9, %v5898_v58 }
 0x3e2   :  { %v5906_v16 = vmax.f32 %v5904_v11, %v5905_v12 }
 0x3e3   :  { %v10599_v17 = vsel %vm4876_vm0, %v5710_v13, %v5899_v14 }
 0x3e4   :  { %v10602_v18 = vsel %vm4876_vm0, %v5717_v15, %v5906_v16  ;;  %vm6099_vm0 = vcmask 220160  }
 0x460   :  { %v8228_v24 = vpop.f32.mrb[4].mxu0 }
 0x461   :  { %v5649_v25 = vadd.f32 %v8228_v24, %v8051_v22  ;;  %v5643_v26 = vpop.f32.mrb[5].mxu0 }
 0x462   :  { %v5644_v27 = vadd.f32 %v8051_v22, %v5643_v26 }
 0x463   :  { %v5719_v28 = vsel %vm5560_vm8, %v5649_v25, -inf }
 0x464   :  { %v5718_v34 = vsel %vm5560_vm8, %v5644_v27, -inf }
 0x465   :  { %v5720_v35 = vmax.f32 %v5718_v34, %v5719_v28 }
 0x467   :  { %v5721_v29 = vrot.slane %v5720_v35, 4 }
 0x468   :  { %v8231_v30 = vpop.f32.mrb[6].mxu0 }
 0x469   :  { %v5722_v32 = vmax.f32 %v5720_v35, %v5721_v29  ;;  %v5659_v37 = vadd.f32 %v8231_v30, %v8051_v22  ;;  %v5653_v40 = vpop.f32.mrb[7].mxu0 }
 0x46a   :  { %v5654_v43 = vadd.f32 %v8051_v22, %v5653_v40 }
 0x46b   :  { %v5723_v44 = vrot.slane %v5722_v32, 2  ;;  %v5908_v45 = vsel %vm5560_vm8, %v5659_v37, -inf }
 0x46c   :  { %v5907_v47 = vsel %vm5560_vm8, %v5654_v43, -inf }
 0x46d   :  { %v5724_v38 = vmax.f32 %v5722_v32, %v5723_v44  ;;  %v5909_v51 = vmax.f32 %v5907_v47, %v5908_v45  ;;  %v8393_v47 = vpack.c.bf16 %v10366_v49, %v10361_v48 }
 0x46f   :  { %v5725_v52 = vrot.slane %v5724_v38, 1  ;;  %v5910_v54 = vrot.slane %v5909_v51, 4 }
 0x471   :  { %v5726_v57 = vmax.f32 %v5724_v38, %v5725_v52  ;;  %v5911_v61 = vmax.f32 %v5909_v51, %v5910_v54 }
 0x473   :  { %v5727_v31 = vsub.f32 %v5644_v27, %v5726_v57  ;;  %v5728_v62 = vsub.f32 %v5649_v25, %v5726_v57  ;;  %v5912_v63 = vrot.slane %v5911_v61, 2 }
 0x475   :  { %v5729_v0 = vmul.f32 1.442695, %v5727_v31  ;;  %v5731_v1 = vmul.f32 1.442695, %v5728_v62  ;;  %v5913_v50 = vmax.f32 %v5911_v61, %v5912_v63  ;;  %v6138_v63 = vld [vmem:[%s11265_s21] sm:$0xff] }
 0x477   :  { %8486 = vpow2.f32 %v5729_v0  ;;  %v5914_v2 = vrot.slane %v5913_v50, 1  ;;  %v6139_v0 = vld [vmem:[%s11265_s21 + $0x8] sm:$0xff] }
 0x478   :  { %8488 = vpow2.f32 %v5731_v1  ;;  %v8396_v1 = vpack.c.bf16 %v6139_v0, %v6138_v63  ;;  %v6228_v0 = vld [vmem:[%s11266_s22] sm:$0xff] }
 0x479   :  { %v5915_v3 = vmax.f32 %v5913_v50, %v5914_v2  ;;  %v6140_v50 = vld [vmem:[%s11265_s21 + $0x10] sm:$0xff]  ;;  %v6141_v2 = vld [vmem:[%s11265_s21 + $0x18] sm:$0xff] }
 0x47a   :  { %8397 = vmatpush3.bf16.msra.mxu1 %v8396_v1  ;;  %v6229_v1 = vld [vmem:[%s11266_s22 + $0x8] sm:$0xf] }
 0x47b   :  { %v5916_v4 = vsub.f32 %v5654_v43, %v5915_v3  ;;  %v5917_v5 = vsub.f32 %v5659_v37, %v5915_v3  ;;  %8398 = vmatprep.subr.bf16.mxu1 %v8526_v21 }
 0x47d   :  { %v5918_v41 = vmul.f32 1.442695, %v5916_v4  ;;  %v5920_v6 = vmul.f32 1.442695, %v5917_v5  ;;  %v8399_v4 = vpack.c.bf16 %v6141_v2, %v6140_v50  ;;  %v8402_v50 = vpack.c.bf16 %v6229_v1, %v6228_v0 }
 0x47e   :  { %v6322_v1 = vadd.s32 80, %v10541_v55 }
 0x47f   :  { %8490 = vpow2.f32 %v5918_v41  ;;  %8400 = vmatpush3.bf16.msra.mxu1 %v8399_v4  ;;  %v6142_v41 = vld [vmem:[%s11265_s21 + $0x20] sm:$0xf] }
 0x480   :  { %8492 = vpow2.f32 %v5920_v6  ;;  %8254 = vmatprep.subr.mxu1 %v8525_v33 }
 0x481   :  { %v8487_v7 = vpop.eup %8486 }
 0x482   :  { %v8489_v8 = vpop.eup %8488  ;;  %v5733_v9 = vsel %vm5560_vm8, %v8487_v7, 0.0 }
 0x483   :  { %v5734_v10 = vsel %vm5560_vm8, %v8489_v8, 0.0  ;;  %8255 = vmatpush3.msk.msra.mxu1 %vm5573_vm6, %v6142_v41 }
 0x484   :  { %v5735_v11 = vadd.f32 %v5734_v10, %v5733_v9  ;;  %8266 = vmatprep.subr.mxu1 %v8525_v33 }
 0x486   :  { %v5736_v58 = vrot.slane %v5735_v11, 4 }
 0x488   :  { %v5737_v12 = vadd.f32 %v5736_v58, %v5735_v11 }
 0x489   :  { %v8491_v13 = vpop.eup %8490 }
 0x48a   :  { %v8493_v14 = vpop.eup %8492  ;;  %v5922_v15 = vsel %vm5560_vm8, %v8491_v13, 0.0  ;;  %v5738_v16 = vrot.slane %v5737_v12, 2 }
 0x48b   :  { %v5923_v20 = vsel %vm5560_vm8, %v8493_v14, 0.0 }
 0x48c   :  { %v5924_v22 = vadd.f32 %v5923_v20, %v5922_v15  ;;  %v5739_v24 = vadd.f32 %v5738_v16, %v5737_v12 }
 0x48e   :  { %v5925_v25 = vrot.slane %v5924_v22, 4  ;;  %v5740_v26 = vrot.slane %v5739_v24, 1 }
 0x490   :  { %v5741_v27 = vadd.f32 %v5740_v26, %v5739_v24  ;;  %v5926_v28 = vadd.f32 %v5925_v25, %v5924_v22 }
 0x492   :  { %8494 = vrcp.f32 %v5741_v27  ;;  %v5927_v34 = vrot.slane %v5926_v28, 2 }
 0x494   :  { %v5928_v35 = vadd.f32 %v5927_v34, %v5926_v28 }
 0x496   :  { %v5929_v29 = vrot.slane %v5928_v35, 1 }
 0x498   :  { %v5930_v30 = vadd.f32 %v5929_v29, %v5928_v35 }
 0x49a   :  { %8496 = vrcp.f32 %v5930_v30 }
 0x49c   :  { %v8495_v32 = vpop.eup %8494 }
 0x49d   :  { %v5743_v37 = vmul.f32 %v8495_v32, %v8487_v7  ;;  %v5744_v40 = vmul.f32 %v8495_v32, %v8489_v8 }
 0x49f   :  { %5745 = vxpose.xlu0.b32.start [1/2] (short) (narrow) %v5743_v37, 8  ;;  %6039 = vst.msk [vmem:[%s11268_s24] sm:$0xff] %vm5560_vm8, %v5743_v37  ;;  %6040 = vst.msk [vmem:[%s11268_s24 + $0x8] sm:$0xff] %vm5560_vm8, %v5744_v40 }
 0x4a3   :  { %5746 = vxpose.xlu0.b32.end [2/2] (short) (narrow) %v5744_v40, 8 }
 0x4a4   :  { %v8497_v43 = vpop.eup %8496 }
 0x4a5   :  { %v5932_v44 = vmul.f32 %v8497_v43, %v8491_v13  ;;  %v5933_v45 = vmul.f32 %v8497_v43, %v8493_v14 }
 0x4a7   :  { %5934 = vxpose.xlu1.b32.start [1/2] (short) (narrow) %v5932_v44, 8  ;;  %6041 = vst.msk [vmem:[%s11268_s24 + $0x10] sm:$0xff] %vm5560_vm8, %v5932_v44  ;;  %6042 = vst.msk [vmem:[%s11268_s24 + $0x18] sm:$0xff] %vm5560_vm8, %v5933_v45  ;;  %s8528_s24 = smov 12  }
 0x4ab   :  { %5935 = vxpose.xlu1.b32.end [2/2] (short) (narrow) %v5933_v45, 8 }
 0x51f   :  { %v5761_v38 = vpop.trf.xlu0 }
 0x520   :  { %8237 = vmatmul.mubr.msk.f32.vlgmr.msra.gmra.mrb[8].mxu0 %vm5777_vm10, %v5761_v38 }
 0x521   :  { %8394 = vmatpush3.bf16.msra.mxu0 %v8393_v47  ;;  %8243 = vmatprep.mubr.msk.f32.mxu0 %vm8527_vm9, %v8525_v33 }
 0x522   :  { %8401 = vmatprep.subr.bf16.mxu0 %v8526_v21 }
 0x527   :  { %v5950_v51 = vpop.trf.xlu1 }
 0x528   :  { %8244 = vmatmul.mubr.msk.f32.vlgmr.msra.gmra.mrb[10].mxu0 %vm5777_vm10, %v5950_v51 }
 0x529   :  { %8263 = vmatprep.mubr.msk.f32.mxu0 %vm8527_vm9, %v8525_v33  ;;  %8404 = vmatpush3.bf16.msk.msra.mxu0 %vm8403_vm7, %v8402_v50 }
 0x5f3   :  { %v5847_v52 = vpop.f32.mrb[8].mxu0 }
 0x5f4   :  { %6105 = vrot.lane.b32.xlu1 %v5847_v52, %s8523_s29  ;;  %v8238_v54 = vpop.f32.mrb[9].mxu0  ;;  %v6052_v57 = vrot.slane %v5847_v52, 1  ;;  %v6066_v61 = vrot.slane %v5847_v52, 2 }
 0x5f6   :  { %6060 = vrot.lane.b32.xlu0 %v6052_v57, %s8528_s24 }
 0x5f8   :  { %6111 = vrot.lane.b32.xlu1 %v5847_v52, %s8529_s30 }
 0x5fa   :  { %6117 = vrot.lane.b32.xlu0 %v6052_v57, %s8530_s7 }
 0x5fb   :  { %v6035_v48 = vpop.f32.mrb[10].mxu0 }
 0x5fc   :  { %v6044_v49 = vrot.slane %v6035_v48, 4  ;;  %6053 = vrot.lane.b32.xlu1 %v6052_v57, %s8523_s29  ;;  %v8245_v31 = vpop.f32.mrb[11].mxu0  ;;  %v6056_v3 = vrot.slane %v6035_v48, 1  ;;  %v6070_v5 = vrot.slane %v6035_v48, 2 }
 0x5fe   :  { %v6046_v62 = vsel %vm5573_vm6, %v5847_v52, %v6044_v49  ;;  %6080 = vrot.lane.b32.xlu0 %v6066_v61, %s8531_s5 }
 0x5ff   :  { %6047 = vst.msk [vmem:[%s11269_s25] sm:$0xff] %vm4844_vm3, %v6046_v62 }
 0x600   :  { %6067 = vrot.lane.b32.xlu1 %v6066_v61, %s8529_s30 }
 0x602   :  { %6048 = vrot.lane.b32.xlu0 %v6035_v48, %s8522_s4  ;;  %s8532_s4 = smov 9  }
 0x604   :  { %6074 = vrot.lane.b32.xlu1 %v6066_v61, %s8530_s7  ;;  %s8536_s7 = smov 33  }
 0x606   :  { %6108 = vrot.lane.b32.xlu0 %v6035_v48, %s8532_s4 }
 0x608   :  { %6057 = vrot.lane.b32.xlu1 %v6056_v3, %s8532_s4 }
 0x60a   :  { %6114 = vrot.lane.b32.xlu0 %v6035_v48, %s8533_s2 }
 0x60c   :  { %6071 = vrot.lane.b32.xlu1 %v6070_v5, %s8533_s2 }
 0x60e   :  { %6063 = vrot.lane.b32.xlu0 %v6056_v3, %s8534_s9 }
 0x610   :  { %6077 = vrot.lane.b32.xlu1 %v6070_v5, %s8535_s13 }
 0x612   :  { %6120 = vrot.lane.b32.xlu0 %v6056_v3, %s8535_s13 }
 0x616   :  { %6083 = vrot.lane.b32.xlu0 %v6070_v5, %s8536_s7 }
 0x666   :  { %v6106_v21 = vpop.permute.xlu1 %6105 }
 0x668   :  { %v6061_v6 = vpop.permute.xlu0 %6060 }
 0x66a   :  { %v6112_v7 = vpop.permute.xlu1 %6111 }
 0x66c   :  { %v6118_v8 = vpop.permute.xlu0 %6117 }
 0x66e   :  { %v6054_v9 = vpop.permute.xlu1 %6053 }
 0x670   :  { %v6081_v10 = vpop.permute.xlu0 %6080 }
 0x672   :  { %v6068_v11 = vpop.permute.xlu1 %6067 }
 0x674   :  { %v6049_v58 = vpop.permute.xlu0 %6048 }
 0x675   :  { %v6086_v14 = vsel %vm4844_vm3, %v5847_v52, %v6049_v58  ;;  %vm6103_vm3 = vcmask 269312  }
 0x676   :  { %v6075_v12 = vpop.permute.xlu1 %6074  ;;  %v6123_v16 = vsel %vm4849_vm4, %v6086_v14, %v6106_v21  ;;  %v6087_v20 = vsel %vm4849_vm4, %v6086_v14, %v6054_v9 }
 0x678   :  { %v6109_v13 = vpop.permute.xlu0 %6108 }
 0x679   :  { %v6124_v24 = vsel %vm4863_vm5, %v6123_v16, %v6109_v13  ;;  %v6337_v16 = vcvt.s32.f32 %v10541_v55 }
 0x67a   :  { %v6058_v15 = vpop.permute.xlu1 %6057  ;;  %v6125_v27 = vsel %vm6089_vm11, %v6124_v24, %v6061_v6 }
 0x67b   :  { %v6088_v25 = vsel %vm4863_vm5, %v6087_v20, %v6058_v15  ;;  %vm6145_vm5 = vcmask 293888   ;;  %v6313_v20 = vadd.s32 8, %v10541_v55 }
 0x67c   :  { %v6115_v22 = vpop.permute.xlu0 %6114  ;;  %v6090_v34 = vsel %vm6089_vm11, %v6088_v25, %v6061_v6 }
 0x67d   :  { %v6338_v25 = vcvt.s32.f32 %v6313_v20  ;;  %v6328_v20 = vadd.s32 128, %v10541_v55 }
 0x67e   :  { %v6072_v26 = vpop.permute.xlu1 %6071 }
 0x680   :  { %v6064_v28 = vpop.permute.xlu0 %6063 }
 0x681   :  { %v6092_v35 = vsel %vm6091_vm12, %v6090_v34, %v6064_v28  ;;  %v6126_v29 = vsel %vm6091_vm12, %v6125_v27, %v6064_v28  ;;  %v6315_v34 = vadd.s32 24, %v10541_v55 }
 0x682   :  { %v6094_v30 = vsel %vm6093_vm13, %v6092_v35, %v6068_v11  ;;  %v6127_v32 = vsel %vm6093_vm13, %v6126_v29, %v6112_v7  ;;  %v6078_v38 = vpop.permute.xlu1 %6077 }
 0x683   :  { %v6096_v37 = vsel %vm6095_vm14, %v6094_v30, %v6072_v26  ;;  %v6128_v40 = vsel %vm6095_vm14, %v6127_v32, %v6115_v22  ;;  %v6314_v26 = vadd.s32 16, %v10541_v55  ;;  %v6340_v29 = vcvt.s32.f32 %v6315_v34 }
 0x684   :  { %v6098_v43 = vsel %vm6097_vm15, %v6096_v37, %v6075_v12  ;;  %v6129_v44 = vsel %vm6097_vm15, %v6128_v40, %v6118_v8  ;;  %v6121_v45 = vpop.permute.xlu0 %6120  ;;  %v6393_v8 = vld [vmem:[%s11264_s20] sm:$0x3f]  ;;  %v6316_v30 = vadd.s32 32, %v10541_v55  ;;  %v6317_v40 = vadd.s32 40, %v10541_v55 }
 0x685   :  { %v6130_v47 = vsel %vm6099_vm0, %v6129_v44, %v6121_v45  ;;  %v6100_v51 = vsel %vm6099_vm0, %v6098_v43, %v6078_v38  ;;  %v6339_v28 = vcvt.s32.f32 %v6314_v26  ;;  %v6318_v45 = vadd.s32 48, %v10541_v55 }
 0x686   :  { %v6131_v52 = vsel %vm6101_vm2, %v6130_v47, %v6081_v10  ;;  %v6102_v48 = vsel %vm6101_vm2, %v6100_v51, %v6081_v10  ;;  %v6341_v37 = vcvt.s32.f32 %v6316_v30  ;;  %v6342_v44 = vcvt.s32.f32 %v6317_v40 }
 0x687   :  { %v6343_v38 = vcvt.s32.f32 %v6318_v45  ;;  %v6319_v51 = vadd.s32 56, %v10541_v55  ;;  %v6329_v26 = vadd.s32 136, %v10541_v55  ;;  %v6330_v34 = vadd.s32 144, %v10541_v55 }
 0x688   :  { %v6084_v54 = vpop.permute.xlu0 %6083  ;;  %v6331_v30 = vadd.s32 152, %v10541_v55  ;;  %v6332_v40 = vadd.s32 160, %v10541_v55  ;;  %v6333_v45 = vadd.s32 168, %v10541_v55 }
 0x689   :  { %v10681_v57 = vsel %vm6103_vm3, %v6131_v52, %v6084_v54  ;;  %v6104_v61 = vsel %vm6103_vm3, %v6102_v48, %v6084_v54  ;;  %v6344_v54 = vcvt.s32.f32 %v6319_v51  ;;  %v6320_v48 = vadd.s32 64, %v10541_v55 }
 0x68a   :  { %v6134_v49 = vrot.slane %v10681_v57, 7  ;;  %v6334_v51 = vadd.s32 176, %v10541_v55 }
 0x68c   :  { %v10684_v31 = vsub.f32 %v6104_v61, %v6134_v49  ;;  %v6345_v61 = vcvt.s32.f32 %v6320_v48  ;;  %v6335_v48 = vadd.s32 184, %v10541_v55 }
 0x68e   :  { %v6137_v62 = vmul.f32 %v10684_v31, %v10684_v31 }
 0x690   :  { %v6144_v63 = vrot.slane %v6137_v62, 1  ;;  %v6321_v62 = vadd.s32 72, %v10541_v55 }
 0x692   :  { %8257 = vmatmul.mubr.msk.f32.vlgmr.msra.gmra.mrb[36].mxu1 %vm6145_vm5, %v6144_v63  ;;  %v6346_v0 = vcvt.s32.f32 %v6321_v62  ;;  %v6336_v62 = vadd.s32 192, %v10541_v55 }
 0x693   :  { %8268 = vmatprep.mubr.msk.f32.mxu1 %vm8527_vm9, %v8525_v33  ;;  %8267 = vmatpush3.msk.msra.mxu1 %vm6469_vm1, %v6393_v8 }
 0x765   :  { %v6217_v2 = vpop.f32.mrb[36].mxu1 }
 0x766   :  { %v6218_v3 = vadd.f32 0.001, %v6217_v2  ;;  %v8258_v4 = vpop.f32.mrb[37].mxu1  ;;  %v6347_v2 = vcvt.s32.f32 %v6322_v1 }
 0x768   :  { %8498 = vrsqrt.f32 %v6218_v3  ;;  %vm6223_vm8 = vcmp.eq.f32.partialorder %v6218_v3, inf  ;;  %v6226_v21 = vand.u32 2147483648, %v6218_v3  ;;  %vm6225_vm10 = vcmp.eq.f32.partialorder %v6218_v3, 0.0 }
 0x772   :  { %v8499_v5 = vpop.eup %8498 }
 0x773   :  { %v6222_v41 = vmul.f32 %v8499_v5, %v6218_v3 }
 0x775   :  { %v6224_v6 = vsel %vm6223_vm8, %v6218_v3, %v6222_v41  ;;  %v6323_v3 = vadd.s32 88, %v10541_v55  ;;  %v6324_v41 = vadd.s32 96, %v10541_v55 }
 0x776   :  { %v6227_v7 = vsel %vm6225_vm10, %v6226_v21, %v6224_v6 }
 0x777   :  { %8264 = vmatmul.mubr.msk.f32.vlgmr.msra.gmra.mrb[12].mxu0 %vm6089_vm11, %v6227_v7  ;;  %v6348_v5 = vcvt.s32.f32 %v6323_v3  ;;  %v6349_v6 = vcvt.s32.f32 %v6324_v41  ;;  %v6325_v7 = vadd.s32 104, %v10541_v55 }
 0x84a   :  { %v6302_v9 = vpop.f32.mrb[12].mxu0 }
 0x84b   :  { %v6307_v10 = vmul.f32 100.0, %v6302_v9  ;;  %v8265_v11 = vpop.f32.mrb[13].mxu0  ;;  %v6350_v9 = vcvt.s32.f32 %v6325_v7  ;;  %v6665_v7 = vld [vmem:[%s11263_s19 + $0x10] sm:$0xff] }
 0x84d   :  { %v6308_v58 = vfloor.f32 %v6307_v10  ;;  %v6326_v10 = vadd.s32 112, %v10541_v55 }
 0x84f   :  { %v10703_v12 = vmax.f32 %v6308_v58, 15.0  ;;  %v6351_v58 = vcvt.s32.f32 %v6326_v10 }
 0x851   :  { %v6310_v13 = vmin.f32 %v10703_v12, 200.0 }
 0x853   :  { %v8063_v14 = vadd.f32 -1.0, %v6310_v13 }
 0x855   :  { %v6366_v15 = vrot.slane %v8063_v14, %v10546_v56  ;;  %v6327_v14 = vadd.s32 120, %v10541_v55  ;;  %v10836_v55 = vrot.slane %v10681_v57, %v10546_v56 }
 0x857   :  { %8500 = vrcp.f32 %v6366_v15  ;;  %v6694_v10 = vadd.f32 %v10836_v55, %v6665_v7  ;;  %v6673_v7 = vld [vmem:[%s11263_s19 + $0x50] sm:$0xff] }
 0x861   :  { %v10711_v22 = vpop.eup %8500 }
 0x862   :  { %v6368_v24 = vmul.f32 %v10711_v22, %v6337_v16  ;;  %v6369_v27 = vmul.f32 %v10711_v22, %v6338_v25  ;;  %v6370_v35 = vmul.f32 %v10711_v22, %v6339_v28  ;;  %v6371_v32 = vmul.f32 %v10711_v22, %v6340_v29 }
 0x863   :  { %v6372_v43 = vmul.f32 %v10711_v22, %v6341_v37  ;;  %v6373_v47 = vmul.f32 %v10711_v22, %v6342_v44  ;;  %v6374_v52 = vmul.f32 %v10711_v22, %v6343_v38  ;;  %v6375_v49 = vmul.f32 %v10711_v22, %v6344_v54 }
 0x864   :  { %8269 = vmatmul.mubr.msk.f32.vlgmr.msra.gmra.mrb[38].mxu1 %vm4849_vm4, %v6368_v24  ;;  %v6376_v63 = vmul.f32 %v10711_v22, %v6345_v61  ;;  %v6377_v50 = vmul.f32 %v10711_v22, %v6346_v0  ;;  %v6378_v4 = vmul.f32 %v10711_v22, %v6347_v2  ;;  %v6379_v21 = vmul.f32 %v10711_v22, %v6348_v5  ;;  %v6664_v5 = vld [vmem:[%s11263_s19 + $0x8] sm:$0xff] }
 0x865   :  { %8271 = vmatprep.mubr.msk.f32.mxu1 %vm8527_vm9, %v8525_v33  ;;  %v6380_v8 = vmul.f32 %v10711_v22, %v6349_v6  ;;  %v6381_v11 = vmul.f32 %v10711_v22, %v6350_v9  ;;  %v6382_v15 = vmul.f32 %v10711_v22, %v6351_v58  ;;  %v6352_v16 = vcvt.s32.f32 %v6327_v14  ;;  %v6666_v14 = vld [vmem:[%s11263_s19 + $0x18] sm:$0xff] }
 0x866   :  { %v6353_v25 = vcvt.s32.f32 %v6328_v20  ;;  %v6354_v28 = vcvt.s32.f32 %v6329_v26  ;;  %v6355_v29 = vcvt.s32.f32 %v6330_v34  ;;  %v6356_v37 = vcvt.s32.f32 %v6331_v30  ;;  %v6667_v26 = vld [vmem:[%s11263_s19 + $0x20] sm:$0xff]  ;;  %v6668_v30 = vld [vmem:[%s11263_s19 + $0x28] sm:$0xff] }
 0x867   :  { %v6383_v24 = vmul.f32 %v10711_v22, %v6352_v16  ;;  %v6357_v44 = vcvt.s32.f32 %v6332_v40  ;;  %v6358_v38 = vcvt.s32.f32 %v6333_v45  ;;  %v6359_v54 = vcvt.s32.f32 %v6334_v51  ;;  %v6669_v45 = vld [vmem:[%s11263_s19 + $0x30] sm:$0xff] }
 0x868   :  { %8272 = vmatmul.mubr.msk.f32.gmra.mrb[40].mxu1 %vm4849_vm4, %v6369_v27  ;;  %v6384_v27 = vmul.f32 %v10711_v22, %v6353_v25  ;;  %v6360_v61 = vcvt.s32.f32 %v6335_v48  ;;  %v6361_v0 = vcvt.s32.f32 %v6336_v62  ;;  %v10843_v2 = vrot.slane %v10684_v31, %v10554_v59  ;;  %v6670_v48 = vld [vmem:[%s11263_s19 + $0x38] sm:$0xff] }
 0x869   :  { %8274 = vmatprep.mubr.msk.f32.mxu1 %vm8527_vm9, %v8525_v33  ;;  %v6693_v31 = vadd.f32 %v10836_v55, %v6664_v5  ;;  %v6695_v20 = vadd.f32 %v10836_v55, %v6666_v14  ;;  %v6696_v34 = vadd.f32 %v10836_v55, %v6667_v26  ;;  %v6697_v40 = vadd.f32 %v10836_v55, %v6668_v30  ;;  %v6672_v5 = vld [vmem:[%s11263_s19 + $0x48] sm:$0xff]  ;;  %v6674_v14 = vld [vmem:[%s11263_s19 + $0x58] sm:$0xff]  ;;  %v6675_v26 = vld [vmem:[%s11263_s19 + $0x60] sm:$0xff] }
 0x86a   :  { %v6392_v1 = vmul.f32 %v10711_v22, %v6361_v0  ;;  %v6698_v51 = vadd.f32 %v10836_v55, %v6669_v45  ;;  %v6699_v62 = vadd.f32 %v10836_v55, %v6670_v48  ;;  %v6676_v30 = vld [vmem:[%s11263_s19 + $0x68] sm:$0xff]  ;;  %v6677_v45 = vld [vmem:[%s11263_s19 + $0x70] sm:$0xff]  ;;  %v6678_v48 = vld [vmem:[%s11263_s19 + $0x78] sm:$0xff] }
 0x86c   :  { %8275 = vmatmul.mubr.msk.f32.gmra.mrb[42].mxu1 %vm4849_vm4, %v6370_v35  ;;  %v6385_v35 = vmul.f32 %v10711_v22, %v6354_v28 }
 0x86d   :  { %8277 = vmatprep.mubr.msk.f32.mxu1 %vm8527_vm9, %v8525_v33 }
 0x870   :  { %8278 = vmatmul.mubr.msk.f32.gmra.mrb[44].mxu1 %vm4849_vm4, %v6371_v32  ;;  %v6386_v32 = vmul.f32 %v10711_v22, %v6355_v29 }
 0x871   :  { %8280 = vmatprep.mubr.msk.f32.mxu1 %vm8527_vm9, %v8525_v33 }
 0x874   :  { %8281 = vmatmul.mubr.msk.f32.gmra.mrb[46].mxu1 %vm4849_vm4, %v6372_v43  ;;  %v6387_v43 = vmul.f32 %v10711_v22, %v6356_v37 }
 0x875   :  { %8283 = vmatprep.mubr.msk.f32.mxu1 %vm8527_vm9, %v8525_v33 }
 0x878   :  { %8284 = vmatmul.mubr.msk.f32.gmra.mrb[48].mxu1 %vm4849_vm4, %v6373_v47  ;;  %v6388_v47 = vmul.f32 %v10711_v22, %v6357_v44 }
 0x879   :  { %8286 = vmatprep.mubr.msk.f32.mxu1 %vm8527_vm9, %v8525_v33 }
 0x87c   :  { %8287 = vmatmul.mubr.msk.f32.gmra.mrb[50].mxu1 %vm4849_vm4, %v6374_v52  ;;  %v6389_v52 = vmul.f32 %v10711_v22, %v6358_v38 }
 0x87d   :  { %8289 = vmatprep.mubr.msk.f32.mxu1 %vm8527_vm9, %v8525_v33 }
 0x880   :  { %8290 = vmatmul.mubr.msk.f32.gmra.mrb[52].mxu1 %vm4849_vm4, %v6375_v49  ;;  %v6390_v49 = vmul.f32 %v10711_v22, %v6359_v54 }
 0x881   :  { %8292 = vmatprep.mubr.msk.f32.mxu1 %vm8527_vm9, %v8525_v33 }
 0x884   :  { %8293 = vmatmul.mubr.msk.f32.gmra.mrb[54].mxu1 %vm4849_vm4, %v6376_v63  ;;  %v6391_v63 = vmul.f32 %v10711_v22, %v6360_v61 }
 0x885   :  { %8295 = vmatprep.mubr.msk.f32.mxu1 %vm8527_vm9, %v8525_v33 }
 0x888   :  { %8296 = vmatmul.mubr.msk.f32.gmra.mrb[56].mxu1 %vm4849_vm4, %v6377_v50  ;;  %v6663_v50 = vld [vmem:[%s11263_s19] sm:$0xff] }
 0x889   :  { %8298 = vmatprep.mubr.msk.f32.mxu1 %vm8527_vm9, %v8525_v33 }
 0x88c   :  { %8299 = vmatmul.mubr.msk.f32.gmra.mrb[58].mxu1 %vm4849_vm4, %v6378_v4  ;;  %v6692_v4 = vadd.f32 %v10836_v55, %v6663_v50 }
 0x88d   :  { %8301 = vmatprep.mubr.msk.f32.mxu1 %vm8527_vm9, %v8525_v33 }
 0x890   :  { %8302 = vmatmul.mubr.msk.f32.gmra.mrb[60].mxu1 %vm4849_vm4, %v6379_v21 }
 0x891   :  { %8304 = vmatprep.mubr.msk.f32.mxu1 %vm8527_vm9, %v8525_v33 }
 0x894   :  { %8305 = vmatmul.mubr.msk.f32.gmra.mrb[62].mxu1 %vm4849_vm4, %v6380_v8 }
 0x895   :  { %8307 = vmatprep.mubr.msk.f32.mxu1 %vm8527_vm9, %v8525_v33 }
 0x898   :  { %8308 = vmatmul.mubr.msk.f32.gmra.mrb[64].mxu1 %vm4849_vm4, %v6381_v11 }
 0x899   :  { %8310 = vmatprep.mubr.msk.f32.mxu1 %vm8527_vm9, %v8525_v33 }
 0x89c   :  { %8311 = vmatmul.mubr.msk.f32.gmra.mrb[66].mxu1 %vm4849_vm4, %v6382_v15 }
 0x89d   :  { %8313 = vmatprep.mubr.msk.f32.mxu1 %vm8527_vm9, %v8525_v33 }
 0x8a0   :  { %8314 = vmatmul.mubr.msk.f32.gmra.mrb[68].mxu1 %vm4849_vm4, %v6383_v24 }
 0x8a1   :  { %8316 = vmatprep.mubr.msk.f32.mxu1 %vm8527_vm9, %v8525_v33 }
 0x8a4   :  { %8317 = vmatmul.mubr.msk.f32.gmra.mrb[70].mxu1 %vm4849_vm4, %v6384_v27 }
 0x8a5   :  { %8319 = vmatprep.mubr.msk.f32.mxu1 %vm8527_vm9, %v8525_v33 }
 0x8a8   :  { %8320 = vmatmul.mubr.msk.f32.gmra.mrb[72].mxu1 %vm4849_vm4, %v6385_v35 }
 0x8a9   :  { %8322 = vmatprep.mubr.msk.f32.mxu1 %vm8527_vm9, %v8525_v33 }
 0x8ac   :  { %8323 = vmatmul.mubr.msk.f32.gmra.mrb[74].mxu1 %vm4849_vm4, %v6386_v32 }
 0x8ad   :  { %8325 = vmatprep.mubr.msk.f32.mxu1 %vm8527_vm9, %v8525_v33 }
 0x8b0   :  { %8326 = vmatmul.mubr.msk.f32.gmra.mrb[76].mxu1 %vm4849_vm4, %v6387_v43 }
 0x8b1   :  { %8328 = vmatprep.mubr.msk.f32.mxu1 %vm8527_vm9, %v8525_v33 }
 0x8b4   :  { %8329 = vmatmul.mubr.msk.f32.gmra.mrb[78].mxu1 %vm4849_vm4, %v6388_v47 }
 0x8b5   :  { %8331 = vmatprep.mubr.msk.f32.mxu1 %vm8527_vm9, %v8525_v33 }
 0x8b8   :  { %8332 = vmatmul.mubr.msk.f32.gmra.mrb[80].mxu1 %vm4849_vm4, %v6389_v52 }
 0x8b9   :  { %8334 = vmatprep.mubr.msk.f32.mxu1 %vm8527_vm9, %v8525_v33 }
 0x8bc   :  { %8335 = vmatmul.mubr.msk.f32.gmra.mrb[82].mxu1 %vm4849_vm4, %v6390_v49 }
 0x8bd   :  { %8337 = vmatprep.mubr.msk.f32.mxu1 %vm8527_vm9, %v8525_v33 }
 0x8c0   :  { %8338 = vmatmul.mubr.msk.f32.gmra.mrb[84].mxu1 %vm4849_vm4, %v6391_v63 }
 0x8c1   :  { %8340 = vmatprep.mubr.msk.f32.mxu1 %vm8527_vm9, %v8525_v33 }
 0x8c4   :  { %8341 = vmatmul.mubr.msk.f32.gmra.mrb[86].mxu1 %vm4849_vm4, %v6392_v1  ;;  %v6671_v1 = vld [vmem:[%s11263_s19 + $0x40] sm:$0xff] }
 0x937   :  { %v6539_v3 = vpop.f32.mrb[38].mxu1 }
 0x938   :  { %v6721_v33 = vmul.f32 %v10843_v2, %v6539_v3  ;;  %v8270_v22 = vpop.f32.mrb[39].mxu1 }
 0x93a   :  { %v6746_v57 = vadd.f32 %v6721_v33, %v6692_v4  ;;  %v6700_v4 = vadd.f32 %v10836_v55, %v6671_v1  ;;  %v6679_v1 = vld [vmem:[%s11263_s19 + $0x80] sm:$0xff] }
 0x93b   :  { %v6544_v41 = vpop.f32.mrb[40].mxu1 }
 0x93c   :  { %6771 = vst.msk [vmem:[%s11267_s23] sm:$0xff] %vm6145_vm5, %v6746_v57  ;;  %v6722_v21 = vmul.f32 %v10843_v2, %v6544_v41  ;;  %v8273_v6 = vpop.f32.mrb[41].mxu1 }
 0x93e   :  { %v6747_v8 = vadd.f32 %v6722_v21, %v6693_v31  ;;  %v6701_v31 = vadd.f32 %v10836_v55, %v6672_v5  ;;  %v6680_v5 = vld [vmem:[%s11263_s19 + $0x88] sm:$0xff] }
 0x93f   :  { %v6549_v9 = vpop.f32.mrb[42].mxu1 }
 0x940   :  { %6772 = vst.msk [vmem:[%s11267_s23 + $0x8] sm:$0xff] %vm6145_vm5, %v6747_v8  ;;  %v6723_v11 = vmul.f32 %v10843_v2, %v6549_v9  ;;  %v8276_v58 = vpop.f32.mrb[43].mxu1 }
 0x942   :  { %v6748_v15 = vadd.f32 %v6723_v11, %v6694_v10  ;;  %v6702_v10 = vadd.f32 %v10836_v55, %v6673_v7  ;;  %v6681_v7 = vld [vmem:[%s11263_s19 + $0x90] sm:$0xff] }
 0x943   :  { %v6554_v16 = vpop.f32.mrb[44].mxu1 }
 0x944   :  { %6773 = vst.msk [vmem:[%s11267_s23 + $0x10] sm:$0xff] %vm6145_vm5, %v6748_v15  ;;  %v6724_v24 = vmul.f32 %v10843_v2, %v6554_v16  ;;  %v8279_v25 = vpop.f32.mrb[45].mxu1 }
 0x946   :  { %v6749_v27 = vadd.f32 %v6724_v24, %v6695_v20  ;;  %v6703_v20 = vadd.f32 %v10836_v55, %v6674_v14  ;;  %v6682_v14 = vld [vmem:[%s11263_s19 + $0x98] sm:$0xff] }
 0x947   :  { %v6559_v28 = vpop.f32.mrb[46].mxu1 }
 0x948   :  { %6774 = vst.msk [vmem:[%s11267_s23 + $0x18] sm:$0xff] %vm6145_vm5, %v6749_v27  ;;  %v6725_v35 = vmul.f32 %v10843_v2, %v6559_v28  ;;  %v8282_v29 = vpop.f32.mrb[47].mxu1 }
 0x94a   :  { %v6750_v32 = vadd.f32 %v6725_v35, %v6696_v34  ;;  %v6704_v34 = vadd.f32 %v10836_v55, %v6675_v26  ;;  %v6683_v26 = vld [vmem:[%s11263_s19 + $0xa0] sm:$0xff] }
 0x94b   :  { %v6564_v37 = vpop.f32.mrb[48].mxu1 }
 0x94c   :  { %6775 = vst.msk [vmem:[%s11267_s23 + $0x20] sm:$0xff] %vm6145_vm5, %v6750_v32  ;;  %v6726_v43 = vmul.f32 %v10843_v2, %v6564_v37  ;;  %v8285_v44 = vpop.f32.mrb[49].mxu1 }
 0x94e   :  { %v6751_v47 = vadd.f32 %v6726_v43, %v6697_v40  ;;  %v6705_v40 = vadd.f32 %v10836_v55, %v6676_v30  ;;  %v6684_v30 = vld [vmem:[%s11263_s19 + $0xa8] sm:$0xff] }
 0x94f   :  { %v6569_v38 = vpop.f32.mrb[50].mxu1 }
 0x950   :  { %6776 = vst.msk [vmem:[%s11267_s23 + $0x28] sm:$0xff] %vm6145_vm5, %v6751_v47  ;;  %v6727_v52 = vmul.f32 %v10843_v2, %v6569_v38  ;;  %v8288_v54 = vpop.f32.mrb[51].mxu1 }
 0x952   :  { %v6752_v49 = vadd.f32 %v6727_v52, %v6698_v51  ;;  %v6706_v51 = vadd.f32 %v10836_v55, %v6677_v45  ;;  %v6685_v45 = vld [vmem:[%s11263_s19 + $0xb0] sm:$0xff] }
 0x953   :  { %v6574_v61 = vpop.f32.mrb[52].mxu1 }
 0x954   :  { %6777 = vst.msk [vmem:[%s11267_s23 + $0x30] sm:$0xff] %vm6145_vm5, %v6752_v49  ;;  %v6728_v63 = vmul.f32 %v10843_v2, %v6574_v61  ;;  %v8291_v0 = vpop.f32.mrb[53].mxu1 }
 0x956   :  { %v6753_v50 = vadd.f32 %v6728_v63, %v6699_v62  ;;  %v6707_v62 = vadd.f32 %v10836_v55, %v6678_v48  ;;  %v6686_v48 = vld [vmem:[%s11263_s19 + $0xb8] sm:$0xff] }
 0x957   :  { %v6579_v3 = vpop.f32.mrb[54].mxu1 }
 0x958   :  { %6778 = vst.msk [vmem:[%s11267_s23 + $0x38] sm:$0xff] %vm6145_vm5, %v6753_v50  ;;  %v6729_v33 = vmul.f32 %v10843_v2, %v6579_v3  ;;  %v8294_v22 = vpop.f32.mrb[55].mxu1 }
 0x95a   :  { %v6754_v57 = vadd.f32 %v6729_v33, %v6700_v4  ;;  %v6708_v4 = vadd.f32 %v10836_v55, %v6679_v1  ;;  %v6687_v1 = vld [vmem:[%s11263_s19 + $0xc0] sm:$0xff] }
 0x95b   :  { %v6584_v41 = vpop.f32.mrb[56].mxu1 }
 0x95c   :  { %6779 = vst.msk [vmem:[%s11267_s23 + $0x40] sm:$0xff] %vm6145_vm5, %v6754_v57  ;;  %v6730_v21 = vmul.f32 %v10843_v2, %v6584_v41  ;;  %v8297_v6 = vpop.f32.mrb[57].mxu1 }
 0x95e   :  { %v6755_v8 = vadd.f32 %v6730_v21, %v6701_v31  ;;  %v6709_v31 = vadd.f32 %v10836_v55, %v6680_v5 }
 0x95f   :  { %v6589_v9 = vpop.f32.mrb[58].mxu1 }
 0x960   :  { %6780 = vst.msk [vmem:[%s11267_s23 + $0x48] sm:$0xff] %vm6145_vm5, %v6755_v8  ;;  %v6731_v11 = vmul.f32 %v10843_v2, %v6589_v9  ;;  %v8300_v58 = vpop.f32.mrb[59].mxu1 }
 0x962   :  { %v6756_v15 = vadd.f32 %v6731_v11, %v6702_v10  ;;  %v6710_v10 = vadd.f32 %v10836_v55, %v6681_v7 }
 0x963   :  { %v6594_v16 = vpop.f32.mrb[60].mxu1 }
 0x964   :  { %6781 = vst.msk [vmem:[%s11267_s23 + $0x50] sm:$0xff] %vm6145_vm5, %v6756_v15  ;;  %v6732_v24 = vmul.f32 %v10843_v2, %v6594_v16  ;;  %v8303_v25 = vpop.f32.mrb[61].mxu1 }
 0x966   :  { %v6757_v27 = vadd.f32 %v6732_v24, %v6703_v20  ;;  %v6711_v20 = vadd.f32 %v10836_v55, %v6682_v14 }
 0x967   :  { %v6599_v28 = vpop.f32.mrb[62].mxu1 }
 0x968   :  { %6782 = vst.msk [vmem:[%s11267_s23 + $0x58] sm:$0xff] %vm6145_vm5, %v6757_v27  ;;  %v6733_v35 = vmul.f32 %v10843_v2, %v6599_v28  ;;  %v8306_v29 = vpop.f32.mrb[63].mxu1 }
 0x96a   :  { %v6758_v32 = vadd.f32 %v6733_v35, %v6704_v34  ;;  %v6712_v34 = vadd.f32 %v10836_v55, %v6683_v26 }
 0x96b   :  { %v6604_v37 = vpop.f32.mrb[64].mxu1 }
 0x96c   :  { %6783 = vst.msk [vmem:[%s11267_s23 + $0x60] sm:$0xff] %vm6145_vm5, %v6758_v32  ;;  %v6734_v43 = vmul.f32 %v10843_v2, %v6604_v37  ;;  %v8309_v44 = vpop.f32.mrb[65].mxu1 }
 0x96e   :  { %v6759_v47 = vadd.f32 %v6734_v43, %v6705_v40  ;;  %v6713_v40 = vadd.f32 %v10836_v55, %v6684_v30 }
 0x96f   :  { %v6609_v38 = vpop.f32.mrb[66].mxu1 }
 0x970   :  { %6784 = vst.msk [vmem:[%s11267_s23 + $0x68] sm:$0xff] %vm6145_vm5, %v6759_v47  ;;  %v6735_v52 = vmul.f32 %v10843_v2, %v6609_v38  ;;  %v8312_v54 = vpop.f32.mrb[67].mxu1 }
 0x972   :  { %v6760_v49 = vadd.f32 %v6735_v52, %v6706_v51  ;;  %v6714_v51 = vadd.f32 %v10836_v55, %v6685_v45 }
 0x973   :  { %v6614_v61 = vpop.f32.mrb[68].mxu1 }
 0x974   :  { %6785 = vst.msk [vmem:[%s11267_s23 + $0x70] sm:$0xff] %vm6145_vm5, %v6760_v49  ;;  %v6736_v63 = vmul.f32 %v10843_v2, %v6614_v61  ;;  %v8315_v0 = vpop.f32.mrb[69].mxu1 }
 0x976   :  { %v6761_v50 = vadd.f32 %v6736_v63, %v6707_v62  ;;  %v6715_v62 = vadd.f32 %v10836_v55, %v6686_v48 }
 0x977   :  { %v6619_v3 = vpop.f32.mrb[70].mxu1 }
 0x978   :  { %6786 = vst.msk [vmem:[%s11267_s23 + $0x78] sm:$0xff] %vm6145_vm5, %v6761_v50  ;;  %v6737_v33 = vmul.f32 %v10843_v2, %v6619_v3  ;;  %v8318_v22 = vpop.f32.mrb[71].mxu1 }
 0x97a   :  { %v6762_v57 = vadd.f32 %v6737_v33, %v6708_v4  ;;  %v6716_v4 = vadd.f32 %v10836_v55, %v6687_v1 }
 0x97b   :  { %v6624_v41 = vpop.f32.mrb[72].mxu1 }
 0x97c   :  { %6787 = vst.msk [vmem:[%s11267_s23 + $0x80] sm:$0xff] %vm6145_vm5, %v6762_v57  ;;  %v6738_v21 = vmul.f32 %v10843_v2, %v6624_v41  ;;  %v8321_v6 = vpop.f32.mrb[73].mxu1 }
 0x97e   :  { %v6763_v8 = vadd.f32 %v6738_v21, %v6709_v31 }
 0x97f   :  { %v6629_v9 = vpop.f32.mrb[74].mxu1 }
 0x980   :  { %6788 = vst.msk [vmem:[%s11267_s23 + $0x88] sm:$0xff] %vm6145_vm5, %v6763_v8  ;;  %v6739_v11 = vmul.f32 %v10843_v2, %v6629_v9  ;;  %v8324_v58 = vpop.f32.mrb[75].mxu1 }
 0x982   :  { %v6764_v15 = vadd.f32 %v6739_v11, %v6710_v10 }
 0x983   :  { %v6634_v16 = vpop.f32.mrb[76].mxu1 }
 0x984   :  { %6789 = vst.msk [vmem:[%s11267_s23 + $0x90] sm:$0xff] %vm6145_vm5, %v6764_v15  ;;  %v6740_v24 = vmul.f32 %v10843_v2, %v6634_v16  ;;  %v8327_v25 = vpop.f32.mrb[77].mxu1 }
 0x986   :  { %v6765_v27 = vadd.f32 %v6740_v24, %v6711_v20 }
 0x987   :  { %v6639_v28 = vpop.f32.mrb[78].mxu1 }
 0x988   :  { %6790 = vst.msk [vmem:[%s11267_s23 + $0x98] sm:$0xff] %vm6145_vm5, %v6765_v27  ;;  %v6741_v35 = vmul.f32 %v10843_v2, %v6639_v28  ;;  %v8330_v29 = vpop.f32.mrb[79].mxu1 }
 0x98a   :  { %v6766_v32 = vadd.f32 %v6741_v35, %v6712_v34 }
 0x98b   :  { %v6644_v37 = vpop.f32.mrb[80].mxu1 }
 0x98c   :  { %6791 = vst.msk [vmem:[%s11267_s23 + $0xa0] sm:$0xff] %vm6145_vm5, %v6766_v32  ;;  %v6742_v43 = vmul.f32 %v10843_v2, %v6644_v37  ;;  %v8333_v44 = vpop.f32.mrb[81].mxu1 }
 0x98e   :  { %v6767_v47 = vadd.f32 %v6742_v43, %v6713_v40 }
 0x98f   :  { %v6649_v38 = vpop.f32.mrb[82].mxu1 }
 0x990   :  { %6792 = vst.msk [vmem:[%s11267_s23 + $0xa8] sm:$0xff] %vm6145_vm5, %v6767_v47  ;;  %v6743_v52 = vmul.f32 %v10843_v2, %v6649_v38  ;;  %v8336_v54 = vpop.f32.mrb[83].mxu1 }
 0x992   :  { %v6768_v49 = vadd.f32 %v6743_v52, %v6714_v51 }
 0x993   :  { %v6654_v61 = vpop.f32.mrb[84].mxu1 }
 0x994   :  { %6793 = vst.msk [vmem:[%s11267_s23 + $0xb0] sm:$0xff] %vm6145_vm5, %v6768_v49  ;;  %v6744_v63 = vmul.f32 %v10843_v2, %v6654_v61  ;;  %v8339_v0 = vpop.f32.mrb[85].mxu1 }
 0x996   :  { %v6769_v50 = vadd.f32 %v6744_v63, %v6715_v62 }
 0x997   :  { %v6659_v3 = vpop.f32.mrb[86].mxu1 }
 0x998   :  { %6794 = vst.msk [vmem:[%s11267_s23 + $0xb8] sm:$0xff] %vm6145_vm5, %v6769_v50  ;;  %v6745_v33 = vmul.f32 %v10843_v2, %v6659_v3  ;;  %v8342_v22 = vpop.f32.mrb[87].mxu1 }
 0x99a   :  { %v6770_v5 = vadd.f32 %v6745_v33, %v6716_v4 }
 0x99c   :  { %6795 = vst.msk [vmem:[%s11267_s23 + $0xc0] sm:$0xff] %vm6145_vm5, %v6770_v5 }
 0x99d   :  { %8518 = dma.done.wait [#allocation4], 32768 }
 0x99e   :  { %8519 = vsyncadd [#allocation4], 4294934528 }
 0x99f   :  { %8520 = dma.done.wait [#allocation4 + $0x1], 8192 }
 0x9a0   :  { %8521 = vsyncadd [#allocation4 + $0x1], 4294959104  ;;  %v7069_v57 = vpack.c.bf16 %v10579_v42, %v10579_v42  ;;  %v6813_v41 = vld [vmem:[#allocation2 + $0x8] sm:$0xff]  ;;  %v6815_v55 = vld [vmem:[#allocation2 + $0x18] sm:$0xff]  ;;  %s11299_s5 = sld [smem:[#allocation19_spill]]  ;;  %vm7426_vm4 = vcmask 1041408  }
 0x9a1   :  { %v6812_v31 = vld [vmem:[#allocation2] sm:$0xff]  ;;  %7098 = vmatprep.subr.bf16.mxu0 %v6813_v41  ;;  %7262 = vmatprep.subr.bf16.mxu1 %v6815_v55  ;;  %v6814_v2 = vld [vmem:[#allocation2 + $0x10] sm:$0xff]  ;;  %v6817_v21 = vld [vmem:[#allocation2 + $0x28] sm:$0xff]  ;;  %vm7921_vm6 = vcmask 43008  }
 0x9a2   :  { %7130 = vmatprep.mubr.bf16.mxu0 %v7069_v57  ;;  %7294 = vmatprep.mubr.bf16.mxu1 %v7069_v57  ;;  %v6819_v6 = vld [vmem:[#allocation2 + $0x38] sm:$0xff]  ;;  %v6816_v7 = vld [vmem:[#allocation2 + $0x20] sm:$0xff]  ;;  %v6818_v8 = vld [vmem:[#allocation2 + $0x30] sm:$0xff] }
 0x9a3   :  { %7099 = vmatpush1.bf16.msra.mxu0 %v6812_v31  ;;  %7263 = vmatpush1.bf16.msra.mxu1 %v6814_v2  ;;  %v6821_v9 = vld [vmem:[#allocation2 + $0x48] sm:$0xff]  ;;  %v6823_v10 = vld [vmem:[#allocation2 + $0x58] sm:$0xff]  ;;  %v6820_v42 = vld [vmem:[#allocation2 + $0x40] sm:$0xff] }
 0x9a4   :  { %7100 = vmatprep.subr.bf16.mxu0 %v6817_v21  ;;  %7264 = vmatprep.subr.bf16.mxu1 %v6819_v6  ;;  %v6822_v11 = vld [vmem:[#allocation2 + $0x50] sm:$0xff]  ;;  %v6825_v58 = vld [vmem:[#allocation2 + $0x68] sm:$0xff]  ;;  %v6827_v14 = vld [vmem:[#allocation2 + $0x78] sm:$0xff] }
 0x9a5   :  { %v6824_v15 = vld [vmem:[#allocation2 + $0x60] sm:$0xff]  ;;  %v6826_v16 = vld [vmem:[#allocation2 + $0x70] sm:$0xff]  ;;  %v6829_v20 = vld [vmem:[#allocation2 + $0x88] sm:$0xff] }
 0x9a6   :  { %v6831_v24 = vld [vmem:[#allocation2 + $0x98] sm:$0xff]  ;;  %v6828_v25 = vld [vmem:[#allocation2 + $0x80] sm:$0xff]  ;;  %v6830_v26 = vld [vmem:[#allocation2 + $0x90] sm:$0xff] }
 0x9a7   :  { %7101 = vmatpush1.bf16.msra.mxu0 %v6816_v7  ;;  %7265 = vmatpush1.bf16.msra.mxu1 %v6818_v8  ;;  %v6833_v27 = vld [vmem:[#allocation2 + $0xa8] sm:$0xff]  ;;  %v6835_v28 = vld [vmem:[#allocation2 + $0xb8] sm:$0xff]  ;;  %v6832_v34 = vld [vmem:[#allocation2 + $0xa0] sm:$0xff] }
 0x9a8   :  { %7102 = vmatprep.subr.bf16.mxu0 %v6821_v9  ;;  %7266 = vmatprep.subr.bf16.mxu1 %v6823_v10  ;;  %v6834_v35 = vld [vmem:[#allocation2 + $0xb0] sm:$0xff]  ;;  %v6837_v29 = vld [vmem:[#allocation2 + $0xc8] sm:$0xff]  ;;  %v6839_v30 = vld [vmem:[#allocation2 + $0xd8] sm:$0xff] }
 0x9a9   :  { %v6836_v32 = vld [vmem:[#allocation2 + $0xc0] sm:$0xff]  ;;  %v6838_v37 = vld [vmem:[#allocation2 + $0xd0] sm:$0xff]  ;;  %v6841_v40 = vld [vmem:[#allocation2 + $0xe8] sm:$0xff] }
 0x9aa   :  { %v6843_v43 = vld [vmem:[#allocation2 + $0xf8] sm:$0xff]  ;;  %v6840_v44 = vld [vmem:[#allocation2 + $0xe0] sm:$0xff]  ;;  %v6842_v45 = vld [vmem:[#allocation2 + $0xf0] sm:$0xff] }
 0x9ab   :  { %7103 = vmatpush1.bf16.msra.mxu0 %v6820_v42  ;;  %7267 = vmatpush1.bf16.msra.mxu1 %v6822_v11  ;;  %v6845_v47 = vld [vmem:[#allocation2 + $0x108] sm:$0xff]  ;;  %v6847_v38 = vld [vmem:[#allocation2 + $0x118] sm:$0xff]  ;;  %v6844_v51 = vld [vmem:[#allocation2 + $0x100] sm:$0xff] }
 0x9ac   :  { %7104 = vmatprep.subr.bf16.mxu0 %v6825_v58  ;;  %7268 = vmatprep.subr.bf16.mxu1 %v6827_v14  ;;  %v6846_v52 = vld [vmem:[#allocation2 + $0x110] sm:$0xff]  ;;  %v6849_v54 = vld [vmem:[#allocation2 + $0x128] sm:$0xff]  ;;  %v6851_v48 = vld [vmem:[#allocation2 + $0x138] sm:$0xff] }
 0x9ad   :  { %v6848_v49 = vld [vmem:[#allocation2 + $0x120] sm:$0xff]  ;;  %v6850_v61 = vld [vmem:[#allocation2 + $0x130] sm:$0xff]  ;;  %v6853_v62 = vld [vmem:[#allocation2 + $0x148] sm:$0xff] }
 0x9ae   :  { %v6855_v63 = vld [vmem:[#allocation2 + $0x158] sm:$0xff]  ;;  %v6852_v0 = vld [vmem:[#allocation2 + $0x140] sm:$0xff]  ;;  %v6854_v1 = vld [vmem:[#allocation2 + $0x150] sm:$0xff] }
 0x9af   :  { %7105 = vmatpush1.bf16.msra.mxu0 %v6824_v15  ;;  %7269 = vmatpush1.bf16.msra.mxu1 %v6826_v16  ;;  %v6857_v50 = vld [vmem:[#allocation2 + $0x168] sm:$0xff]  ;;  %v6859_v3 = vld [vmem:[#allocation2 + $0x178] sm:$0xff]  ;;  %v6856_v4 = vld [vmem:[#allocation2 + $0x160] sm:$0xff]  ;;  %v7068_v16 = vpack.c.bf16 %v10575_v36, %v10575_v36 }
 0x9b0   :  { %7106 = vmatprep.subr.bf16.mxu0 %v6829_v20  ;;  %7270 = vmatprep.subr.bf16.mxu1 %v6831_v24  ;;  %v6858_v33 = vld [vmem:[#allocation2 + $0x170] sm:$0xff]  ;;  %v6861_v22 = vld [vmem:[#allocation2 + $0x188] sm:$0xff]  ;;  %v6863_v5 = vld [vmem:[#allocation2 + $0x198] sm:$0xff] }
 0x9b1   :  { %v6860_v57 = vld [vmem:[#allocation2 + $0x180] sm:$0xff]  ;;  %v6862_v41 = vld [vmem:[#allocation2 + $0x190] sm:$0xff]  ;;  %v6865_v55 = vld [vmem:[#allocation2 + $0x1a8] sm:$0xff] }
 0x9b2   :  { %v6867_v31 = vld [vmem:[#allocation2 + $0x1b8] sm:$0xff]  ;;  %v6864_v2 = vld [vmem:[#allocation2 + $0x1a0] sm:$0xff]  ;;  %v6866_v21 = vld [vmem:[#allocation2 + $0x1b0] sm:$0xff] }
 0x9b3   :  { %7107 = vmatpush1.bf16.msra.mxu0 %v6828_v25  ;;  %7271 = vmatpush1.bf16.msra.mxu1 %v6830_v26  ;;  %v6869_v6 = vld [vmem:[#allocation2 + $0x1c8] sm:$0xff]  ;;  %v6871_v7 = vld [vmem:[#allocation2 + $0x1d8] sm:$0xff]  ;;  %v6868_v8 = vld [vmem:[#allocation2 + $0x1c0] sm:$0xff] }
 0x9b4   :  { %7108 = vmatprep.subr.bf16.mxu0 %v6833_v27  ;;  %7272 = vmatprep.subr.bf16.mxu1 %v6835_v28  ;;  %v6870_v9 = vld [vmem:[#allocation2 + $0x1d0] sm:$0xff]  ;;  %v6873_v10 = vld [vmem:[#allocation2 + $0x1e8] sm:$0xff]  ;;  %v6875_v42 = vld [vmem:[#allocation2 + $0x1f8] sm:$0xff]  ;;  %v7071_v27 = vpack.c.bf16 %v10589_v39, %v10589_v39 }
 0x9b5   :  { %v6872_v11 = vld [vmem:[#allocation2 + $0x1e0] sm:$0xff]  ;;  %v6874_v58 = vld [vmem:[#allocation2 + $0x1f0] sm:$0xff]  ;;  %v6877_v14 = vld [vmem:[#allocation2 + $0x208] sm:$0xff] }
 0x9b6   :  { %v6879_v15 = vld [vmem:[#allocation2 + $0x218] sm:$0xff]  ;;  %v6876_v20 = vld [vmem:[#allocation2 + $0x200] sm:$0xff]  ;;  %v6878_v24 = vld [vmem:[#allocation2 + $0x210] sm:$0xff] }
 0x9b7   :  { %7109 = vmatpush1.bf16.msra.mxu0 %v6832_v34  ;;  %7273 = vmatpush1.bf16.msra.mxu1 %v6834_v35  ;;  %v6881_v25 = vld [vmem:[#allocation2 + $0x228] sm:$0xff]  ;;  %v6883_v26 = vld [vmem:[#allocation2 + $0x238] sm:$0xff]  ;;  %v6880_v28 = vld [vmem:[#allocation2 + $0x220] sm:$0xff] }
 0x9b8   :  { %7110 = vmatprep.subr.bf16.mxu0 %v6837_v29  ;;  %7274 = vmatprep.subr.bf16.mxu1 %v6839_v30  ;;  %v6882_v34 = vld [vmem:[#allocation2 + $0x230] sm:$0xff]  ;;  %v6885_v36 = vld [vmem:[#allocation2 + $0x248] sm:$0xff]  ;;  %v6887_v35 = vld [vmem:[#allocation2 + $0x258] sm:$0xff] }
 0x9b9   :  { %v6884_v29 = vld [vmem:[#allocation2 + $0x240] sm:$0xff]  ;;  %v6886_v30 = vld [vmem:[#allocation2 + $0x250] sm:$0xff]  ;;  %v6891_v39 = vld [vmem:[#allocation2 + $0x278] sm:$0xff] }
 0x9bb   :  { %7111 = vmatpush1.bf16.msra.mxu0 %v6836_v32  ;;  %7275 = vmatpush1.bf16.msra.mxu1 %v6838_v37  ;;  %v6889_v32 = vld [vmem:[#allocation2 + $0x268] sm:$0xff]  ;;  %v6888_v37 = vld [vmem:[#allocation2 + $0x260] sm:$0xff] }
 0x9bc   :  { %7112 = vmatprep.subr.bf16.mxu0 %v6841_v40  ;;  %7276 = vmatprep.subr.bf16.mxu1 %v6843_v43  ;;  %v6890_v40 = vld [vmem:[#allocation2 + $0x270] sm:$0xff]  ;;  %v6893_v43 = vld [vmem:[#allocation2 + $0x288] sm:$0xff] }
 0x9bf   :  { %7113 = vmatpush1.bf16.msra.mxu0 %v6840_v44  ;;  %7277 = vmatpush1.bf16.msra.mxu1 %v6842_v45  ;;  %v6895_v44 = vld [vmem:[#allocation2 + $0x298] sm:$0xff]  ;;  %v6892_v45 = vld [vmem:[#allocation2 + $0x280] sm:$0xff] }
 0x9c0   :  { %7114 = vmatprep.subr.bf16.mxu0 %v6845_v47  ;;  %7278 = vmatprep.subr.bf16.mxu1 %v6847_v38  ;;  %v6894_v47 = vld [vmem:[#allocation2 + $0x290] sm:$0xff]  ;;  %v6897_v38 = vld [vmem:[#allocation2 + $0x2a8] sm:$0xff] }
 0x9c3   :  { %7115 = vmatpush1.bf16.msra.mxu0 %v6844_v51  ;;  %7279 = vmatpush1.bf16.msra.mxu1 %v6846_v52  ;;  %v6899_v51 = vld [vmem:[#allocation2 + $0x2b8] sm:$0xff]  ;;  %v6896_v52 = vld [vmem:[#allocation2 + $0x2a0] sm:$0xff] }
 0x9c4   :  { %7116 = vmatprep.subr.bf16.mxu0 %v6849_v54  ;;  %7280 = vmatprep.subr.bf16.mxu1 %v6851_v48  ;;  %v6898_v54 = vld [vmem:[#allocation2 + $0x2b0] sm:$0xff]  ;;  %v6901_v48 = vld [vmem:[#allocation2 + $0x2c8] sm:$0xff] }
 0x9c7   :  { %7117 = vmatpush1.bf16.msra.mxu0 %v6848_v49  ;;  %7281 = vmatpush1.bf16.msra.mxu1 %v6850_v61  ;;  %v6903_v49 = vld [vmem:[#allocation2 + $0x2d8] sm:$0xff]  ;;  %v6900_v61 = vld [vmem:[#allocation2 + $0x2c0] sm:$0xff] }
 0x9c8   :  { %7118 = vmatprep.subr.bf16.mxu0 %v6853_v62  ;;  %7282 = vmatprep.subr.bf16.mxu1 %v6855_v63  ;;  %v6902_v62 = vld [vmem:[#allocation2 + $0x2d0] sm:$0xff]  ;;  %v6905_v63 = vld [vmem:[#allocation2 + $0x2e8] sm:$0xff] }
 0x9cb   :  { %7119 = vmatpush1.bf16.msra.mxu0 %v6852_v0  ;;  %7283 = vmatpush1.bf16.msra.mxu1 %v6854_v1  ;;  %v6907_v0 = vld [vmem:[#allocation2 + $0x2f8] sm:$0xff]  ;;  %v6904_v1 = vld [vmem:[#allocation2 + $0x2e0] sm:$0xff] }
 0x9cc   :  { %7120 = vmatprep.subr.bf16.mxu0 %v6857_v50  ;;  %7284 = vmatprep.subr.bf16.mxu1 %v6859_v3  ;;  %v6906_v50 = vld [vmem:[#allocation2 + $0x2f0] sm:$0xff]  ;;  %v6909_v3 = vld [vmem:[#allocation2 + $0x308] sm:$0xff] }
 0x9cf   :  { %7121 = vmatpush1.bf16.msra.mxu0 %v6856_v4  ;;  %7285 = vmatpush1.bf16.msra.mxu1 %v6858_v33  ;;  %v6911_v4 = vld [vmem:[#allocation2 + $0x318] sm:$0xff]  ;;  %v6908_v33 = vld [vmem:[#allocation2 + $0x300] sm:$0xff] }
 0x9d0   :  { %7122 = vmatprep.subr.bf16.mxu0 %v6861_v22  ;;  %7286 = vmatprep.subr.bf16.mxu1 %v6863_v5  ;;  %v6910_v22 = vld [vmem:[#allocation2 + $0x310] sm:$0xff]  ;;  %v6913_v5 = vld [vmem:[#allocation2 + $0x328] sm:$0xff] }
 0x9d3   :  { %7123 = vmatpush1.bf16.msra.mxu0 %v6860_v57  ;;  %7287 = vmatpush1.bf16.msra.mxu1 %v6862_v41  ;;  %v6915_v57 = vld [vmem:[#allocation2 + $0x338] sm:$0xff]  ;;  %v6912_v41 = vld [vmem:[#allocation2 + $0x320] sm:$0xff] }
 0x9d4   :  { %7124 = vmatprep.subr.bf16.mxu0 %v6865_v55  ;;  %7288 = vmatprep.subr.bf16.mxu1 %v6867_v31  ;;  %v6914_v55 = vld [vmem:[#allocation2 + $0x330] sm:$0xff]  ;;  %v6917_v31 = vld [vmem:[#allocation2 + $0x348] sm:$0xff] }
 0x9d7   :  { %7125 = vmatpush1.bf16.msra.mxu0 %v6864_v2  ;;  %7289 = vmatpush1.bf16.msra.mxu1 %v6866_v21  ;;  %v6919_v2 = vld [vmem:[#allocation2 + $0x358] sm:$0xff]  ;;  %v6916_v21 = vld [vmem:[#allocation2 + $0x340] sm:$0xff] }
 0x9d8   :  { %7126 = vmatprep.subr.bf16.mxu0 %v6869_v6  ;;  %7290 = vmatprep.subr.bf16.mxu1 %v6871_v7  ;;  %v6918_v6 = vld [vmem:[#allocation2 + $0x350] sm:$0xff]  ;;  %v6921_v7 = vld [vmem:[#allocation2 + $0x368] sm:$0xff] }
 0x9db   :  { %7127 = vmatpush1.bf16.msra.mxu0 %v6868_v8  ;;  %7291 = vmatpush1.bf16.msra.mxu1 %v6870_v9  ;;  %v6923_v8 = vld [vmem:[#allocation2 + $0x378] sm:$0xff]  ;;  %v6920_v9 = vld [vmem:[#allocation2 + $0x360] sm:$0xff] }
 0x9dc   :  { %7128 = vmatprep.subr.bf16.mxu0 %v6873_v10  ;;  %7292 = vmatprep.subr.bf16.mxu1 %v6875_v42  ;;  %v6922_v10 = vld [vmem:[#allocation2 + $0x370] sm:$0xff]  ;;  %v6925_v42 = vld [vmem:[#allocation2 + $0x388] sm:$0xff] }
 0x9df   :  { %7129 = vmatpush1.bf16.msra.mxu0 %v6872_v11  ;;  %7293 = vmatpush1.bf16.msra.mxu1 %v6874_v58  ;;  %v6927_v11 = vld [vmem:[#allocation2 + $0x398] sm:$0xff]  ;;  %v6924_v58 = vld [vmem:[#allocation2 + $0x380] sm:$0xff] }
 0x9e0   :  { %7139 = vmatprep.subr.bf16.mxu0 %v6877_v14  ;;  %7303 = vmatprep.subr.bf16.mxu1 %v6879_v15  ;;  %v6926_v14 = vld [vmem:[#allocation2 + $0x390] sm:$0xff]  ;;  %v6929_v15 = vld [vmem:[#allocation2 + $0x3a8] sm:$0xff] }
 0x9e2   :  { %7131 = vmatmul.mubr.bf16.vlgmr.msra.gmra.mrb[16].mxu0 %v7068_v16  ;;  %7295 = vmatmul.mubr.bf16.vlgmr.msra.gmra.mrb[88].mxu1 %v7068_v16  ;;  %v6931_v16 = vld [vmem:[#allocation2 + $0x3b8] sm:$0xff] }
 0x9e3   :  { %7140 = vmatpush1.bf16.msra.mxu0 %v6876_v20  ;;  %7304 = vmatpush1.bf16.msra.mxu1 %v6878_v24  ;;  %v6928_v20 = vld [vmem:[#allocation2 + $0x3a0] sm:$0xff]  ;;  %v6930_v24 = vld [vmem:[#allocation2 + $0x3b0] sm:$0xff] }
 0x9e4   :  { %7141 = vmatprep.subr.bf16.mxu0 %v6881_v25  ;;  %7305 = vmatprep.subr.bf16.mxu1 %v6883_v26  ;;  %v6933_v25 = vld [vmem:[#allocation2 + $0x3c8] sm:$0xff]  ;;  %v6935_v26 = vld [vmem:[#allocation2 + $0x3d8] sm:$0xff] }
 0x9e5   :  { %7171 = vmatprep.mubr.bf16.mxu0 %v7071_v27  ;;  %7335 = vmatprep.mubr.bf16.mxu1 %v7071_v27  ;;  %v6932_v27 = vld [vmem:[#allocation2 + $0x3c0] sm:$0xff] }
 0x9e7   :  { %7142 = vmatpush1.bf16.msra.mxu0 %v6880_v28  ;;  %7306 = vmatpush1.bf16.msra.mxu1 %v6882_v34  ;;  %v6934_v28 = vld [vmem:[#allocation2 + $0x3d0] sm:$0xff]  ;;  %v6937_v34 = vld [vmem:[#allocation2 + $0x3e8] sm:$0xff] }
 0x9e8   :  { %7143 = vmatprep.subr.bf16.mxu0 %v6885_v36  ;;  %7307 = vmatprep.subr.bf16.mxu1 %v6887_v35  ;;  %v6939_v36 = vld [vmem:[#allocation2 + $0x3f8] sm:$0xff]  ;;  %v6936_v35 = vld [vmem:[#allocation2 + $0x3e0] sm:$0xff] }
 0x9eb   :  { %7144 = vmatpush1.bf16.msra.mxu0 %v6884_v29  ;;  %7308 = vmatpush1.bf16.msra.mxu1 %v6886_v30  ;;  %v6938_v29 = vld [vmem:[#allocation2 + $0x3f0] sm:$0xff]  ;;  %v6941_v30 = vld [vmem:[#allocation2 + $0x408] sm:$0xff] }
 0x9ec   :  { %7145 = vmatprep.subr.bf16.mxu0 %v6889_v32  ;;  %7309 = vmatprep.subr.bf16.mxu1 %v6891_v39  ;;  %v6943_v32 = vld [vmem:[#allocation2 + $0x418] sm:$0xff]  ;;  %v7070_v39 = vpack.c.bf16 %v10585_v46, %v10585_v46  ;;  %v6949_v46 = vld [vmem:[#allocation2 + $0x448] sm:$0xff] }
 0x9ef   :  { %7146 = vmatpush1.bf16.msra.mxu0 %v6888_v37  ;;  %7310 = vmatpush1.bf16.msra.mxu1 %v6890_v40  ;;  %v6940_v37 = vld [vmem:[#allocation2 + $0x400] sm:$0xff]  ;;  %v6942_v40 = vld [vmem:[#allocation2 + $0x410] sm:$0xff] }
 0x9f0   :  { %7147 = vmatprep.subr.bf16.mxu0 %v6893_v43  ;;  %7311 = vmatprep.subr.bf16.mxu1 %v6895_v44  ;;  %v6945_v43 = vld [vmem:[#allocation2 + $0x428] sm:$0xff]  ;;  %v6947_v44 = vld [vmem:[#allocation2 + $0x438] sm:$0xff] }
 0x9f3   :  { %7148 = vmatpush1.bf16.msra.mxu0 %v6892_v45  ;;  %7312 = vmatpush1.bf16.msra.mxu1 %v6894_v47  ;;  %v7073_v45 = vpack.c.bf16 %v10596_v60, %v10596_v60  ;;  %v6944_v47 = vld [vmem:[#allocation2 + $0x420] sm:$0xff]  ;;  %v6955_v60 = vld [vmem:[#allocation2 + $0x478] sm:$0xff] }
 0x9f4   :  { %7149 = vmatprep.subr.bf16.mxu0 %v6897_v38  ;;  %7313 = vmatprep.subr.bf16.mxu1 %v6899_v51  ;;  %v6946_v38 = vld [vmem:[#allocation2 + $0x430] sm:$0xff]  ;;  %v6951_v51 = vld [vmem:[#allocation2 + $0x458] sm:$0xff] }
 0x9f7   :  { %7150 = vmatpush1.bf16.msra.mxu0 %v6896_v52  ;;  %7314 = vmatpush1.bf16.msra.mxu1 %v6898_v54  ;;  %v6948_v52 = vld [vmem:[#allocation2 + $0x440] sm:$0xff]  ;;  %v6950_v54 = vld [vmem:[#allocation2 + $0x450] sm:$0xff] }
 0x9f8   :  { %7151 = vmatprep.subr.bf16.mxu0 %v6901_v48  ;;  %7315 = vmatprep.subr.bf16.mxu1 %v6903_v49  ;;  %v6953_v48 = vld [vmem:[#allocation2 + $0x468] sm:$0xff]  ;;  %v6952_v49 = vld [vmem:[#allocation2 + $0x460] sm:$0xff] }
 0x9fb   :  { %7152 = vmatpush1.bf16.msra.mxu0 %v6900_v61  ;;  %7316 = vmatpush1.bf16.msra.mxu1 %v6902_v62  ;;  %v6954_v61 = vld [vmem:[#allocation2 + $0x470] sm:$0xff]  ;;  %v6957_v62 = vld [vmem:[#allocation2 + $0x488] sm:$0xff] }
 0x9fc   :  { %7153 = vmatprep.subr.bf16.mxu0 %v6905_v63  ;;  %7317 = vmatprep.subr.bf16.mxu1 %v6907_v0  ;;  %v6959_v63 = vld [vmem:[#allocation2 + $0x498] sm:$0xff]  ;;  %v6956_v0 = vld [vmem:[#allocation2 + $0x480] sm:$0xff] }
 0x9ff   :  { %7154 = vmatpush1.bf16.msra.mxu0 %v6904_v1  ;;  %7318 = vmatpush1.bf16.msra.mxu1 %v6906_v50  ;;  %v6958_v1 = vld [vmem:[#allocation2 + $0x490] sm:$0xff]  ;;  %v6961_v50 = vld [vmem:[#allocation2 + $0x4a8] sm:$0xff] }
 0xa00   :  { %7155 = vmatprep.subr.bf16.mxu0 %v6909_v3  ;;  %7319 = vmatprep.subr.bf16.mxu1 %v6911_v4  ;;  %v6963_v3 = vld [vmem:[#allocation2 + $0x4b8] sm:$0xff]  ;;  %v6960_v4 = vld [vmem:[#allocation2 + $0x4a0] sm:$0xff] }
 0xa03   :  { %7156 = vmatpush1.bf16.msra.mxu0 %v6908_v33  ;;  %7320 = vmatpush1.bf16.msra.mxu1 %v6910_v22  ;;  %v6962_v33 = vld [vmem:[#allocation2 + $0x4b0] sm:$0xff]  ;;  %v6965_v22 = vld [vmem:[#allocation2 + $0x4c8] sm:$0xff] }
 0xa04   :  { %7157 = vmatprep.subr.bf16.mxu0 %v6913_v5  ;;  %7321 = vmatprep.subr.bf16.mxu1 %v6915_v57  ;;  %v6967_v5 = vld [vmem:[#allocation2 + $0x4d8] sm:$0xff]  ;;  %v6964_v57 = vld [vmem:[#allocation2 + $0x4c0] sm:$0xff] }
 0xa07   :  { %7158 = vmatpush1.bf16.msra.mxu0 %v6912_v41  ;;  %7322 = vmatpush1.bf16.msra.mxu1 %v6914_v55  ;;  %v6966_v41 = vld [vmem:[#allocation2 + $0x4d0] sm:$0xff]  ;;  %v6969_v55 = vld [vmem:[#allocation2 + $0x4e8] sm:$0xff] }
 0xa08   :  { %7159 = vmatprep.subr.bf16.mxu0 %v6917_v31  ;;  %7323 = vmatprep.subr.bf16.mxu1 %v6919_v2  ;;  %v6971_v31 = vld [vmem:[#allocation2 + $0x4f8] sm:$0xff]  ;;  %v6968_v2 = vld [vmem:[#allocation2 + $0x4e0] sm:$0xff] }
 0xa0b   :  { %7160 = vmatpush1.bf16.msra.mxu0 %v6916_v21  ;;  %7324 = vmatpush1.bf16.msra.mxu1 %v6918_v6  ;;  %v6970_v21 = vld [vmem:[#allocation2 + $0x4f0] sm:$0xff]  ;;  %v6973_v6 = vld [vmem:[#allocation2 + $0x508] sm:$0xff] }
 0xa0c   :  { %7161 = vmatprep.subr.bf16.mxu0 %v6921_v7  ;;  %7325 = vmatprep.subr.bf16.mxu1 %v6923_v8  ;;  %v6975_v7 = vld [vmem:[#allocation2 + $0x518] sm:$0xff]  ;;  %v6972_v8 = vld [vmem:[#allocation2 + $0x500] sm:$0xff] }
 0xa0f   :  { %7162 = vmatpush1.bf16.msra.mxu0 %v6920_v9  ;;  %7326 = vmatpush1.bf16.msra.mxu1 %v6922_v10  ;;  %v6974_v9 = vld [vmem:[#allocation2 + $0x510] sm:$0xff]  ;;  %v6977_v10 = vld [vmem:[#allocation2 + $0x528] sm:$0xff] }
 0xa10   :  { %7163 = vmatprep.subr.bf16.mxu0 %v6925_v42  ;;  %7327 = vmatprep.subr.bf16.mxu1 %v6927_v11  ;;  %v6979_v42 = vld [vmem:[#allocation2 + $0x538] sm:$0xff]  ;;  %v6976_v11 = vld [vmem:[#allocation2 + $0x520] sm:$0xff] }
 0xa13   :  { %7164 = vmatpush1.bf16.msra.mxu0 %v6924_v58  ;;  %7328 = vmatpush1.bf16.msra.mxu1 %v6926_v14  ;;  %v6978_v58 = vld [vmem:[#allocation2 + $0x530] sm:$0xff]  ;;  %v6981_v14 = vld [vmem:[#allocation2 + $0x548] sm:$0xff] }
 0xa14   :  { %7165 = vmatprep.subr.bf16.mxu0 %v6929_v15  ;;  %7329 = vmatprep.subr.bf16.mxu1 %v6931_v16  ;;  %v6983_v15 = vld [vmem:[#allocation2 + $0x558] sm:$0xff]  ;;  %v6980_v16 = vld [vmem:[#allocation2 + $0x540] sm:$0xff] }
 0xa17   :  { %7166 = vmatpush1.bf16.msra.mxu0 %v6928_v20  ;;  %7330 = vmatpush1.bf16.msra.mxu1 %v6930_v24  ;;  %v6982_v20 = vld [vmem:[#allocation2 + $0x550] sm:$0xff]  ;;  %v6985_v24 = vld [vmem:[#allocation2 + $0x568] sm:$0xff] }
 0xa18   :  { %7167 = vmatprep.subr.bf16.mxu0 %v6933_v25  ;;  %7331 = vmatprep.subr.bf16.mxu1 %v6935_v26  ;;  %v6987_v25 = vld [vmem:[#allocation2 + $0x578] sm:$0xff]  ;;  %v6984_v26 = vld [vmem:[#allocation2 + $0x560] sm:$0xff] }
 0xa1b   :  { %7168 = vmatpush1.bf16.msra.mxu0 %v6932_v27  ;;  %7332 = vmatpush1.bf16.msra.mxu1 %v6934_v28  ;;  %v6986_v27 = vld [vmem:[#allocation2 + $0x570] sm:$0xff]  ;;  %v6989_v28 = vld [vmem:[#allocation2 + $0x588] sm:$0xff] }
 0xa1c   :  { %7169 = vmatprep.subr.bf16.mxu0 %v6937_v34  ;;  %7333 = vmatprep.subr.bf16.mxu1 %v6939_v36  ;;  %v6991_v34 = vld [vmem:[#allocation2 + $0x598] sm:$0xff]  ;;  %v6988_v36 = vld [vmem:[#allocation2 + $0x580] sm:$0xff] }
 0xa1f   :  { %7170 = vmatpush1.bf16.msra.mxu0 %v6936_v35  ;;  %7334 = vmatpush1.bf16.msra.mxu1 %v6938_v29  ;;  %v6990_v35 = vld [vmem:[#allocation2 + $0x590] sm:$0xff]  ;;  %v6993_v29 = vld [vmem:[#allocation2 + $0x5a8] sm:$0xff] }
 0xa20   :  { %7180 = vmatprep.subr.bf16.mxu0 %v6941_v30  ;;  %7344 = vmatprep.subr.bf16.mxu1 %v6943_v32  ;;  %v6995_v30 = vld [vmem:[#allocation2 + $0x5b8] sm:$0xff]  ;;  %v6992_v32 = vld [vmem:[#allocation2 + $0x5a0] sm:$0xff] }
 0xa22   :  { %7172 = vmatmul.mubr.bf16.vlgmr.msra.gmra.mrb[16].mxu0 %v7070_v39  ;;  %7336 = vmatmul.mubr.bf16.vlgmr.msra.gmra.mrb[88].mxu1 %v7070_v39  ;;  %v6994_v39 = vld [vmem:[#allocation2 + $0x5b0] sm:$0xff] }
 0xa23   :  { %7181 = vmatpush1.bf16.msra.mxu0 %v6940_v37  ;;  %7345 = vmatpush1.bf16.msra.mxu1 %v6942_v40  ;;  %v6997_v37 = vld [vmem:[#allocation2 + $0x5c8] sm:$0xff]  ;;  %v6999_v40 = vld [vmem:[#allocation2 + $0x5d8] sm:$0xff] }
 0xa24   :  { %7182 = vmatprep.subr.bf16.mxu0 %v6945_v43  ;;  %7346 = vmatprep.subr.bf16.mxu1 %v6947_v44  ;;  %v6996_v43 = vld [vmem:[#allocation2 + $0x5c0] sm:$0xff]  ;;  %v6998_v44 = vld [vmem:[#allocation2 + $0x5d0] sm:$0xff] }
 0xa25   :  { %7212 = vmatprep.mubr.bf16.mxu0 %v7073_v45  ;;  %7376 = vmatprep.mubr.bf16.mxu1 %v7073_v45  ;;  %v7001_v45 = vld [vmem:[#allocation2 + $0x5e8] sm:$0xff] }
 0xa27   :  { %7183 = vmatpush1.bf16.msra.mxu0 %v6944_v47  ;;  %7347 = vmatpush1.bf16.msra.mxu1 %v6946_v38  ;;  %v7003_v47 = vld [vmem:[#allocation2 + $0x5f8] sm:$0xff]  ;;  %v7000_v38 = vld [vmem:[#allocation2 + $0x5e0] sm:$0xff] }
 0xa28   :  { %7184 = vmatprep.subr.bf16.mxu0 %v6949_v46  ;;  %7348 = vmatprep.subr.bf16.mxu1 %v6951_v51  ;;  %v7002_v46 = vld [vmem:[#allocation2 + $0x5f0] sm:$0xff]  ;;  %v7005_v51 = vld [vmem:[#allocation2 + $0x608] sm:$0xff] }
 0xa2b   :  { %7185 = vmatpush1.bf16.msra.mxu0 %v6948_v52  ;;  %7349 = vmatpush1.bf16.msra.mxu1 %v6950_v54  ;;  %v7007_v52 = vld [vmem:[#allocation2 + $0x618] sm:$0xff]  ;;  %v7072_v54 = vpack.c.bf16 %v10593_v53, %v10593_v53  ;;  %v7013_v53 = vld [vmem:[#allocation2 + $0x648] sm:$0xff] }
 0xa2c   :  { %7186 = vmatprep.subr.bf16.mxu0 %v6953_v48  ;;  %7350 = vmatprep.subr.bf16.mxu1 %v6955_v60  ;;  %v7004_v48 = vld [vmem:[#allocation2 + $0x600] sm:$0xff]  ;;  %v7006_v60 = vld [vmem:[#allocation2 + $0x610] sm:$0xff] }
 0xa2f   :  { %7187 = vmatpush1.bf16.msra.mxu0 %v6952_v49  ;;  %7351 = vmatpush1.bf16.msra.mxu1 %v6954_v61  ;;  %v7009_v49 = vld [vmem:[#allocation2 + $0x628] sm:$0xff]  ;;  %v7011_v61 = vld [vmem:[#allocation2 + $0x638] sm:$0xff] }
 0xa30   :  { %7188 = vmatprep.subr.bf16.mxu0 %v6957_v62  ;;  %7352 = vmatprep.subr.bf16.mxu1 %v6959_v63  ;;  %v7075_v62 = vpack.c.bf16 %v10602_v18, %v10602_v18  ;;  %v7008_v63 = vld [vmem:[#allocation2 + $0x620] sm:$0xff]  ;;  %v7019_v18 = vld [vmem:[#allocation2 + $0x678] sm:$0xff] }
 0xa33   :  { %7189 = vmatpush1.bf16.msra.mxu0 %v6956_v0  ;;  %7353 = vmatpush1.bf16.msra.mxu1 %v6958_v1  ;;  %v7010_v0 = vld [vmem:[#allocation2 + $0x630] sm:$0xff]  ;;  %v7015_v1 = vld [vmem:[#allocation2 + $0x658] sm:$0xff] }
 0xa34   :  { %7190 = vmatprep.subr.bf16.mxu0 %v6961_v50  ;;  %7354 = vmatprep.subr.bf16.mxu1 %v6963_v3  ;;  %v7012_v50 = vld [vmem:[#allocation2 + $0x640] sm:$0xff]  ;;  %v7014_v3 = vld [vmem:[#allocation2 + $0x650] sm:$0xff] }
 0xa37   :  { %7191 = vmatpush1.bf16.msra.mxu0 %v6960_v4  ;;  %7355 = vmatpush1.bf16.msra.mxu1 %v6962_v33  ;;  %v7017_v4 = vld [vmem:[#allocation2 + $0x668] sm:$0xff]  ;;  %v7016_v33 = vld [vmem:[#allocation2 + $0x660] sm:$0xff] }
 0xa38   :  { %7192 = vmatprep.subr.bf16.mxu0 %v6965_v22  ;;  %7356 = vmatprep.subr.bf16.mxu1 %v6967_v5  ;;  %v7018_v22 = vld [vmem:[#allocation2 + $0x670] sm:$0xff]  ;;  %v7021_v5 = vld [vmem:[#allocation2 + $0x688] sm:$0xff] }
 0xa3b   :  { %7193 = vmatpush1.bf16.msra.mxu0 %v6964_v57  ;;  %7357 = vmatpush1.bf16.msra.mxu1 %v6966_v41  ;;  %v7023_v57 = vld [vmem:[#allocation2 + $0x698] sm:$0xff]  ;;  %v7020_v41 = vld [vmem:[#allocation2 + $0x680] sm:$0xff] }
 0xa3c   :  { %7194 = vmatprep.subr.bf16.mxu0 %v6969_v55  ;;  %7358 = vmatprep.subr.bf16.mxu1 %v6971_v31  ;;  %v7022_v55 = vld [vmem:[#allocation2 + $0x690] sm:$0xff]  ;;  %v7025_v31 = vld [vmem:[#allocation2 + $0x6a8] sm:$0xff] }
 0xa3f   :  { %7195 = vmatpush1.bf16.msra.mxu0 %v6968_v2  ;;  %7359 = vmatpush1.bf16.msra.mxu1 %v6970_v21  ;;  %v7027_v2 = vld [vmem:[#allocation2 + $0x6b8] sm:$0xff]  ;;  %v7024_v21 = vld [vmem:[#allocation2 + $0x6a0] sm:$0xff] }
 0xa40   :  { %7196 = vmatprep.subr.bf16.mxu0 %v6973_v6  ;;  %7360 = vmatprep.subr.bf16.mxu1 %v6975_v7  ;;  %v7026_v6 = vld [vmem:[#allocation2 + $0x6b0] sm:$0xff]  ;;  %v7029_v7 = vld [vmem:[#allocation2 + $0x6c8] sm:$0xff] }
 0xa43   :  { %7197 = vmatpush1.bf16.msra.mxu0 %v6972_v8  ;;  %7361 = vmatpush1.bf16.msra.mxu1 %v6974_v9  ;;  %v7031_v8 = vld [vmem:[#allocation2 + $0x6d8] sm:$0xff]  ;;  %v7028_v9 = vld [vmem:[#allocation2 + $0x6c0] sm:$0xff] }
 0xa44   :  { %7198 = vmatprep.subr.bf16.mxu0 %v6977_v10  ;;  %7362 = vmatprep.subr.bf16.mxu1 %v6979_v42  ;;  %v7030_v10 = vld [vmem:[#allocation2 + $0x6d0] sm:$0xff]  ;;  %v7033_v42 = vld [vmem:[#allocation2 + $0x6e8] sm:$0xff] }
 0xa47   :  { %7199 = vmatpush1.bf16.msra.mxu0 %v6976_v11  ;;  %7363 = vmatpush1.bf16.msra.mxu1 %v6978_v58  ;;  %v7035_v11 = vld [vmem:[#allocation2 + $0x6f8] sm:$0xff]  ;;  %v7032_v58 = vld [vmem:[#allocation2 + $0x6e0] sm:$0xff] }
 0xa48   :  { %7200 = vmatprep.subr.bf16.mxu0 %v6981_v14  ;;  %7364 = vmatprep.subr.bf16.mxu1 %v6983_v15  ;;  %v7034_v14 = vld [vmem:[#allocation2 + $0x6f0] sm:$0xff]  ;;  %v7037_v15 = vld [vmem:[#allocation2 + $0x708] sm:$0xff] }
 0xa4b   :  { %7201 = vmatpush1.bf16.msra.mxu0 %v6980_v16  ;;  %7365 = vmatpush1.bf16.msra.mxu1 %v6982_v20  ;;  %v7039_v16 = vld [vmem:[#allocation2 + $0x718] sm:$0xff]  ;;  %v7036_v20 = vld [vmem:[#allocation2 + $0x700] sm:$0xff] }
 0xa4c   :  { %7202 = vmatprep.subr.bf16.mxu0 %v6985_v24  ;;  %7366 = vmatprep.subr.bf16.mxu1 %v6987_v25  ;;  %v7038_v24 = vld [vmem:[#allocation2 + $0x710] sm:$0xff]  ;;  %v7041_v25 = vld [vmem:[#allocation2 + $0x728] sm:$0xff] }
 0xa4f   :  { %7203 = vmatpush1.bf16.msra.mxu0 %v6984_v26  ;;  %7367 = vmatpush1.bf16.msra.mxu1 %v6986_v27  ;;  %v7043_v26 = vld [vmem:[#allocation2 + $0x738] sm:$0xff]  ;;  %v7040_v27 = vld [vmem:[#allocation2 + $0x720] sm:$0xff] }
 0xa50   :  { %7204 = vmatprep.subr.bf16.mxu0 %v6989_v28  ;;  %7368 = vmatprep.subr.bf16.mxu1 %v6991_v34  ;;  %v7042_v28 = vld [vmem:[#allocation2 + $0x730] sm:$0xff]  ;;  %v7045_v34 = vld [vmem:[#allocation2 + $0x748] sm:$0xff] }
 0xa53   :  { %7205 = vmatpush1.bf16.msra.mxu0 %v6988_v36  ;;  %7369 = vmatpush1.bf16.msra.mxu1 %v6990_v35  ;;  %v7047_v36 = vld [vmem:[#allocation2 + $0x758] sm:$0xff]  ;;  %v7044_v35 = vld [vmem:[#allocation2 + $0x740] sm:$0xff] }
 0xa54   :  { %7206 = vmatprep.subr.bf16.mxu0 %v6993_v29  ;;  %7370 = vmatprep.subr.bf16.mxu1 %v6995_v30  ;;  %v7046_v29 = vld [vmem:[#allocation2 + $0x750] sm:$0xff]  ;;  %v7049_v30 = vld [vmem:[#allocation2 + $0x768] sm:$0xff] }
 0xa57   :  { %7207 = vmatpush1.bf16.msra.mxu0 %v6992_v32  ;;  %7371 = vmatpush1.bf16.msra.mxu1 %v6994_v39  ;;  %v7051_v32 = vld [vmem:[#allocation2 + $0x778] sm:$0xff]  ;;  %v7048_v39 = vld [vmem:[#allocation2 + $0x760] sm:$0xff] }
 0xa58   :  { %7208 = vmatprep.subr.bf16.mxu0 %v6997_v37  ;;  %7372 = vmatprep.subr.bf16.mxu1 %v6999_v40  ;;  %v7050_v37 = vld [vmem:[#allocation2 + $0x770] sm:$0xff]  ;;  %v7053_v40 = vld [vmem:[#allocation2 + $0x788] sm:$0xff] }
 0xa5b   :  { %7209 = vmatpush1.bf16.msra.mxu0 %v6996_v43  ;;  %7373 = vmatpush1.bf16.msra.mxu1 %v6998_v44  ;;  %v7055_v43 = vld [vmem:[#allocation2 + $0x798] sm:$0xff]  ;;  %v7052_v44 = vld [vmem:[#allocation2 + $0x780] sm:$0xff] }
 0xa5c   :  { %7210 = vmatprep.subr.bf16.mxu0 %v7001_v45  ;;  %7374 = vmatprep.subr.bf16.mxu1 %v7003_v47  ;;  %v7054_v45 = vld [vmem:[#allocation2 + $0x790] sm:$0xff]  ;;  %v7057_v47 = vld [vmem:[#allocation2 + $0x7a8] sm:$0xff] }
 0xa5f   :  { %7211 = vmatpush1.bf16.msra.mxu0 %v7000_v38  ;;  %7375 = vmatpush1.bf16.msra.mxu1 %v7002_v46  ;;  %v7059_v38 = vld [vmem:[#allocation2 + $0x7b8] sm:$0xff]  ;;  %v7056_v46 = vld [vmem:[#allocation2 + $0x7a0] sm:$0xff] }
 0xa60   :  { %7221 = vmatprep.subr.bf16.mxu0 %v7005_v51  ;;  %7385 = vmatprep.subr.bf16.mxu1 %v7007_v52  ;;  %v7058_v51 = vld [vmem:[#allocation2 + $0x7b0] sm:$0xff]  ;;  %v7061_v52 = vld [vmem:[#allocation2 + $0x7c8] sm:$0xff] }
 0xa62   :  { %7213 = vmatmul.mubr.bf16.vlgmr.msra.gmra.mrb[16].mxu0 %v7072_v54  ;;  %7377 = vmatmul.mubr.bf16.vlgmr.msra.gmra.mrb[88].mxu1 %v7072_v54  ;;  %v7063_v54 = vld [vmem:[#allocation2 + $0x7d8] sm:$0xff] }
 0xa63   :  { %7222 = vmatpush1.bf16.msra.mxu0 %v7004_v48  ;;  %7386 = vmatpush1.bf16.msra.mxu1 %v7006_v60  ;;  %v7060_v48 = vld [vmem:[#allocation2 + $0x7c0] sm:$0xff]  ;;  %v7062_v60 = vld [vmem:[#allocation2 + $0x7d0] sm:$0xff] }
 0xa64   :  { %7223 = vmatprep.subr.bf16.mxu0 %v7009_v49  ;;  %7387 = vmatprep.subr.bf16.mxu1 %v7011_v61  ;;  %v7065_v49 = vld [vmem:[#allocation2 + $0x7e8] sm:$0xff]  ;;  %v7067_v61 = vld [vmem:[#allocation2 + $0x7f8] sm:$0xff] }
 0xa65   :  { %7253 = vmatprep.mubr.bf16.mxu0 %v7075_v62  ;;  %7417 = vmatprep.mubr.bf16.mxu1 %v7075_v62  ;;  %v7064_v62 = vld [vmem:[#allocation2 + $0x7e0] sm:$0xff] }
 0xa67   :  { %7224 = vmatpush1.bf16.msra.mxu0 %v7008_v63  ;;  %7388 = vmatpush1.bf16.msra.mxu1 %v7010_v0  ;;  %v7066_v63 = vld [vmem:[#allocation2 + $0x7f0] sm:$0xff]  ;;  %v7569_v0 = vld [vmem:[#allocation3 + $0x8] sm:$0xff] }
 0xa68   :  { %7225 = vmatprep.subr.bf16.mxu0 %v7013_v53  ;;  %7389 = vmatprep.subr.bf16.mxu1 %v7015_v1  ;;  %v7074_v53 = vpack.c.bf16 %v10599_v17, %v10599_v17  ;;  %v7568_v1 = vld [vmem:[#allocation3] sm:$0xff]  ;;  %v7577_v17 = vld [vmem:[#allocation3 + $0x48] sm:$0xff] }
 0xa6b   :  { %7226 = vmatpush1.bf16.msra.mxu0 %v7012_v50  ;;  %7390 = vmatpush1.bf16.msra.mxu1 %v7014_v3  ;;  %v7571_v50 = vld [vmem:[#allocation3 + $0x18] sm:$0xff]  ;;  %v7570_v3 = vld [vmem:[#allocation3 + $0x10] sm:$0xff] }
 0xa6c   :  { %7227 = vmatprep.subr.bf16.mxu0 %v7017_v4  ;;  %7391 = vmatprep.subr.bf16.mxu1 %v7019_v18  ;;  %v7573_v4 = vld [vmem:[#allocation3 + $0x28] sm:$0xff]  ;;  %v7572_v18 = vld [vmem:[#allocation3 + $0x20] sm:$0xff] }
 0xa6f   :  { %7228 = vmatpush1.bf16.msra.mxu0 %v7016_v33  ;;  %7392 = vmatpush1.bf16.msra.mxu1 %v7018_v22  ;;  %v7575_v33 = vld [vmem:[#allocation3 + $0x38] sm:$0xff]  ;;  %v7574_v22 = vld [vmem:[#allocation3 + $0x30] sm:$0xff] }
 0xa70   :  { %7229 = vmatprep.subr.bf16.mxu0 %v7021_v5  ;;  %7393 = vmatprep.subr.bf16.mxu1 %v7023_v57  ;;  %v7576_v5 = vld [vmem:[#allocation3 + $0x40] sm:$0xff]  ;;  %v7579_v57 = vld [vmem:[#allocation3 + $0x58] sm:$0xff] }
 0xa73   :  { %7230 = vmatpush1.bf16.msra.mxu0 %v7020_v41  ;;  %7394 = vmatpush1.bf16.msra.mxu1 %v7022_v55  ;;  %v7578_v41 = vld [vmem:[#allocation3 + $0x50] sm:$0xff]  ;;  %v7581_v55 = vld [vmem:[#allocation3 + $0x68] sm:$0xff] }
 0xa74   :  { %7231 = vmatprep.subr.bf16.mxu0 %v7025_v31  ;;  %7395 = vmatprep.subr.bf16.mxu1 %v7027_v2  ;;  %v7580_v31 = vld [vmem:[#allocation3 + $0x60] sm:$0xff]  ;;  %v7583_v2 = vld [vmem:[#allocation3 + $0x78] sm:$0xff] }
 0xa77   :  { %7232 = vmatpush1.bf16.msra.mxu0 %v7024_v21  ;;  %7396 = vmatpush1.bf16.msra.mxu1 %v7026_v6  ;;  %v7582_v21 = vld [vmem:[#allocation3 + $0x70] sm:$0xff]  ;;  %v7585_v6 = vld [vmem:[#allocation3 + $0x88] sm:$0xff] }
 0xa78   :  { %7233 = vmatprep.subr.bf16.mxu0 %v7029_v7  ;;  %7397 = vmatprep.subr.bf16.mxu1 %v7031_v8  ;;  %v7584_v7 = vld [vmem:[#allocation3 + $0x80] sm:$0xff]  ;;  %v7587_v8 = vld [vmem:[#allocation3 + $0x98] sm:$0xff] }
 0xa7b   :  { %7234 = vmatpush1.bf16.msra.mxu0 %v7028_v9  ;;  %7398 = vmatpush1.bf16.msra.mxu1 %v7030_v10  ;;  %v7586_v9 = vld [vmem:[#allocation3 + $0x90] sm:$0xff]  ;;  %v7589_v10 = vld [vmem:[#allocation3 + $0xa8] sm:$0xff] }
 0xa7c   :  { %7235 = vmatprep.subr.bf16.mxu0 %v7033_v42  ;;  %7399 = vmatprep.subr.bf16.mxu1 %v7035_v11  ;;  %v7588_v42 = vld [vmem:[#allocation3 + $0xa0] sm:$0xff]  ;;  %v7591_v11 = vld [vmem:[#allocation3 + $0xb8] sm:$0xff] }
 0xa7f   :  { %7236 = vmatpush1.bf16.msra.mxu0 %v7032_v58  ;;  %7400 = vmatpush1.bf16.msra.mxu1 %v7034_v14  ;;  %v7590_v58 = vld [vmem:[#allocation3 + $0xb0] sm:$0xff]  ;;  %v7593_v14 = vld [vmem:[#allocation3 + $0xc8] sm:$0xff] }
 0xa80   :  { %7237 = vmatprep.subr.bf16.mxu0 %v7037_v15  ;;  %7401 = vmatprep.subr.bf16.mxu1 %v7039_v16  ;;  %v7592_v15 = vld [vmem:[#allocation3 + $0xc0] sm:$0xff]  ;;  %v7595_v16 = vld [vmem:[#allocation3 + $0xd8] sm:$0xff] }
 0xa83   :  { %7238 = vmatpush1.bf16.msra.mxu0 %v7036_v20  ;;  %7402 = vmatpush1.bf16.msra.mxu1 %v7038_v24  ;;  %v7594_v20 = vld [vmem:[#allocation3 + $0xd0] sm:$0xff]  ;;  %v7597_v24 = vld [vmem:[#allocation3 + $0xe8] sm:$0xff] }
 0xa84   :  { %7239 = vmatprep.subr.bf16.mxu0 %v7041_v25  ;;  %7403 = vmatprep.subr.bf16.mxu1 %v7043_v26  ;;  %v7596_v25 = vld [vmem:[#allocation3 + $0xe0] sm:$0xff]  ;;  %v7599_v26 = vld [vmem:[#allocation3 + $0xf8] sm:$0xff] }
 0xa87   :  { %7240 = vmatpush1.bf16.msra.mxu0 %v7040_v27  ;;  %7404 = vmatpush1.bf16.msra.mxu1 %v7042_v28  ;;  %v7598_v27 = vld [vmem:[#allocation3 + $0xf0] sm:$0xff]  ;;  %v7601_v28 = vld [vmem:[#allocation3 + $0x108] sm:$0xff] }
 0xa88   :  { %7241 = vmatprep.subr.bf16.mxu0 %v7045_v34  ;;  %7405 = vmatprep.subr.bf16.mxu1 %v7047_v36  ;;  %v7076_v34 = vld [vmem:[%s11299_s5] sm:$0xf] }
 0xa89   :  { %v7081_v36 = vrot.slane %v7076_v34, %v10546_v56 }
 0xa8b   :  { %7242 = vmatpush1.bf16.msra.mxu0 %v7044_v35  ;;  %7406 = vmatpush1.bf16.msra.mxu1 %v7046_v29  ;;  %v7089_v35 = vrot.slane %v7076_v34, %v10563_v19  ;;  %v7085_v29 = vrot.slane %v7076_v34, %v10554_v59 }
 0xa8c   :  { %7243 = vmatprep.subr.bf16.mxu0 %v7049_v30  ;;  %7407 = vmatprep.subr.bf16.mxu1 %v7051_v32  ;;  %v7093_v30 = vrot.slane %v7076_v34, %v10566_v23 }
 0xa8f   :  { %7244 = vmatpush1.bf16.msra.mxu0 %v7048_v39  ;;  %7408 = vmatpush1.bf16.msra.mxu1 %v7050_v37 }
 0xa90   :  { %7245 = vmatprep.subr.bf16.mxu0 %v7053_v40  ;;  %7409 = vmatprep.subr.bf16.mxu1 %v7055_v43 }
 0xa93   :  { %7246 = vmatpush1.bf16.msra.mxu0 %v7052_v44  ;;  %7410 = vmatpush1.bf16.msra.mxu1 %v7054_v45 }
 0xa94   :  { %7247 = vmatprep.subr.bf16.mxu0 %v7057_v47  ;;  %7411 = vmatprep.subr.bf16.mxu1 %v7059_v38 }
 0xa97   :  { %7248 = vmatpush1.bf16.msra.mxu0 %v7056_v46  ;;  %7412 = vmatpush1.bf16.msra.mxu1 %v7058_v51 }
 0xa98   :  { %7249 = vmatprep.subr.bf16.mxu0 %v7061_v52  ;;  %7413 = vmatprep.subr.bf16.mxu1 %v7063_v54 }
 0xa9b   :  { %7250 = vmatpush1.bf16.msra.mxu0 %v7060_v48  ;;  %7414 = vmatpush1.bf16.msra.mxu1 %v7062_v60 }
 0xa9c   :  { %7251 = vmatprep.subr.bf16.mxu0 %v7065_v49  ;;  %7415 = vmatprep.subr.bf16.mxu1 %v7067_v61 }
 0xa9f   :  { %7252 = vmatpush1.bf16.msra.mxu0 %v7064_v62  ;;  %7416 = vmatpush1.bf16.msra.mxu1 %v7066_v63 }
 0xaa0   :  { %7648 = vmatprep.subr.bf16.mxu0 %v7569_v0 }
 0xaa2   :  { %7254 = vmatmul.mubr.bf16.vlgmr.msra.gmra.mrb[16].mxu0 %v7074_v53  ;;  %7418 = vmatmul.mubr.bf16.vlgmr.msra.gmra.mrb[88].mxu1 %v7074_v53 }
 0xaa3   :  { %7649 = vmatpush1.bf16.msra.mxu0 %v7568_v1 }
 0xaa4   :  { %7650 = vmatprep.subr.bf16.mxu0 %v7571_v50 }
 0xaa7   :  { %7651 = vmatpush1.bf16.msra.mxu0 %v7570_v3 }
 0xaa8   :  { %7652 = vmatprep.subr.bf16.mxu0 %v7573_v4 }
 0xaab   :  { %7653 = vmatpush1.bf16.msra.mxu0 %v7572_v18 }
 0xaac   :  { %7654 = vmatprep.subr.bf16.mxu0 %v7575_v33 }
 0xaaf   :  { %7655 = vmatpush1.bf16.msra.mxu0 %v7574_v22 }
 0xab0   :  { %7656 = vmatprep.subr.bf16.mxu0 %v7577_v17 }
 0xab3   :  { %7657 = vmatpush1.bf16.msra.mxu0 %v7576_v5 }
 0xab4   :  { %7658 = vmatprep.subr.bf16.mxu0 %v7579_v57 }
 0xab7   :  { %7659 = vmatpush1.bf16.msra.mxu0 %v7578_v41 }
 0xab8   :  { %7660 = vmatprep.subr.bf16.mxu0 %v7581_v55 }
 0xabb   :  { %7661 = vmatpush1.bf16.msra.mxu0 %v7580_v31 }
 0xabc   :  { %7662 = vmatprep.subr.bf16.mxu0 %v7583_v2 }
 0xabf   :  { %7663 = vmatpush1.bf16.msra.mxu0 %v7582_v21 }
 0xac0   :  { %7664 = vmatprep.subr.bf16.mxu0 %v7585_v6 }
 0xac3   :  { %7665 = vmatpush1.bf16.msra.mxu0 %v7584_v7 }
 0xac4   :  { %7666 = vmatprep.subr.bf16.mxu0 %v7587_v8 }
 0xac7   :  { %7667 = vmatpush1.bf16.msra.mxu0 %v7586_v9 }
 0xac8   :  { %7668 = vmatprep.subr.bf16.mxu0 %v7589_v10 }
 0xacb   :  { %7669 = vmatpush1.bf16.msra.mxu0 %v7588_v42 }
 0xacc   :  { %7670 = vmatprep.subr.bf16.mxu0 %v7591_v11 }
 0xacf   :  { %7671 = vmatpush1.bf16.msra.mxu0 %v7590_v58 }
 0xad0   :  { %7672 = vmatprep.subr.bf16.mxu0 %v7593_v14 }
 0xad3   :  { %7673 = vmatpush1.bf16.msra.mxu0 %v7592_v15 }
 0xad4   :  { %7674 = vmatprep.subr.bf16.mxu0 %v7595_v16 }
 0xad7   :  { %7675 = vmatpush1.bf16.msra.mxu0 %v7594_v20 }
 0xad8   :  { %7676 = vmatprep.subr.bf16.mxu0 %v7597_v24 }
 0xadb   :  { %7677 = vmatpush1.bf16.msra.mxu0 %v7596_v25 }
 0xadc   :  { %7678 = vmatprep.subr.bf16.mxu0 %v7599_v26 }
 0xadf   :  { %7679 = vmatpush1.bf16.msra.mxu0 %v7598_v27 }
 0xae0   :  { %7689 = vmatprep.subr.bf16.mxu0 %v7601_v28 }
 0xb75   :  { %v7255_v32 = vpop.f32.mrb[16].mxu0  ;;  %v7419_v39 = vpop.f32.mrb[88].mxu1 }
 0xb76   :  { %v8437_v37 = vadd.f32 %v7255_v32, %v7081_v36  ;;  %v8439_v40 = vadd.f32 %v7419_v39, %v7089_v35  ;;  %v7257_v43 = vpop.f32.mrb[17].mxu0  ;;  %v7421_v44 = vpop.f32.mrb[89].mxu1 }
 0xb77   :  { %v8438_v45 = vadd.f32 %v7257_v43, %v7085_v29  ;;  %v8440_v47 = vadd.f32 %v7421_v44, %v7093_v30  ;;  %v7259_v38 = vpop.f32.mrb[18].mxu0  ;;  %v7423_v46 = vpop.f32.mrb[90].mxu1 }
 0xb78   :  { %v7427_v51 = vsel %vm7426_vm4, %v8437_v37, 0.0  ;;  %v7441_v52 = vsel %vm7426_vm4, %v8439_v40, 0.0  ;;  %v7260_v54 = vpop.f32.mrb[19].mxu0  ;;  %v7424_v48 = vpop.f32.mrb[91].mxu1 }
 0xb79   :  { %v7428_v60 = vrot.slane %v7427_v51, 4  ;;  %v7442_v49 = vrot.slane %v7441_v52, 4  ;;  %v7434_v61 = vsel %vm7426_vm4, %v8438_v45, 0.0  ;;  %v7448_v62 = vsel %vm7426_vm4, %v8440_v47, 0.0 }
 0xb7a   :  { %v7435_v63 = vrot.slane %v7434_v61, 4  ;;  %v7449_v0 = vrot.slane %v7448_v62, 4 }
 0xb7b   :  { %v7429_v53 = vadd.f32 %v7428_v60, %v7427_v51  ;;  %v7443_v1 = vadd.f32 %v7442_v49, %v7441_v52 }
 0xb7c   :  { %v7436_v50 = vadd.f32 %v7435_v63, %v7434_v61  ;;  %v7450_v3 = vadd.f32 %v7449_v0, %v7448_v62 }
 0xb7d   :  { %v7430_v4 = vrot.slane %v7429_v53, 2  ;;  %v7444_v18 = vrot.slane %v7443_v1, 2 }
 0xb7e   :  { %v7437_v33 = vrot.slane %v7436_v50, 2  ;;  %v7451_v22 = vrot.slane %v7450_v3, 2 }
 0xb7f   :  { %v7431_v17 = vadd.f32 %v7430_v4, %v7429_v53  ;;  %v7445_v5 = vadd.f32 %v7444_v18, %v7443_v1 }
 0xb80   :  { %v7438_v57 = vadd.f32 %v7437_v33, %v7436_v50  ;;  %v7452_v41 = vadd.f32 %v7451_v22, %v7450_v3 }
 0xb81   :  { %v7432_v55 = vrot.slane %v7431_v17, 1  ;;  %v7446_v31 = vrot.slane %v7445_v5, 1 }
 0xb82   :  { %v7439_v2 = vrot.slane %v7438_v57, 1  ;;  %v7453_v21 = vrot.slane %v7452_v41, 1 }
 0xb83   :  { %v7433_v6 = vadd.f32 %v7432_v55, %v7431_v17  ;;  %v7447_v7 = vadd.f32 %v7446_v31, %v7445_v5 }
 0xb84   :  { %v7440_v8 = vadd.f32 %v7439_v2, %v7438_v57  ;;  %v7454_v9 = vadd.f32 %v7453_v21, %v7452_v41  ;;  %v7512_v57 = vld [vmem:[%s11255_s11] sm:$0xf] }
 0xb85   :  { %v7456_v10 = vmul.f32 0.5, %v7433_v6  ;;  %v7458_v42 = vmul.f32 0.5, %v7447_v7  ;;  %v7538_v41 = vld [vmem:[%s11256_s12] sm:$0xf]  ;;  %v7517_v55 = vrot.slane %v7512_v57, %v10546_v56  ;;  %v7525_v2 = vrot.slane %v7512_v57, %v10563_v19 }
 0xb86   :  { %v7457_v11 = vmul.f32 0.5, %v7440_v8  ;;  %v7459_v58 = vmul.f32 0.5, %v7454_v9  ;;  %v7521_v7 = vrot.slane %v7512_v57, %v10554_v59  ;;  %v7543_v8 = vrot.slane %v7538_v41, %v10546_v56 }
 0xb87   :  { %v7460_v14 = vsub.f32 %v8437_v37, %v7456_v10  ;;  %v7462_v15 = vsub.f32 %v8439_v40, %v7458_v42  ;;  %v7529_v42 = vrot.slane %v7512_v57, %v10566_v23  ;;  %v7628_v57 = vld [vmem:[#allocation3 + $0x1e0] sm:$0xff] }
 0xb88   :  { %v7461_v16 = vsub.f32 %v8438_v45, %v7457_v11  ;;  %v11094_v20 = vsub.f32 %v8440_v47, %v7459_v58  ;;  %v7551_v11 = vrot.slane %v7538_v41, %v10563_v19 }
 0xb89   :  { %v7464_v24 = vmul.f32 %v7460_v14, %v7460_v14  ;;  %v7466_v25 = vmul.f32 %v7462_v15, %v7462_v15 }
 0xb8a   :  { %v7465_v26 = vmul.f32 %v7461_v16, %v7461_v16  ;;  %v7467_v27 = vmul.f32 %v11094_v20, %v11094_v20 }
 0xb8b   :  { %v7468_v28 = vsel %vm7426_vm4, %v7464_v24, 0.0  ;;  %v7482_v34 = vsel %vm7426_vm4, %v7466_v25, 0.0 }
 0xb8c   :  { %v7469_v36 = vrot.slane %v7468_v28, 4  ;;  %v7483_v35 = vrot.slane %v7482_v34, 4  ;;  %v7475_v29 = vsel %vm7426_vm4, %v7465_v26, 0.0  ;;  %v7489_v30 = vsel %vm7426_vm4, %v7467_v27, 0.0 }
 0xb8d   :  { %v7476_v32 = vrot.slane %v7475_v29, 4  ;;  %v7490_v39 = vrot.slane %v7489_v30, 4  ;;  %v7547_v26 = vrot.slane %v7538_v41, %v10554_v59 }
 0xb8e   :  { %v7470_v37 = vadd.f32 %v7469_v36, %v7468_v28  ;;  %v7484_v40 = vadd.f32 %v7483_v35, %v7482_v34 }
 0xb8f   :  { %v7477_v43 = vadd.f32 %v7476_v32, %v7475_v29  ;;  %v7491_v44 = vadd.f32 %v7490_v39, %v7489_v30 }
 0xb90   :  { %v7471_v45 = vrot.slane %v7470_v37, 2  ;;  %v7485_v47 = vrot.slane %v7484_v40, 2 }
 0xb91   :  { %v7478_v38 = vrot.slane %v7477_v43, 2  ;;  %v7492_v46 = vrot.slane %v7491_v44, 2 }
 0xb92   :  { %v7472_v51 = vadd.f32 %v7471_v45, %v7470_v37  ;;  %v7486_v52 = vadd.f32 %v7485_v47, %v7484_v40  ;;  %v7604_v45 = vld [vmem:[#allocation3 + $0x120] sm:$0xff]  ;;  %v7607_v47 = vld [vmem:[#allocation3 + $0x138] sm:$0xff] }
 0xb93   :  { %v7479_v54 = vadd.f32 %v7478_v38, %v7477_v43  ;;  %v7493_v48 = vadd.f32 %v7492_v46, %v7491_v44  ;;  %v7603_v44 = vld [vmem:[#allocation3 + $0x118] sm:$0xff]  ;;  %v7606_v38 = vld [vmem:[#allocation3 + $0x130] sm:$0xff]  ;;  %v7609_v46 = vld [vmem:[#allocation3 + $0x148] sm:$0xff] }
 0xb94   :  { %v7473_v60 = vrot.slane %v7472_v51, 1  ;;  %v7487_v49 = vrot.slane %v7486_v52, 1 }
 0xb95   :  { %v7480_v61 = vrot.slane %v7479_v54, 1  ;;  %v7494_v62 = vrot.slane %v7493_v48, 1 }
 0xb96   :  { %v7474_v63 = vadd.f32 %v7473_v60, %v7472_v51  ;;  %v7488_v0 = vadd.f32 %v7487_v49, %v7486_v52  ;;  %v7608_v51 = vld [vmem:[#allocation3 + $0x140] sm:$0xff]  ;;  %v7611_v52 = vld [vmem:[#allocation3 + $0x158] sm:$0xff] }
 0xb97   :  { %v7481_v53 = vadd.f32 %v7480_v61, %v7479_v54  ;;  %v7495_v1 = vadd.f32 %v7494_v62, %v7493_v48  ;;  %v7610_v54 = vld [vmem:[#allocation3 + $0x150] sm:$0xff]  ;;  %v7613_v48 = vld [vmem:[#allocation3 + $0x168] sm:$0xff]  ;;  %v7612_v60 = vld [vmem:[#allocation3 + $0x160] sm:$0xff] }
 0xb98   :  { %v7496_v50 = vmul.f32 0.5, %v7474_v63  ;;  %v7498_v3 = vmul.f32 0.5, %v7488_v0  ;;  %v7615_v49 = vld [vmem:[#allocation3 + $0x178] sm:$0xff]  ;;  %v7614_v61 = vld [vmem:[#allocation3 + $0x170] sm:$0xff]  ;;  %v7617_v62 = vld [vmem:[#allocation3 + $0x188] sm:$0xff] }
 0xb99   :  { %v7497_v4 = vmul.f32 0.5, %v7481_v53  ;;  %v7499_v18 = vmul.f32 0.5, %v7495_v1  ;;  %v7616_v63 = vld [vmem:[#allocation3 + $0x180] sm:$0xff]  ;;  %v7619_v0 = vld [vmem:[#allocation3 + $0x198] sm:$0xff]  ;;  %v7618_v53 = vld [vmem:[#allocation3 + $0x190] sm:$0xff] }
 0xb9a   :  { %v7500_v33 = vadd.f32 1e-05, %v7496_v50  ;;  %v7502_v22 = vadd.f32 1e-05, %v7498_v3  ;;  %v7621_v1 = vld [vmem:[#allocation3 + $0x1a8] sm:$0xff]  ;;  %v7620_v50 = vld [vmem:[#allocation3 + $0x1a0] sm:$0xff] }
 0xb9b   :  { %v7501_v17 = vadd.f32 1e-05, %v7497_v4  ;;  %v7503_v5 = vadd.f32 1e-05, %v7499_v18  ;;  %v7623_v3 = vld [vmem:[#allocation3 + $0x1b8] sm:$0xff]  ;;  %v7622_v4 = vld [vmem:[#allocation3 + $0x1b0] sm:$0xff] }
 0xb9c   :  { %8502 = vrsqrt.f32 %v7500_v33  ;;  %v7625_v18 = vld [vmem:[#allocation3 + $0x1c8] sm:$0xff]  ;;  %v7624_v33 = vld [vmem:[#allocation3 + $0x1c0] sm:$0xff] }
 0xb9d   :  { %8504 = vrsqrt.f32 %v7502_v22  ;;  %v7627_v22 = vld [vmem:[#allocation3 + $0x1d8] sm:$0xff] }
 0xb9e   :  { %8506 = vrsqrt.f32 %v7501_v17  ;;  %v7626_v17 = vld [vmem:[#allocation3 + $0x1d0] sm:$0xff] }
 0xb9f   :  { %8508 = vrsqrt.f32 %v7503_v5  ;;  %v7629_v5 = vld [vmem:[#allocation3 + $0x1e8] sm:$0xff] }
 0xba6   :  { %v8503_v31 = vpop.eup %8502 }
 0xba7   :  { %v8505_v21 = vpop.eup %8504  ;;  %v7508_v6 = vmul.f32 %v8503_v31, %v7460_v14  ;;  %v7555_v14 = vrot.slane %v7538_v41, %v10566_v23  ;;  %v7602_v23 = vld [vmem:[#allocation3 + $0x110] sm:$0xff]  ;;  %v7631_v41 = vld [vmem:[#allocation3 + $0x1f8] sm:$0xff] }
 0xba8   :  { %v8507_v9 = vpop.eup %8506  ;;  %v7510_v10 = vmul.f32 %v8505_v21, %v7462_v15  ;;  %v7818_v21 = vld [vmem:[%s11261_s17 + $0x80] sm:$0xff] }
 0xba9   :  { %v8509_v58 = vpop.eup %8508  ;;  %v7534_v24 = vmul.f32 %v7517_v55, %v7508_v6  ;;  %v7509_v25 = vmul.f32 %v8507_v9, %v7461_v16  ;;  %v7600_v16 = vld [vmem:[#allocation3 + $0x100] sm:$0xff]  ;;  %v7630_v55 = vld [vmem:[#allocation3 + $0x1f0] sm:$0xff]  ;;  %v7819_v6 = vld [vmem:[%s11261_s17 + $0x88] sm:$0xff] }
 0xbaa   :  { %v7536_v27 = vmul.f32 %v7525_v2, %v7510_v10  ;;  %v7511_v28 = vmul.f32 %v8509_v58, %v11094_v20  ;;  %v7605_v20 = vld [vmem:[#allocation3 + $0x128] sm:$0xff] }
 0xbab   :  { %v7535_v34 = vmul.f32 %v7521_v7, %v7509_v25  ;;  %v7560_v36 = vadd.f32 %v7543_v8, %v7534_v24  ;;  %v8405_v7 = vpack.c.bf16 %v7819_v6, %v7818_v21  ;;  %v7802_v8 = vld [vmem:[%s11261_s17] sm:$0xff]  ;;  %v7803_v9 = vld [vmem:[%s11261_s17 + $0x8] sm:$0xff]  ;;  %v7804_v24 = vld [vmem:[%s11261_s17 + $0x10] sm:$0xff] }
 0xbac   :  { %v7537_v35 = vmul.f32 %v7529_v42, %v7511_v28  ;;  %v11117_v29 = vadd.f32 %v7551_v11, %v7536_v27  ;;  %v8407_v10 = vpack.c.bf16 %v7803_v9, %v7802_v8  ;;  %v7820_v42 = vld [vmem:[%s11261_s17 + $0x90] sm:$0xff]  ;;  %v7821_v11 = vld [vmem:[%s11261_s17 + $0x98] sm:$0xff]  ;;  %v7822_v27 = vld [vmem:[%s11261_s17 + $0xa0] sm:$0xff] }
 0xbad   :  { %v7561_v15 = vadd.f32 %v7547_v26, %v7535_v34  ;;  %v7564_v30 = vmax.f32 %v7560_v36, 0.0  ;;  %8406 = vmatprep.subr.bf16.mxu1 %v8405_v7  ;;  %v8409_v58 = vpack.c.bf16 %v7821_v11, %v7820_v42  ;;  %v7805_v25 = vld [vmem:[%s11261_s17 + $0x18] sm:$0xff]  ;;  %v7823_v28 = vld [vmem:[%s11261_s17 + $0xa8] sm:$0xff]  ;;  %v7806_v34 = vld [vmem:[%s11261_s17 + $0x20] sm:$0xff] }
 0xbae   :  { %v7563_v32 = vadd.f32 %v7555_v14, %v7537_v35  ;;  %v7566_v31 = vmax.f32 %v11117_v29, 0.0  ;;  %8408 = vmatpush3.bf16.msra.mxu1 %v8407_v10  ;;  %v8411_v26 = vpack.c.bf16 %v7805_v25, %v7804_v24  ;;  %v8413_v14 = vpack.c.bf16 %v7823_v28, %v7822_v27  ;;  %v7807_v36 = vld [vmem:[%s11261_s17 + $0x28] sm:$0xff]  ;;  %v7824_v29 = vld [vmem:[%s11261_s17 + $0xb0] sm:$0xff] }
 0xbaf   :  { %v7565_v39 = vmax.f32 %v7561_v15, 0.0  ;;  %v7632_v40 = vpack.c.bf16 %v7564_v30, %v7564_v30  ;;  %8410 = vmatprep.subr.bf16.mxu1 %v8409_v58  ;;  %v8415_v35 = vpack.c.bf16 %v7807_v36, %v7806_v34  ;;  %v7825_v15 = vld [vmem:[%s11261_s17 + $0xb8] sm:$0xff] }
 0xbb0   :  { %v7567_v19 = vmax.f32 %v7563_v32, 0.0  ;;  %v7634_v2 = vpack.c.bf16 %v7566_v31, %v7566_v31  ;;  %v8417_v30 = vpack.c.bf16 %v7825_v15, %v7824_v29  ;;  %v7808_v32 = vld [vmem:[%s11261_s17 + $0x30] sm:$0xff] }
 0xbb1   :  { %v7633_v37 = vpack.c.bf16 %v7565_v39, %v7565_v39  ;;  %v7809_v39 = vld [vmem:[%s11261_s17 + $0x38] sm:$0xff] }
 0xbb2   :  { %v7635_v43 = vpack.c.bf16 %v7567_v19, %v7567_v19  ;;  %8412 = vmatpush3.bf16.msra.mxu1 %v8411_v26  ;;  %v8419_v19 = vpack.c.bf16 %v7809_v39, %v7808_v32 }
 0xbb3   :  { %7680 = vmatprep.mubr.bf16.mxu0 %v7633_v37  ;;  %8414 = vmatprep.subr.bf16.mxu1 %v8413_v14  ;;  %v7826_v37 = vld [vmem:[%s11261_s17 + $0xc0] sm:$0xff] }
 0xbb4   :  { %7681 = vmatmul.mubr.bf16.vlgmr.msra.gmra.mrb[20].mxu0 %v7632_v40  ;;  %v7827_v40 = vld [vmem:[%s11261_s17 + $0xc8] sm:$0xff] }
 0xbb5   :  { %7690 = vmatpush1.bf16.msra.mxu0 %v7600_v16  ;;  %7721 = vmatprep.mubr.bf16.mxu0 %v7635_v43  ;;  %v8421_v16 = vpack.c.bf16 %v7827_v40, %v7826_v37  ;;  %v7810_v43 = vld [vmem:[%s11261_s17 + $0x40] sm:$0xff] }
 0xbb6   :  { %7691 = vmatprep.subr.bf16.mxu0 %v7603_v44  ;;  %8416 = vmatpush3.bf16.msra.mxu1 %v8415_v35  ;;  %v7811_v44 = vld [vmem:[%s11261_s17 + $0x48] sm:$0xff] }
 0xbb7   :  { %8418 = vmatprep.subr.bf16.mxu1 %v8417_v30 }
 0xbb9   :  { %7692 = vmatpush1.bf16.msra.mxu0 %v7602_v23  ;;  %v8423_v23 = vpack.c.bf16 %v7811_v44, %v7810_v43 }
 0xbba   :  { %7693 = vmatprep.subr.bf16.mxu0 %v7605_v20  ;;  %8420 = vmatpush3.bf16.msra.mxu1 %v8419_v19  ;;  %v7828_v20 = vld [vmem:[%s11261_s17 + $0xd0] sm:$0xff] }
 0xbbb   :  { %8422 = vmatprep.subr.bf16.mxu1 %v8421_v16 }
 0xbbd   :  { %7694 = vmatpush1.bf16.msra.mxu0 %v7604_v45  ;;  %v7829_v45 = vld [vmem:[%s11261_s17 + $0xd8] sm:$0xff] }
 0xbbe   :  { %7695 = vmatprep.subr.bf16.mxu0 %v7607_v47  ;;  %8424 = vmatpush3.bf16.msra.mxu1 %v8423_v23  ;;  %v8425_v47 = vpack.c.bf16 %v7829_v45, %v7828_v20 }
 0xbc0   :  { %8426 = vmatprep.subr.bf16.mxu1 %v8425_v47 }
 0xbc1   :  { %7696 = vmatpush1.bf16.msra.mxu0 %v7606_v38  ;;  %v7812_v38 = vld [vmem:[%s11261_s17 + $0x50] sm:$0xff] }
 0xbc2   :  { %7697 = vmatprep.subr.bf16.mxu0 %v7609_v46  ;;  %v7813_v46 = vld [vmem:[%s11261_s17 + $0x58] sm:$0xff] }
 0xbc5   :  { %7698 = vmatpush1.bf16.msra.mxu0 %v7608_v51  ;;  %v8427_v51 = vpack.c.bf16 %v7813_v46, %v7812_v38 }
 0xbc6   :  { %7699 = vmatprep.subr.bf16.mxu0 %v7611_v52  ;;  %v7830_v52 = vld [vmem:[%s11261_s17 + $0xe0] sm:$0xff] }
 0xbc7   :  { %8428 = vmatpush3.bf16.msra.mxu1 %v8427_v51  ;;  %v7772_v51 = vld [vmem:[%s11259_s15] sm:$0x3] }
 0xbc9   :  { %7700 = vmatpush1.bf16.msra.mxu0 %v7610_v54  ;;  %v7831_v54 = vld [vmem:[%s11261_s17 + $0xe8] sm:$0xff] }
 0xbca   :  { %7701 = vmatprep.subr.bf16.mxu0 %v7613_v48  ;;  %v8429_v48 = vpack.c.bf16 %v7831_v54, %v7830_v52  ;;  %v7786_v52 = vld [vmem:[%s11260_s16] sm:$0x3]  ;;  %v7777_v54 = vrot.slane %v7772_v51, %v10546_v56 }
 0xbcc   :  { %8430 = vmatprep.subr.bf16.mxu1 %v8429_v48 }
 0xbcd   :  { %7702 = vmatpush1.bf16.msra.mxu0 %v7612_v60  ;;  %v7814_v60 = vld [vmem:[%s11261_s17 + $0x60] sm:$0xff] }
 0xbce   :  { %7703 = vmatprep.subr.bf16.mxu0 %v7615_v49  ;;  %v7815_v49 = vld [vmem:[%s11261_s17 + $0x68] sm:$0xff] }
 0xbd1   :  { %7704 = vmatpush1.bf16.msra.mxu0 %v7614_v61  ;;  %v8431_v61 = vpack.c.bf16 %v7815_v49, %v7814_v60  ;;  %v7781_v60 = vrot.slane %v7772_v51, %v10554_v59 }
 0xbd2   :  { %7705 = vmatprep.subr.bf16.mxu0 %v7617_v62  ;;  %v7832_v62 = vld [vmem:[%s11261_s17 + $0xf0] sm:$0xff] }
 0xbd3   :  { %8432 = vmatpush3.bf16.msra.mxu1 %v8431_v61 }
 0xbd5   :  { %7706 = vmatpush1.bf16.msra.mxu0 %v7616_v63  ;;  %v7833_v63 = vld [vmem:[%s11261_s17 + $0xf8] sm:$0xff] }
 0xbd6   :  { %7707 = vmatprep.subr.bf16.mxu0 %v7619_v0  ;;  %v7816_v0 = vld [vmem:[%s11261_s17 + $0x70] sm:$0xff] }
 0xbd9   :  { %7708 = vmatpush1.bf16.msra.mxu0 %v7618_v53  ;;  %v8433_v53 = vpack.c.bf16 %v7833_v63, %v7832_v62  ;;  %v7791_v62 = vrot.slane %v7786_v52, %v10546_v56 }
 0xbda   :  { %7709 = vmatprep.subr.bf16.mxu0 %v7621_v1  ;;  %v7817_v1 = vld [vmem:[%s11261_s17 + $0x78] sm:$0xff] }
 0xbdb   :  { %8434 = vmatprep.subr.bf16.mxu1 %v8433_v53 }
 0xbdd   :  { %7710 = vmatpush1.bf16.msra.mxu0 %v7620_v50  ;;  %v8435_v50 = vpack.c.bf16 %v7817_v1, %v7816_v0  ;;  %v7795_v0 = vrot.slane %v7786_v52, %v10554_v59 }
 0xbde   :  { %7711 = vmatprep.subr.bf16.mxu0 %v7623_v3  ;;  %v7636_v3 = vld [vmem:[%s11258_s14] sm:$0x3] }
 0xbdf   :  { %8436 = vmatpush3.bf16.msra.mxu1 %v8435_v50 }
 0xbe1   :  { %7712 = vmatpush1.bf16.msra.mxu0 %v7622_v4  ;;  %v7641_v4 = vrot.slane %v7636_v3, %v10546_v56 }
 0xbe2   :  { %7713 = vmatprep.subr.bf16.mxu0 %v7625_v18  ;;  %v7645_v18 = vrot.slane %v7636_v3, %v10554_v59 }
 0xbe5   :  { %7714 = vmatpush1.bf16.msra.mxu0 %v7624_v33 }
 0xbe6   :  { %7715 = vmatprep.subr.bf16.mxu0 %v7627_v22 }
 0xbe9   :  { %7716 = vmatpush1.bf16.msra.mxu0 %v7626_v17 }
 0xbea   :  { %7717 = vmatprep.subr.bf16.mxu0 %v7629_v5 }
 0xbed   :  { %7718 = vmatpush1.bf16.msra.mxu0 %v7628_v57 }
 0xbee   :  { %7719 = vmatprep.subr.bf16.mxu0 %v7631_v41 }
 0xbf1   :  { %7720 = vmatpush1.bf16.msra.mxu0 %v7630_v55 }
 0xbf4   :  { %7722 = vmatmul.mubr.bf16.vlgmr.msra.gmra.mrb[20].mxu0 %v7634_v2 }
 0xcc7   :  { %v7723_v33 = vpop.f32.mrb[20].mxu0 }
 0xcc8   :  { %v8441_v22 = vadd.f32 %v7723_v33, %v7641_v4  ;;  %v7725_v17 = vpop.f32.mrb[21].mxu0 }
 0xcc9   :  { %v8442_v5 = vadd.f32 %v7725_v17, %v7645_v18  ;;  %v7727_v57 = vpop.f32.mrb[22].mxu0 }
 0xcca   :  { %v7730_v41 = vsel %vm7426_vm4, %v8441_v22, 0.0  ;;  %v7728_v55 = vpop.f32.mrb[23].mxu0 }
 0xccb   :  { %v7731_v31 = vrot.slane %v7730_v41, 4  ;;  %v7737_v2 = vsel %vm7426_vm4, %v8442_v5, 0.0 }
 0xccc   :  { %v7738_v21 = vrot.slane %v7737_v2, 4 }
 0xccd   :  { %v7732_v6 = vadd.f32 %v7731_v31, %v7730_v41  ;;  %v7918_v31 = vrot.slane %v6310_v13, 6 }
 0xcce   :  { %v7739_v7 = vadd.f32 %v7738_v21, %v7737_v2 }
 0xccf   :  { %v7733_v8 = vrot.slane %v7732_v6, 2 }
 0xcd0   :  { %v7740_v9 = vrot.slane %v7739_v7, 2 }
 0xcd1   :  { %v7734_v10 = vadd.f32 %v7733_v8, %v7732_v6 }
 0xcd2   :  { %v7741_v42 = vadd.f32 %v7740_v9, %v7739_v7 }
 0xcd3   :  { %v7735_v11 = vrot.slane %v7734_v10, 1 }
 0xcd4   :  { %v7742_v58 = vrot.slane %v7741_v42, 1 }
 0xcd5   :  { %v7736_v24 = vadd.f32 %v7735_v11, %v7734_v10 }
 0xcd6   :  { %v7743_v25 = vadd.f32 %v7742_v58, %v7741_v42 }
 0xcd7   :  { %v7744_v26 = vmul.f32 0.5, %v7736_v24 }
 0xcd8   :  { %v7745_v27 = vmul.f32 0.5, %v7743_v25 }
 0xcd9   :  { %v7746_v28 = vsub.f32 %v8441_v22, %v7744_v26  ;;  %v8090_v22 = vld [vmem:[%s11262_s18] ss:$0 sm:$0xff] }
 0xcda   :  { %v7747_v14 = vsub.f32 %v8442_v5, %v7745_v27 }
 0xcdb   :  { %v7748_v34 = vmul.f32 %v7746_v28, %v7746_v28 }
 0xcdc   :  { %v7749_v36 = vmul.f32 %v7747_v14, %v7747_v14 }
 0xcdd   :  { %v7750_v35 = vsel %vm7426_vm4, %v7748_v34, 0.0 }
 0xcde   :  { %v7751_v29 = vrot.slane %v7750_v35, 4  ;;  %v7757_v15 = vsel %vm7426_vm4, %v7749_v36, 0.0 }
 0xcdf   :  { %v7758_v30 = vrot.slane %v7757_v15, 4 }
 0xce0   :  { %v7752_v32 = vadd.f32 %v7751_v29, %v7750_v35 }
 0xce1   :  { %v7759_v39 = vadd.f32 %v7758_v30, %v7757_v15 }
 0xce2   :  { %v7753_v19 = vrot.slane %v7752_v32, 2 }
 0xce3   :  { %v7760_v37 = vrot.slane %v7759_v39, 2 }
 0xce4   :  { %v7754_v40 = vadd.f32 %v7753_v19, %v7752_v32 }
 0xce5   :  { %v7761_v16 = vadd.f32 %v7760_v37, %v7759_v39 }
 0xce6   :  { %v7755_v43 = vrot.slane %v7754_v40, 1 }
 0xce7   :  { %v7762_v44 = vrot.slane %v7761_v16, 1 }
 0xce8   :  { %v7756_v23 = vadd.f32 %v7755_v43, %v7754_v40 }
 0xce9   :  { %v7763_v20 = vadd.f32 %v7762_v44, %v7761_v16 }
 0xcea   :  { %v7764_v45 = vmul.f32 0.5, %v7756_v23 }
 0xceb   :  { %v7765_v47 = vmul.f32 0.5, %v7763_v20 }
 0xcec   :  { %v7766_v38 = vadd.f32 1e-05, %v7764_v45 }
 0xced   :  { %v7767_v46 = vadd.f32 1e-05, %v7765_v47 }
 0xcee   :  { %8510 = vrsqrt.f32 %v7766_v38 }
 0xcef   :  { %8512 = vrsqrt.f32 %v7767_v46 }
 0xcf8   :  { %v8511_v48 = vpop.eup %8510 }
 0xcf9   :  { %v8513_v49 = vpop.eup %8512  ;;  %v7770_v61 = vmul.f32 %v8511_v48, %v7746_v28 }
 0xcfa   :  { %v7771_v63 = vmul.f32 %v8513_v49, %v7747_v14 }
 0xcfb   :  { %v7784_v53 = vmul.f32 %v7777_v54, %v7770_v61 }
 0xcfc   :  { %v7785_v1 = vmul.f32 %v7781_v60, %v7771_v63 }
 0xcfd   :  { %v7798_v50 = vadd.f32 %v7791_v62, %v7784_v53 }
 0xcfe   :  { %v7799_v3 = vadd.f32 %v7795_v0, %v7785_v1 }
 0xcff   :  { %v7800_v18 = vmax.f32 %v7798_v50, 0.0 }
 0xd00   :  { %v7801_v4 = vmax.f32 %v7799_v3, 0.0 }
 0xd02   :  { %7905 = vmatprep.mubr.f32.mxu1 %v7801_v4 }
 0xd03   :  { %7906 = vmatmul.mubr.f32.vlgmr.msra.gmra.mrb[92].mxu1 %v7800_v18 }
 0xdd6   :  { %v8189_v33 = vpop.f32.mrb[92].mxu1 }
 0xdd7   :  { %v8190_v17 = vpop.f32.mrb[93].mxu1 }
 0xdd8   :  { %v8191_v5 = vadd.f32 %v8190_v17, %v8189_v33 }
 0xdda   :  { %v7908_v57 = vadd.f32 %v8191_v5, %v8090_v22 }
 0xddc   :  { %v7911_v56 = vsub.f32 0.0, %v7908_v57 }
 0xdde   :  { %v7912_v41 = vmul.f32 1.442695, %v7911_v56 }
 0xde0   :  { %8514 = vpow2.f32 %v7912_v41 }
 0xdea   :  { %v8515_v59 = vpop.eup %8514 }
 0xdeb   :  { %v7914_v55 = vadd.f32 1.0, %v8515_v59 }
 0xded   :  { %8516 = vrcp.f32 %v7914_v55 }
 0xdf7   :  { %v8517_v2 = vpop.eup %8516 }
 0xdf8   :  { %v7920_v21 = vsel %vm7426_vm4, %v8517_v2, %v7918_v31 }
 0xdf9   :  { %7922 = vst.msk [vmem:[%s11270_s26] sm:$0x7] %vm7921_vm6, %v7920_v21 }
 0xdfa   :  { %7939 = vsyncmov [#allocation4] }
 0xdfd   :  { %s7940_s18 = vpop.sfrf %7939 }
 0xdfe   :  { %p8091_p0 = scmp.ne.s32.totalorder %s7940_s18, 0 }
 0xe00   :  { %7944 = shalt.err (%p8091_p0)  }
 0xe01   :  { %7946 = vsyncmov [#allocation4 + $0x1] }
 0xe04   :  { %s7947_s5 = vpop.sfrf %7946 }
 0xe05   :  { %p8092_p1 = scmp.ne.s32.totalorder %s7947_s5, 0 }
 0xe07   :  { %7951 = shalt.err (%p8092_p1)  }

</bundles_post_ra>
